<compile_context>
chip_gen: v6e
topology: v6e:2x2x1
jax: 0.10.0
libtpu: 0.0.40
codegen_flags: <defaults>
</compile_context>

<pallas_src>
import functools

import jax
import jax.numpy as jnp
from jax import lax
from jax.experimental import pallas as pl
from jax.experimental.pallas import tpu as pltpu


# ---------------------------------------------------------------------------
# Plain-JAX glue: dense convolutions, pixel shuffle (reference only).
# ---------------------------------------------------------------------------
def conv2d_nchw(x, w, b=None, padding=0, groups=1):
    out = lax.conv_general_dilated(
        x, w, window_strides=(1, 1),
        padding=[(padding, padding), (padding, padding)],
        dimension_numbers=("NCHW", "OIHW", "NCHW"),
        feature_group_count=groups,
        precision=lax.Precision.HIGHEST)
    if b is not None:
        out = out + b[None, :, None, None]
    return out


def pixel_shuffle(x, r):
    # out[b, c, h*r+i, w*r+j] = x[b, c*r*r + i*r + j, h, w]  (PyTorch semantics)
    b, cr2, h, w = x.shape
    c = cr2 // (r * r)
    x = x.reshape(b, c, r, r, h, w)
    x = jnp.transpose(x, (0, 1, 4, 2, 5, 3))
    return x.reshape(b, c, h * r, w * r)


# ---------------------------------------------------------------------------
# In-kernel helpers for the flattened-spatial (lane = H*W) layout
# ---------------------------------------------------------------------------
def _col_index(hw, w):
    """(1, hw) int32 array with the image column of each flattened position."""
    pos = lax.broadcasted_iota(jnp.int32, (1, hw), 1)
    if (w & (w - 1)) == 0:
        return jnp.bitwise_and(pos, w - 1)
    return pos % w


def _flat_shift(x, shift):
    """t[:, p] = x[:, p + shift] if 0 <= p + shift < n else 0 (static shift)."""
    if shift == 0:
        return x
    n = x.shape[-1]
    pad = jnp.zeros((x.shape[0], abs(shift)), x.dtype)
    if shift > 0:
        return jnp.concatenate([x[:, shift:], pad], axis=-1)
    return jnp.concatenate([pad, x[:, :n + shift]], axis=-1)


def _hshift_masked(x, dx, col, w):
    """Horizontal (column) shift by dx with zero fill at the image border."""
    if dx == 0:
        return x
    t = _flat_shift(x, dx)
    mask = jnp.logical_and(col + dx >= 0, col + dx < w)
    return jnp.where(mask, t, 0.0)


def _vshift(x, dy, w):
    """Vertical (row) shift by dy rows; zero fill handles the top/bottom edge."""
    return _flat_shift(x, dy * w)


# ---------------------------------------------------------------------------
# Pallas kernel 1: DetailEnhanceAttention (gate combine + depthwise 3x3 edge)
# ---------------------------------------------------------------------------
def dea_attention_kernel(wf_ref, gate_ref, ew_ref, out_ref, *, w):
    wf = wf_ref[0]                        # (Cm, H*W)  lane-dense
    gate = gate_ref[0]                    # (Cm, 1)
    ew = ew_ref[...]                      # (Cm, 9)
    hw = wf.shape[-1]
    col = _col_index(hw, w)

    # 3 horizontally shifted + border-masked copies, shared across the 3 rows.
    htaps = {dj: _hshift_masked(wf, dj, col, w) for dj in (-1, 0, 1)}

    acc = wf * gate
    for di in (-1, 0, 1):
        for dj in (-1, 0, 1):
            tap = _vshift(htaps[dj], di, w)
            idx = (di + 1) * 3 + (dj + 1)
            acc = acc + tap * ew[:, idx:idx + 1]        # (Cm,1) lane-broadcast
    out_ref[0] = acc


def dea_attention(wf_flat, gate, edge_w9, w):
    b, cm, hw = wf_flat.shape
    kernel = functools.partial(dea_attention_kernel, w=w)
    return pl.pallas_call(
        kernel,
        out_shape=jax.ShapeDtypeStruct((b, cm, hw), jnp.float32),
        grid=(b,),
        in_specs=[
            pl.BlockSpec((1, cm, hw), lambda i: (i, 0, 0)),
            pl.BlockSpec((1, cm, 1), lambda i: (i, 0, 0)),
            pl.BlockSpec((cm, 9), lambda i: (0, 0)),
        ],
        out_specs=pl.BlockSpec((1, cm, hw), lambda i: (i, 0, 0)),
        compiler_params=pltpu.CompilerParams(
            dimension_semantics=("parallel",),
            vmem_limit_bytes=32 * 1024 * 1024),
    )(wf_flat, gate, edge_w9)


# ---------------------------------------------------------------------------
# Pallas kernel 2: CARAFE (per-sub-pixel softmax + 25-tap reassembly)
# ---------------------------------------------------------------------------
def carafe_kernel(wenc_ref, x_ref, out_ref, *, w, k_up, scale):
    x = x_ref[0]                          # (C, H*W)   lane-dense, low-res
    hw = x.shape[-1]
    r2 = scale * scale
    half = k_up // 2
    col = _col_index(hw, w)

    # Un-normalized softmax weights + 1/Z per sub-pixel (normalization is
    # deferred to the small (C, HW) accumulator).
    exps, invz = [], []
    for s in range(r2):
        logits = wenc_ref[0, s]           # (k_up^2, H*W)
        m = jnp.max(logits, axis=0, keepdims=True)
        e = jnp.exp(logits - m)
        z = jnp.sum(e, axis=0, keepdims=True)
        exps.append(e)
        invz.append(1.0 / z)

    # 5 horizontally shifted + border-masked copies of X; the 25 taps are
    # derived from these by cheap vertical (row) shifts and shared by all
    # r^2 sub-pixel accumulators.
    htaps = {dj: _hshift_masked(x, dj, col, w) for dj in range(-half, half + 1)}

    accs = [None] * r2
    for ki in range(k_up):
        for kj in range(k_up):
            tap = _vshift(htaps[kj - half], ki - half, w)
            k = ki * k_up + kj
            for s in range(r2):
                contrib = tap * exps[s][k:k + 1, :]     # (1,HW) sublane-bcast
                accs[s] = contrib if accs[s] is None else accs[s] + contrib

    # Normalize once per sub-pixel and emit one dense (r^2*C, HW) store.
    out_ref[0] = jnp.concatenate([accs[s] * invz[s] for s in range(r2)], axis=0)


def carafe_reassemble(wenc_r, x_flat, w, k_up, scale):
    b, r2, k2, hw = wenc_r.shape
    c = x_flat.shape[1]
    kernel = functools.partial(carafe_kernel, w=w, k_up=k_up, scale=scale)
    return pl.pallas_call(
        kernel,
        out_shape=jax.ShapeDtypeStruct((b, r2 * c, hw), jnp.float32),
        grid=(b,),
        in_specs=[
            pl.BlockSpec((1, r2, k2, hw), lambda i: (i, 0, 0, 0)),
            pl.BlockSpec((1, c, hw), lambda i: (i, 0, 0)),
        ],
        out_specs=pl.BlockSpec((1, r2 * c, hw), lambda i: (i, 0, 0)),
        compiler_params=pltpu.CompilerParams(
            dimension_semantics=("parallel",),
            vmem_limit_bytes=32 * 1024 * 1024),
    )(wenc_r, x_flat)


# ---------------------------------------------------------------------------
# Full DEA_CARAFE forward
# ---------------------------------------------------------------------------
def dea_carafe_forward(X, params, *, scale=2, k_up=5):
    b, c, h, w = X.shape
    cm = params["w3"].shape[0]
    k2 = k_up * k_up
    r2 = scale * scale

    # comp_3x3 + comp_5x5 (dense convs -> XLA glue)
    W3 = conv2d_nchw(X, params["w3"], params["b3"], padding=1)
    W5 = conv2d_nchw(X, params["w5"], params["b5"], padding=2)
    Wf = W3 + W5                                              # (b, cm, h, w)

    # Squeeze-excite gate hoisted out of the Pallas grid (batched tiny matmuls)
    pooled = jnp.mean(Wf, axis=(2, 3))                        # (b, cm)
    a1 = jnp.dot(pooled, params["att_w1"].T,
                 precision=lax.Precision.HIGHEST) + params["att_b1"]
    gate = jax.nn.sigmoid(
        jnp.dot(a1, params["att_w2"].T,
                precision=lax.Precision.HIGHEST) + params["att_b2"])  # (b, cm)

    # Pallas kernel 1 (flat-lane layout)
    wf_att = dea_attention(Wf.reshape(b, cm, h * w),
                           gate[:, :, None],
                           params["edge_w"].reshape(cm, 9), w)
    Wf = wf_att.reshape(b, cm, h, w)

    # enc conv (dense conv -> XLA glue); channel index = k * r^2 + (i*r + j)
    Wenc = conv2d_nchw(Wf, params["enc_w"], None, padding=1)  # (b, r2*k2, h, w)
    wenc_r = Wenc.reshape(b, k2, r2, h, w)
    wenc_r = jnp.transpose(wenc_r, (0, 2, 1, 3, 4)).reshape(b, r2, k2, h * w)

    # Pallas kernel 2: works directly on X at low resolution -> no upsampled
    # or zero-padded tensors are materialized in HBM.
    out_flat = carafe_reassemble(wenc_r, X.reshape(b, c, h * w), w, k_up, scale)

    # Interleave the r^2 sub-pixel outputs (pixel-shuffle style):
    # out[b, c, u*r+i, v*r+j] = out_flat[b, (i*r+j)*C + c, u*w + v]
    out = out_flat.reshape(b, scale, scale, c, h, w)
    out = jnp.transpose(out, (0, 3, 4, 1, 5, 2))
    return out.reshape(b, c, h * scale, w * scale)


# ---------------------------------------------------------------------------
# Pure-JAX reference (upsample + unfold path, for correctness check)
# ---------------------------------------------------------------------------
def reference_forward(X, params, *, scale=2, k_up=5, reduction=8):
    b, c, h, w = X.shape
    h_, w_ = h * scale, w * scale
    c_mid = params["w3"].shape[0]

    W3 = conv2d_nchw(X, params["w3"], params["b3"], padding=1)
    W5 = conv2d_nchw(X, params["w5"], params["b5"], padding=2)
    Wf = W3 + W5

    pooled = jnp.mean(Wf, axis=(2, 3), keepdims=True)
    a1 = conv2d_nchw(pooled, params["att_w1"].reshape(c_mid // reduction, c_mid, 1, 1),
                     params["att_b1"], padding=0)
    a2 = jax.nn.sigmoid(
        conv2d_nchw(a1, params["att_w2"].reshape(c_mid, c_mid // reduction, 1, 1),
                    params["att_b2"], padding=0))
    edge = conv2d_nchw(Wf, params["edge_w"][:, None, :, :], None, padding=1, groups=c_mid)
    Wf = Wf * a2 + edge

    Wenc = conv2d_nchw(Wf, params["enc_w"], None, padding=1)
    Wps = pixel_shuffle(Wenc, scale)
    P = jax.nn.softmax(Wps, axis=1)

    Xup = jnp.repeat(jnp.repeat(X, scale, axis=2), scale, axis=3)
    pad = (k_up // 2) * scale
    Xpad = jnp.pad(Xup, ((0, 0), (0, 0), (pad, pad), (pad, pad)))
    taps = []
    for ki in range(k_up):
        for kj in range(k_up):
            taps.append(Xpad[:, :, ki * scale:ki * scale + h_, kj * scale:kj * scale + w_])
    Xk = jnp.stack(taps, axis=2)                      # (b, c, k_up^2, h_, w_)
    return jnp.einsum("bkhw,bckhw->bchw", P, Xk, precision=lax.Precision.HIGHEST)


# ---------------------------------------------------------------------------
# Deterministic parameter init (shapes from the PyTorch __init__)
# ---------------------------------------------------------------------------
def init_params(key, c, c_mid, k_up, scale, reduction=8):
    ks = jax.random.split(key, 10)
    s = 0.1
    n_up = (scale * k_up) ** 2
    return {
        "w3": s * jax.random.normal(ks[0], (c_mid, c, 3, 3), jnp.float32),
        "b3": s * jax.random.normal(ks[1], (c_mid,), jnp.float32),
        "w5": s * jax.random.normal(ks[2], (c_mid, c, 5, 5), jnp.float32),
        "b5": s * jax.random.normal(ks[3], (c_mid,), jnp.float32),
        "att_w1": s * jax.random.normal(ks[4], (c_mid // reduction, c_mid), jnp.float32),
        "att_b1": s * jax.random.normal(ks[5], (c_mid // reduction,), jnp.float32),
        "att_w2": s * jax.random.normal(ks[6], (c_mid, c_mid // reduction), jnp.float32),
        "att_b2": s * jax.random.normal(ks[7], (c_mid,), jnp.float32),
        "edge_w": s * jax.random.normal(ks[8], (c_mid, 3, 3), jnp.float32),
        "enc_w": s * jax.random.normal(ks[9], (n_up, c_mid, 3, 3), jnp.float32),
    }


if __name__ == "__main__":
    B, C, H, W = 2, 4, 16, 16
    C_MID, SCALE, K_UP = 64, 2, 5

    key = jax.random.PRNGKey(0)
    kx, kp = jax.random.split(key)
    X = jax.random.normal(kx, (B, C, H, W), jnp.float32)
    params = init_params(kp, C, C_MID, K_UP, SCALE)

    fwd = jax.jit(functools.partial(dea_carafe_forward, scale=SCALE, k_up=K_UP))
    out = jax.block_until_ready(fwd(X, params))

    assert out.shape == (B, C, H * SCALE, W * SCALE), out.shape

    ref = reference_forward(X, params, scale=SCALE, k_up=K_UP)
    max_err = float(jnp.max(jnp.abs(out - ref)))
    assert jnp.allclose(out, ref, rtol=5e-3, atol=5e-3), f"max abs err = {max_err}"

    print("KERNEL_OK")
</pallas_src>

<mosaic_0001>
module attributes {stable_mosaic.version = 11 : i64} {
  func.func @dea_attention_kernel(%arg0: i32, %arg1: memref<1x64x256xf32, #tpu.memory_space<vmem>>, %arg2: memref<1x64x1xf32, #tpu.memory_space<vmem>>, %arg3: memref<64x9xf32, #tpu.memory_space<vmem>>, %arg4: memref<1x64x256xf32, #tpu.memory_space<vmem>>) attributes {dimension_semantics = [#tpu.dimension_semantics<parallel>], iteration_bounds = array<i64: 2>, scalar_prefetch = 0 : i64, scratch_operands = 0 : i64, tpu.core_type = #tpu.core_type<tc>, window_params = [{transform_indices = @transform_0, window_bounds = array<i64: 1, 64, 256>}, {transform_indices = @transform_1, window_bounds = array<i64: 1, 64, 1>}, {pipeline_mode = #tpu.pipeline_mode<synchronous>, transform_indices = @transform_2, window_bounds = array<i64: 64, 9>}, {transform_indices = @transform_3, window_bounds = array<i64: 1, 64, 256>}]} {
    %c0 = arith.constant 0 : index
    %c0_0 = arith.constant 0 : index
    %c0_1 = arith.constant 0 : index
    %0 = vector.load %arg1[%c0, %c0_0, %c0_1] : memref<1x64x256xf32, #tpu.memory_space<vmem>>, vector<1x64x256xf32>
    %1 = vector.shape_cast %0 : vector<1x64x256xf32> to vector<64x256xf32>
    %c0_2 = arith.constant 0 : index
    %c0_3 = arith.constant 0 : index
    %c0_4 = arith.constant 0 : index
    %2 = vector.load %arg2[%c0_2, %c0_3, %c0_4] : memref<1x64x1xf32, #tpu.memory_space<vmem>>, vector<1x64x1xf32>
    %3 = vector.shape_cast %2 : vector<1x64x1xf32> to vector<64x1xf32>
    %c0_5 = arith.constant 0 : index
    %c0_6 = arith.constant 0 : index
    %4 = vector.load %arg3[%c0_5, %c0_6] : memref<64x9xf32, #tpu.memory_space<vmem>>, vector<64x9xf32>
    %5 = tpu.iota {dimensions = array<i32: 1>} : vector<1x256xi32>
    %c15_i32 = arith.constant 15 : i32
    %6 = vector.broadcast %c15_i32 : i32 to vector<1x256xi32>
    %7 = arith.andi %5, %6 : vector<1x256xi32>
    %cst = arith.constant 0.000000e+00 : f32
    %8 = vector.broadcast %cst : f32 to vector<64x1xf32>
    %9 = vector.extract_strided_slice %1 {offsets = [0, 0], sizes = [64, 255], strides = [1, 1]} : vector<64x256xf32> to vector<64x255xf32>
    %10 = tpu.concatenate %8, %9 in 1 : vector<64x1xf32>, vector<64x255xf32> -> vector<64x256xf32>
    %c-1_i32 = arith.constant -1 : i32
    %11 = vector.broadcast %c-1_i32 : i32 to vector<1x256xi32>
    %12 = arith.addi %7, %11 : vector<1x256xi32>
    %c0_i32 = arith.constant 0 : i32
    %13 = vector.broadcast %c0_i32 : i32 to vector<1x256xi32>
    %14 = arith.cmpi sge, %12, %13 : vector<1x256xi32>
    %c-1_i32_7 = arith.constant -1 : i32
    %15 = vector.broadcast %c-1_i32_7 : i32 to vector<1x256xi32>
    %16 = arith.addi %7, %15 : vector<1x256xi32>
    %c16_i32 = arith.constant 16 : i32
    %17 = vector.broadcast %c16_i32 : i32 to vector<1x256xi32>
    %18 = arith.cmpi slt, %16, %17 : vector<1x256xi32>
    %19 = arith.andi %14, %18 : vector<1x256xi1>
    %cst_8 = arith.constant 0.000000e+00 : f32
    %20 = vector.shape_cast %19 : vector<1x256xi1> to vector<1x256xi1>
    %21 = vector.broadcast %20 : vector<1x256xi1> to vector<64x256xi1>
    %22 = vector.broadcast %cst_8 : f32 to vector<64x256xf32>
    %23 = arith.select %21, %10, %22 : vector<64x256xi1>, vector<64x256xf32>
    %cst_9 = arith.constant 0.000000e+00 : f32
    %24 = vector.broadcast %cst_9 : f32 to vector<64x1xf32>
    %25 = vector.extract_strided_slice %1 {offsets = [0, 1], sizes = [64, 255], strides = [1, 1]} : vector<64x256xf32> to vector<64x255xf32>
    %26 = tpu.concatenate %25, %24 in 1 : vector<64x255xf32>, vector<64x1xf32> -> vector<64x256xf32>
    %c1_i32 = arith.constant 1 : i32
    %27 = vector.broadcast %c1_i32 : i32 to vector<1x256xi32>
    %28 = arith.addi %7, %27 : vector<1x256xi32>
    %c0_i32_10 = arith.constant 0 : i32
    %29 = vector.broadcast %c0_i32_10 : i32 to vector<1x256xi32>
    %30 = arith.cmpi sge, %28, %29 : vector<1x256xi32>
    %c1_i32_11 = arith.constant 1 : i32
    %31 = vector.broadcast %c1_i32_11 : i32 to vector<1x256xi32>
    %32 = arith.addi %7, %31 : vector<1x256xi32>
    %c16_i32_12 = arith.constant 16 : i32
    %33 = vector.broadcast %c16_i32_12 : i32 to vector<1x256xi32>
    %34 = arith.cmpi slt, %32, %33 : vector<1x256xi32>
    %35 = arith.andi %30, %34 : vector<1x256xi1>
    %cst_13 = arith.constant 0.000000e+00 : f32
    %36 = vector.shape_cast %35 : vector<1x256xi1> to vector<1x256xi1>
    %37 = vector.broadcast %36 : vector<1x256xi1> to vector<64x256xi1>
    %38 = vector.broadcast %cst_13 : f32 to vector<64x256xf32>
    %39 = arith.select %37, %26, %38 : vector<64x256xi1>, vector<64x256xf32>
    %40 = vector.broadcast %3 : vector<64x1xf32> to vector<64x256xf32>
    %41 = arith.mulf %1, %40 : vector<64x256xf32>
    %cst_14 = arith.constant 0.000000e+00 : f32
    %42 = vector.broadcast %cst_14 : f32 to vector<64x16xf32>
    %43 = vector.extract_strided_slice %23 {offsets = [0, 0], sizes = [64, 240], strides = [1, 1]} : vector<64x256xf32> to vector<64x240xf32>
    %44 = tpu.concatenate %42, %43 in 1 : vector<64x16xf32>, vector<64x240xf32> -> vector<64x256xf32>
    %45 = vector.extract_strided_slice %4 {offsets = [0, 0], sizes = [64, 1], strides = [1, 1]} : vector<64x9xf32> to vector<64x1xf32>
    %46 = vector.broadcast %45 : vector<64x1xf32> to vector<64x256xf32>
    %47 = arith.mulf %44, %46 : vector<64x256xf32>
    %48 = arith.addf %41, %47 : vector<64x256xf32>
    %cst_15 = arith.constant 0.000000e+00 : f32
    %49 = vector.broadcast %cst_15 : f32 to vector<64x16xf32>
    %50 = vector.extract_strided_slice %1 {offsets = [0, 0], sizes = [64, 240], strides = [1, 1]} : vector<64x256xf32> to vector<64x240xf32>
    %51 = tpu.concatenate %49, %50 in 1 : vector<64x16xf32>, vector<64x240xf32> -> vector<64x256xf32>
    %52 = vector.extract_strided_slice %4 {offsets = [0, 1], sizes = [64, 1], strides = [1, 1]} : vector<64x9xf32> to vector<64x1xf32>
    %53 = vector.broadcast %52 : vector<64x1xf32> to vector<64x256xf32>
    %54 = arith.mulf %51, %53 : vector<64x256xf32>
    %55 = arith.addf %48, %54 : vector<64x256xf32>
    %cst_16 = arith.constant 0.000000e+00 : f32
    %56 = vector.broadcast %cst_16 : f32 to vector<64x16xf32>
    %57 = vector.extract_strided_slice %39 {offsets = [0, 0], sizes = [64, 240], strides = [1, 1]} : vector<64x256xf32> to vector<64x240xf32>
    %58 = tpu.concatenate %56, %57 in 1 : vector<64x16xf32>, vector<64x240xf32> -> vector<64x256xf32>
    %59 = vector.extract_strided_slice %4 {offsets = [0, 2], sizes = [64, 1], strides = [1, 1]} : vector<64x9xf32> to vector<64x1xf32>
    %60 = vector.broadcast %59 : vector<64x1xf32> to vector<64x256xf32>
    %61 = arith.mulf %58, %60 : vector<64x256xf32>
    %62 = arith.addf %55, %61 : vector<64x256xf32>
    %63 = vector.extract_strided_slice %4 {offsets = [0, 3], sizes = [64, 1], strides = [1, 1]} : vector<64x9xf32> to vector<64x1xf32>
    %64 = vector.broadcast %63 : vector<64x1xf32> to vector<64x256xf32>
    %65 = arith.mulf %23, %64 : vector<64x256xf32>
    %66 = arith.addf %62, %65 : vector<64x256xf32>
    %67 = vector.extract_strided_slice %4 {offsets = [0, 4], sizes = [64, 1], strides = [1, 1]} : vector<64x9xf32> to vector<64x1xf32>
    %68 = vector.broadcast %67 : vector<64x1xf32> to vector<64x256xf32>
    %69 = arith.mulf %1, %68 : vector<64x256xf32>
    %70 = arith.addf %66, %69 : vector<64x256xf32>
    %71 = vector.extract_strided_slice %4 {offsets = [0, 5], sizes = [64, 1], strides = [1, 1]} : vector<64x9xf32> to vector<64x1xf32>
    %72 = vector.broadcast %71 : vector<64x1xf32> to vector<64x256xf32>
    %73 = arith.mulf %39, %72 : vector<64x256xf32>
    %74 = arith.addf %70, %73 : vector<64x256xf32>
    %cst_17 = arith.constant 0.000000e+00 : f32
    %75 = vector.broadcast %cst_17 : f32 to vector<64x16xf32>
    %76 = vector.extract_strided_slice %23 {offsets = [0, 16], sizes = [64, 240], strides = [1, 1]} : vector<64x256xf32> to vector<64x240xf32>
    %77 = tpu.concatenate %76, %75 in 1 : vector<64x240xf32>, vector<64x16xf32> -> vector<64x256xf32>
    %78 = vector.extract_strided_slice %4 {offsets = [0, 6], sizes = [64, 1], strides = [1, 1]} : vector<64x9xf32> to vector<64x1xf32>
    %79 = vector.broadcast %78 : vector<64x1xf32> to vector<64x256xf32>
    %80 = arith.mulf %77, %79 : vector<64x256xf32>
    %81 = arith.addf %74, %80 : vector<64x256xf32>
    %cst_18 = arith.constant 0.000000e+00 : f32
    %82 = vector.broadcast %cst_18 : f32 to vector<64x16xf32>
    %83 = vector.extract_strided_slice %1 {offsets = [0, 16], sizes = [64, 240], strides = [1, 1]} : vector<64x256xf32> to vector<64x240xf32>
    %84 = tpu.concatenate %83, %82 in 1 : vector<64x240xf32>, vector<64x16xf32> -> vector<64x256xf32>
    %85 = vector.extract_strided_slice %4 {offsets = [0, 7], sizes = [64, 1], strides = [1, 1]} : vector<64x9xf32> to vector<64x1xf32>
    %86 = vector.broadcast %85 : vector<64x1xf32> to vector<64x256xf32>
    %87 = arith.mulf %84, %86 : vector<64x256xf32>
    %88 = arith.addf %81, %87 : vector<64x256xf32>
    %cst_19 = arith.constant 0.000000e+00 : f32
    %89 = vector.broadcast %cst_19 : f32 to vector<64x16xf32>
    %90 = vector.extract_strided_slice %39 {offsets = [0, 16], sizes = [64, 240], strides = [1, 1]} : vector<64x256xf32> to vector<64x240xf32>
    %91 = tpu.concatenate %90, %89 in 1 : vector<64x240xf32>, vector<64x16xf32> -> vector<64x256xf32>
    %92 = vector.extract_strided_slice %4 {offsets = [0, 8], sizes = [64, 1], strides = [1, 1]} : vector<64x9xf32> to vector<64x1xf32>
    %93 = vector.broadcast %92 : vector<64x1xf32> to vector<64x256xf32>
    %94 = arith.mulf %91, %93 : vector<64x256xf32>
    %95 = arith.addf %88, %94 : vector<64x256xf32>
    %c0_20 = arith.constant 0 : index
    %c0_21 = arith.constant 0 : index
    %c0_22 = arith.constant 0 : index
    %96 = vector.load %arg4[%c0_20, %c0_21, %c0_22] : memref<1x64x256xf32, #tpu.memory_space<vmem>>, vector<1x64x256xf32>
    %97 = vector.shape_cast %96 : vector<1x64x256xf32> to vector<64x256xf32>
    %98 = vector.shape_cast %95 : vector<64x256xf32> to vector<1x64x256xf32>
    tpu.vector_store %arg4[%c0_20, %c0_21, %c0_22], %98 {strides = array<i32>} : memref<1x64x256xf32, #tpu.memory_space<vmem>>, vector<1x64x256xf32>,
    return
  }
  func.func @transform_0(%arg0: i32) -> (i32, i32, i32) {
    %c0_i32 = arith.constant 0 : i32
    %c0_i32_0 = arith.constant 0 : i32
    %c0_i32_1 = arith.constant 0 : i32
    return %arg0, %c0_i32, %c0_i32_0 : i32, i32, i32
  }
  func.func @transform_1(%arg0: i32) -> (i32, i32, i32) {
    %c0_i32 = arith.constant 0 : i32
    %c0_i32_0 = arith.constant 0 : i32
    %c0_i32_1 = arith.constant 0 : i32
    return %arg0, %c0_i32, %c0_i32_0 : i32, i32, i32
  }
  func.func @transform_2(%arg0: i32) -> (i32, i32) {
    %c0_i32 = arith.constant 0 : i32
    %c0_i32_0 = arith.constant 0 : i32
    %c0_i32_1 = arith.constant 0 : i32
    return %c0_i32, %c0_i32_0 : i32, i32
  }
  func.func @transform_3(%arg0: i32) -> (i32, i32, i32) {
    %c0_i32 = arith.constant 0 : i32
    %c0_i32_0 = arith.constant 0 : i32
    %c0_i32_1 = arith.constant 0 : i32
    return %arg0, %c0_i32, %c0_i32_0 : i32, i32, i32
  }
}

module attributes {stable_mosaic.version = 11 : i64} {
  func.func @carafe_kernel(%arg0: i32, %arg1: memref<1x4x25x256xf32, #tpu.memory_space<vmem>>, %arg2: memref<1x4x256xf32, #tpu.memory_space<vmem>>, %arg3: memref<1x16x256xf32, #tpu.memory_space<vmem>>) attributes {dimension_semantics = [#tpu.dimension_semantics<parallel>], iteration_bounds = array<i64: 2>, scalar_prefetch = 0 : i64, scratch_operands = 0 : i64, tpu.core_type = #tpu.core_type<tc>, window_params = [{transform_indices = @transform_0, window_bounds = array<i64: 1, 4, 25, 256>}, {transform_indices = @transform_1, window_bounds = array<i64: 1, 4, 256>}, {transform_indices = @transform_2, window_bounds = array<i64: 1, 16, 256>}]} {
    %c0 = arith.constant 0 : index
    %c0_0 = arith.constant 0 : index
    %c0_1 = arith.constant 0 : index
    %0 = vector.load %arg2[%c0, %c0_0, %c0_1] : memref<1x4x256xf32, #tpu.memory_space<vmem>>, vector<1x4x256xf32>
    %1 = vector.shape_cast %0 : vector<1x4x256xf32> to vector<4x256xf32>
    %2 = tpu.iota {dimensions = array<i32: 1>} : vector<1x256xi32>
    %c15_i32 = arith.constant 15 : i32
    %3 = vector.broadcast %c15_i32 : i32 to vector<1x256xi32>
    %4 = arith.andi %2, %3 : vector<1x256xi32>
    %c0_2 = arith.constant 0 : index
    %c0_3 = arith.constant 0 : index
    %c0_4 = arith.constant 0 : index
    %c0_5 = arith.constant 0 : index
    %5 = vector.load %arg1[%c0_2, %c0_3, %c0_4, %c0_5] : memref<1x4x25x256xf32, #tpu.memory_space<vmem>>, vector<1x1x25x256xf32>
    %6 = vector.shape_cast %5 : vector<1x1x25x256xf32> to vector<25x256xf32>
    %cst = arith.constant dense<0xFF800000> : vector<256xf32>
    %7 = vector.multi_reduction <maximumf>, %6, %cst [0] : vector<25x256xf32> to vector<256xf32>
    %8 = vector.shape_cast %7 : vector<256xf32> to vector<1x256xf32>
    %9 = vector.broadcast %8 : vector<1x256xf32> to vector<25x256xf32>
    %10 = arith.subf %6, %9 : vector<25x256xf32>
    %11 = math.exp %10 : vector<25x256xf32>
    %cst_6 = arith.constant dense<0.000000e+00> : vector<256xf32>
    %12 = vector.multi_reduction <add>, %11, %cst_6 [0] : vector<25x256xf32> to vector<256xf32>
    %13 = vector.shape_cast %12 : vector<256xf32> to vector<1x256xf32>
    %cst_7 = arith.constant 1.000000e+00 : f32
    %14 = vector.broadcast %cst_7 : f32 to vector<1x256xf32>
    %15 = arith.divf %14, %13 : vector<1x256xf32>
    %c0_8 = arith.constant 0 : index
    %c1 = arith.constant 1 : index
    %c0_9 = arith.constant 0 : index
    %c0_10 = arith.constant 0 : index
    %16 = vector.load %arg1[%c0_8, %c1, %c0_9, %c0_10] : memref<1x4x25x256xf32, #tpu.memory_space<vmem>>, vector<1x1x25x256xf32>
    %17 = vector.shape_cast %16 : vector<1x1x25x256xf32> to vector<25x256xf32>
    %cst_11 = arith.constant dense<0xFF800000> : vector<256xf32>
    %18 = vector.multi_reduction <maximumf>, %17, %cst_11 [0] : vector<25x256xf32> to vector<256xf32>
    %19 = vector.shape_cast %18 : vector<256xf32> to vector<1x256xf32>
    %20 = vector.broadcast %19 : vector<1x256xf32> to vector<25x256xf32>
    %21 = arith.subf %17, %20 : vector<25x256xf32>
    %22 = math.exp %21 : vector<25x256xf32>
    %cst_12 = arith.constant dense<0.000000e+00> : vector<256xf32>
    %23 = vector.multi_reduction <add>, %22, %cst_12 [0] : vector<25x256xf32> to vector<256xf32>
    %24 = vector.shape_cast %23 : vector<256xf32> to vector<1x256xf32>
    %cst_13 = arith.constant 1.000000e+00 : f32
    %25 = vector.broadcast %cst_13 : f32 to vector<1x256xf32>
    %26 = arith.divf %25, %24 : vector<1x256xf32>
    %c0_14 = arith.constant 0 : index
    %c2 = arith.constant 2 : index
    %c0_15 = arith.constant 0 : index
    %c0_16 = arith.constant 0 : index
    %27 = vector.load %arg1[%c0_14, %c2, %c0_15, %c0_16] : memref<1x4x25x256xf32, #tpu.memory_space<vmem>>, vector<1x1x25x256xf32>
    %28 = vector.shape_cast %27 : vector<1x1x25x256xf32> to vector<25x256xf32>
    %cst_17 = arith.constant dense<0xFF800000> : vector<256xf32>
    %29 = vector.multi_reduction <maximumf>, %28, %cst_17 [0] : vector<25x256xf32> to vector<256xf32>
    %30 = vector.shape_cast %29 : vector<256xf32> to vector<1x256xf32>
    %31 = vector.broadcast %30 : vector<1x256xf32> to vector<25x256xf32>
    %32 = arith.subf %28, %31 : vector<25x256xf32>
    %33 = math.exp %32 : vector<25x256xf32>
    %cst_18 = arith.constant dense<0.000000e+00> : vector<256xf32>
    %34 = vector.multi_reduction <add>, %33, %cst_18 [0] : vector<25x256xf32> to vector<256xf32>
    %35 = vector.shape_cast %34 : vector<256xf32> to vector<1x256xf32>
    %cst_19 = arith.constant 1.000000e+00 : f32
    %36 = vector.broadcast %cst_19 : f32 to vector<1x256xf32>
    %37 = arith.divf %36, %35 : vector<1x256xf32>
    %c0_20 = arith.constant 0 : index
    %c3 = arith.constant 3 : index
    %c0_21 = arith.constant 0 : index
    %c0_22 = arith.constant 0 : index
    %38 = vector.load %arg1[%c0_20, %c3, %c0_21, %c0_22] : memref<1x4x25x256xf32, #tpu.memory_space<vmem>>, vector<1x1x25x256xf32>
    %39 = vector.shape_cast %38 : vector<1x1x25x256xf32> to vector<25x256xf32>
    %cst_23 = arith.constant dense<0xFF800000> : vector<256xf32>
    %40 = vector.multi_reduction <maximumf>, %39, %cst_23 [0] : vector<25x256xf32> to vector<256xf32>
    %41 = vector.shape_cast %40 : vector<256xf32> to vector<1x256xf32>
    %42 = vector.broadcast %41 : vector<1x256xf32> to vector<25x256xf32>
    %43 = arith.subf %39, %42 : vector<25x256xf32>
    %44 = math.exp %43 : vector<25x256xf32>
    %cst_24 = arith.constant dense<0.000000e+00> : vector<256xf32>
    %45 = vector.multi_reduction <add>, %44, %cst_24 [0] : vector<25x256xf32> to vector<256xf32>
    %46 = vector.shape_cast %45 : vector<256xf32> to vector<1x256xf32>
    %cst_25 = arith.constant 1.000000e+00 : f32
    %47 = vector.broadcast %cst_25 : f32 to vector<1x256xf32>
    %48 = arith.divf %47, %46 : vector<1x256xf32>
    %cst_26 = arith.constant 0.000000e+00 : f32
    %49 = vector.broadcast %cst_26 : f32 to vector<4x2xf32>
    %50 = vector.extract_strided_slice %1 {offsets = [0, 0], sizes = [4, 254], strides = [1, 1]} : vector<4x256xf32> to vector<4x254xf32>
    %51 = tpu.concatenate %49, %50 in 1 : vector<4x2xf32>, vector<4x254xf32> -> vector<4x256xf32>
    %c-2_i32 = arith.constant -2 : i32
    %52 = vector.broadcast %c-2_i32 : i32 to vector<1x256xi32>
    %53 = arith.addi %4, %52 : vector<1x256xi32>
    %c0_i32 = arith.constant 0 : i32
    %54 = vector.broadcast %c0_i32 : i32 to vector<1x256xi32>
    %55 = arith.cmpi sge, %53, %54 : vector<1x256xi32>
    %c-2_i32_27 = arith.constant -2 : i32
    %56 = vector.broadcast %c-2_i32_27 : i32 to vector<1x256xi32>
    %57 = arith.addi %4, %56 : vector<1x256xi32>
    %c16_i32 = arith.constant 16 : i32
    %58 = vector.broadcast %c16_i32 : i32 to vector<1x256xi32>
    %59 = arith.cmpi slt, %57, %58 : vector<1x256xi32>
    %60 = arith.andi %55, %59 : vector<1x256xi1>
    %cst_28 = arith.constant 0.000000e+00 : f32
    %61 = vector.shape_cast %60 : vector<1x256xi1> to vector<1x256xi1>
    %62 = vector.broadcast %61 : vector<1x256xi1> to vector<4x256xi1>
    %63 = vector.broadcast %cst_28 : f32 to vector<4x256xf32>
    %64 = arith.select %62, %51, %63 : vector<4x256xi1>, vector<4x256xf32>
    %cst_29 = arith.constant 0.000000e+00 : f32
    %65 = vector.broadcast %cst_29 : f32 to vector<4x1xf32>
    %66 = vector.extract_strided_slice %1 {offsets = [0, 0], sizes = [4, 255], strides = [1, 1]} : vector<4x256xf32> to vector<4x255xf32>
    %67 = tpu.concatenate %65, %66 in 1 : vector<4x1xf32>, vector<4x255xf32> -> vector<4x256xf32>
    %c-1_i32 = arith.constant -1 : i32
    %68 = vector.broadcast %c-1_i32 : i32 to vector<1x256xi32>
    %69 = arith.addi %4, %68 : vector<1x256xi32>
    %c0_i32_30 = arith.constant 0 : i32
    %70 = vector.broadcast %c0_i32_30 : i32 to vector<1x256xi32>
    %71 = arith.cmpi sge, %69, %70 : vector<1x256xi32>
    %c-1_i32_31 = arith.constant -1 : i32
    %72 = vector.broadcast %c-1_i32_31 : i32 to vector<1x256xi32>
    %73 = arith.addi %4, %72 : vector<1x256xi32>
    %c16_i32_32 = arith.constant 16 : i32
    %74 = vector.broadcast %c16_i32_32 : i32 to vector<1x256xi32>
    %75 = arith.cmpi slt, %73, %74 : vector<1x256xi32>
    %76 = arith.andi %71, %75 : vector<1x256xi1>
    %cst_33 = arith.constant 0.000000e+00 : f32
    %77 = vector.shape_cast %76 : vector<1x256xi1> to vector<1x256xi1>
    %78 = vector.broadcast %77 : vector<1x256xi1> to vector<4x256xi1>
    %79 = vector.broadcast %cst_33 : f32 to vector<4x256xf32>
    %80 = arith.select %78, %67, %79 : vector<4x256xi1>, vector<4x256xf32>
    %cst_34 = arith.constant 0.000000e+00 : f32
    %81 = vector.broadcast %cst_34 : f32 to vector<4x1xf32>
    %82 = vector.extract_strided_slice %1 {offsets = [0, 1], sizes = [4, 255], strides = [1, 1]} : vector<4x256xf32> to vector<4x255xf32>
    %83 = tpu.concatenate %82, %81 in 1 : vector<4x255xf32>, vector<4x1xf32> -> vector<4x256xf32>
    %c1_i32 = arith.constant 1 : i32
    %84 = vector.broadcast %c1_i32 : i32 to vector<1x256xi32>
    %85 = arith.addi %4, %84 : vector<1x256xi32>
    %c0_i32_35 = arith.constant 0 : i32
    %86 = vector.broadcast %c0_i32_35 : i32 to vector<1x256xi32>
    %87 = arith.cmpi sge, %85, %86 : vector<1x256xi32>
    %c1_i32_36 = arith.constant 1 : i32
    %88 = vector.broadcast %c1_i32_36 : i32 to vector<1x256xi32>
    %89 = arith.addi %4, %88 : vector<1x256xi32>
    %c16_i32_37 = arith.constant 16 : i32
    %90 = vector.broadcast %c16_i32_37 : i32 to vector<1x256xi32>
    %91 = arith.cmpi slt, %89, %90 : vector<1x256xi32>
    %92 = arith.andi %87, %91 : vector<1x256xi1>
    %cst_38 = arith.constant 0.000000e+00 : f32
    %93 = vector.shape_cast %92 : vector<1x256xi1> to vector<1x256xi1>
    %94 = vector.broadcast %93 : vector<1x256xi1> to vector<4x256xi1>
    %95 = vector.broadcast %cst_38 : f32 to vector<4x256xf32>
    %96 = arith.select %94, %83, %95 : vector<4x256xi1>, vector<4x256xf32>
    %cst_39 = arith.constant 0.000000e+00 : f32
    %97 = vector.broadcast %cst_39 : f32 to vector<4x2xf32>
    %98 = vector.extract_strided_slice %1 {offsets = [0, 2], sizes = [4, 254], strides = [1, 1]} : vector<4x256xf32> to vector<4x254xf32>
    %99 = tpu.concatenate %98, %97 in 1 : vector<4x254xf32>, vector<4x2xf32> -> vector<4x256xf32>
    %c2_i32 = arith.constant 2 : i32
    %100 = vector.broadcast %c2_i32 : i32 to vector<1x256xi32>
    %101 = arith.addi %4, %100 : vector<1x256xi32>
    %c0_i32_40 = arith.constant 0 : i32
    %102 = vector.broadcast %c0_i32_40 : i32 to vector<1x256xi32>
    %103 = arith.cmpi sge, %101, %102 : vector<1x256xi32>
    %c2_i32_41 = arith.constant 2 : i32
    %104 = vector.broadcast %c2_i32_41 : i32 to vector<1x256xi32>
    %105 = arith.addi %4, %104 : vector<1x256xi32>
    %c16_i32_42 = arith.constant 16 : i32
    %106 = vector.broadcast %c16_i32_42 : i32 to vector<1x256xi32>
    %107 = arith.cmpi slt, %105, %106 : vector<1x256xi32>
    %108 = arith.andi %103, %107 : vector<1x256xi1>
    %cst_43 = arith.constant 0.000000e+00 : f32
    %109 = vector.shape_cast %108 : vector<1x256xi1> to vector<1x256xi1>
    %110 = vector.broadcast %109 : vector<1x256xi1> to vector<4x256xi1>
    %111 = vector.broadcast %cst_43 : f32 to vector<4x256xf32>
    %112 = arith.select %110, %99, %111 : vector<4x256xi1>, vector<4x256xf32>
    %cst_44 = arith.constant 0.000000e+00 : f32
    %113 = vector.broadcast %cst_44 : f32 to vector<4x32xf32>
    %114 = vector.extract_strided_slice %64 {offsets = [0, 0], sizes = [4, 224], strides = [1, 1]} : vector<4x256xf32> to vector<4x224xf32>
    %115 = tpu.concatenate %113, %114 in 1 : vector<4x32xf32>, vector<4x224xf32> -> vector<4x256xf32>
    %116 = vector.extract_strided_slice %11 {offsets = [0, 0], sizes = [1, 256], strides = [1, 1]} : vector<25x256xf32> to vector<1x256xf32>
    %117 = vector.broadcast %116 : vector<1x256xf32> to vector<4x256xf32>
    %118 = arith.mulf %115, %117 : vector<4x256xf32>
    %119 = vector.extract_strided_slice %22 {offsets = [0, 0], sizes = [1, 256], strides = [1, 1]} : vector<25x256xf32> to vector<1x256xf32>
    %120 = vector.broadcast %119 : vector<1x256xf32> to vector<4x256xf32>
    %121 = arith.mulf %115, %120 : vector<4x256xf32>
    %122 = vector.extract_strided_slice %33 {offsets = [0, 0], sizes = [1, 256], strides = [1, 1]} : vector<25x256xf32> to vector<1x256xf32>
    %123 = vector.broadcast %122 : vector<1x256xf32> to vector<4x256xf32>
    %124 = arith.mulf %115, %123 : vector<4x256xf32>
    %125 = vector.extract_strided_slice %44 {offsets = [0, 0], sizes = [1, 256], strides = [1, 1]} : vector<25x256xf32> to vector<1x256xf32>
    %126 = vector.broadcast %125 : vector<1x256xf32> to vector<4x256xf32>
    %127 = arith.mulf %115, %126 : vector<4x256xf32>
    %cst_45 = arith.constant 0.000000e+00 : f32
    %128 = vector.broadcast %cst_45 : f32 to vector<4x32xf32>
    %129 = vector.extract_strided_slice %80 {offsets = [0, 0], sizes = [4, 224], strides = [1, 1]} : vector<4x256xf32> to vector<4x224xf32>
    %130 = tpu.concatenate %128, %129 in 1 : vector<4x32xf32>, vector<4x224xf32> -> vector<4x256xf32>
    %131 = vector.extract_strided_slice %11 {offsets = [1, 0], sizes = [1, 256], strides = [1, 1]} : vector<25x256xf32> to vector<1x256xf32>
    %132 = vector.broadcast %131 : vector<1x256xf32> to vector<4x256xf32>
    %133 = arith.mulf %130, %132 : vector<4x256xf32>
    %134 = arith.addf %118, %133 : vector<4x256xf32>
    %135 = vector.extract_strided_slice %22 {offsets = [1, 0], sizes = [1, 256], strides = [1, 1]} : vector<25x256xf32> to vector<1x256xf32>
    %136 = vector.broadcast %135 : vector<1x256xf32> to vector<4x256xf32>
    %137 = arith.mulf %130, %136 : vector<4x256xf32>
    %138 = arith.addf %121, %137 : vector<4x256xf32>
    %139 = vector.extract_strided_slice %33 {offsets = [1, 0], sizes = [1, 256], strides = [1, 1]} : vector<25x256xf32> to vector<1x256xf32>
    %140 = vector.broadcast %139 : vector<1x256xf32> to vector<4x256xf32>
    %141 = arith.mulf %130, %140 : vector<4x256xf32>
    %142 = arith.addf %124, %141 : vector<4x256xf32>
    %143 = vector.extract_strided_slice %44 {offsets = [1, 0], sizes = [1, 256], strides = [1, 1]} : vector<25x256xf32> to vector<1x256xf32>
    %144 = vector.broadcast %143 : vector<1x256xf32> to vector<4x256xf32>
    %145 = arith.mulf %130, %144 : vector<4x256xf32>
    %146 = arith.addf %127, %145 : vector<4x256xf32>
    %cst_46 = arith.constant 0.000000e+00 : f32
    %147 = vector.broadcast %cst_46 : f32 to vector<4x32xf32>
    %148 = vector.extract_strided_slice %1 {offsets = [0, 0], sizes = [4, 224], strides = [1, 1]} : vector<4x256xf32> to vector<4x224xf32>
    %149 = tpu.concatenate %147, %148 in 1 : vector<4x32xf32>, vector<4x224xf32> -> vector<4x256xf32>
    %150 = vector.extract_strided_slice %11 {offsets = [2, 0], sizes = [1, 256], strides = [1, 1]} : vector<25x256xf32> to vector<1x256xf32>
    %151 = vector.broadcast %150 : vector<1x256xf32> to vector<4x256xf32>
    %152 = arith.mulf %149, %151 : vector<4x256xf32>
    %153 = arith.addf %134, %152 : vector<4x256xf32>
    %154 = vector.extract_strided_slice %22 {offsets = [2, 0], sizes = [1, 256], strides = [1, 1]} : vector<25x256xf32> to vector<1x256xf32>
    %155 = vector.broadcast %154 : vector<1x256xf32> to vector<4x256xf32>
    %156 = arith.mulf %149, %155 : vector<4x256xf32>
    %157 = arith.addf %138, %156 : vector<4x256xf32>
    %158 = vector.extract_strided_slice %33 {offsets = [2, 0], sizes = [1, 256], strides = [1, 1]} : vector<25x256xf32> to vector<1x256xf32>
    %159 = vector.broadcast %158 : vector<1x256xf32> to vector<4x256xf32>
    %160 = arith.mulf %149, %159 : vector<4x256xf32>
    %161 = arith.addf %142, %160 : vector<4x256xf32>
    %162 = vector.extract_strided_slice %44 {offsets = [2, 0], sizes = [1, 256], strides = [1, 1]} : vector<25x256xf32> to vector<1x256xf32>
    %163 = vector.broadcast %162 : vector<1x256xf32> to vector<4x256xf32>
    %164 = arith.mulf %149, %163 : vector<4x256xf32>
    %165 = arith.addf %146, %164 : vector<4x256xf32>
    %cst_47 = arith.constant 0.000000e+00 : f32
    %166 = vector.broadcast %cst_47 : f32 to vector<4x32xf32>
    %167 = vector.extract_strided_slice %96 {offsets = [0, 0], sizes = [4, 224], strides = [1, 1]} : vector<4x256xf32> to vector<4x224xf32>
    %168 = tpu.concatenate %166, %167 in 1 : vector<4x32xf32>, vector<4x224xf32> -> vector<4x256xf32>
    %169 = vector.extract_strided_slice %11 {offsets = [3, 0], sizes = [1, 256], strides = [1, 1]} : vector<25x256xf32> to vector<1x256xf32>
    %170 = vector.broadcast %169 : vector<1x256xf32> to vector<4x256xf32>
    %171 = arith.mulf %168, %170 : vector<4x256xf32>
    %172 = arith.addf %153, %171 : vector<4x256xf32>
    %173 = vector.extract_strided_slice %22 {offsets = [3, 0], sizes = [1, 256], strides = [1, 1]} : vector<25x256xf32> to vector<1x256xf32>
    %174 = vector.broadcast %173 : vector<1x256xf32> to vector<4x256xf32>
    %175 = arith.mulf %168, %174 : vector<4x256xf32>
    %176 = arith.addf %157, %175 : vector<4x256xf32>
    %177 = vector.extract_strided_slice %33 {offsets = [3, 0], sizes = [1, 256], strides = [1, 1]} : vector<25x256xf32> to vector<1x256xf32>
    %178 = vector.broadcast %177 : vector<1x256xf32> to vector<4x256xf32>
    %179 = arith.mulf %168, %178 : vector<4x256xf32>
    %180 = arith.addf %161, %179 : vector<4x256xf32>
    %181 = vector.extract_strided_slice %44 {offsets = [3, 0], sizes = [1, 256], strides = [1, 1]} : vector<25x256xf32> to vector<1x256xf32>
    %182 = vector.broadcast %181 : vector<1x256xf32> to vector<4x256xf32>
    %183 = arith.mulf %168, %182 : vector<4x256xf32>
    %184 = arith.addf %165, %183 : vector<4x256xf32>
    %cst_48 = arith.constant 0.000000e+00 : f32
    %185 = vector.broadcast %cst_48 : f32 to vector<4x32xf32>
    %186 = vector.extract_strided_slice %112 {offsets = [0, 0], sizes = [4, 224], strides = [1, 1]} : vector<4x256xf32> to vector<4x224xf32>
    %187 = tpu.concatenate %185, %186 in 1 : vector<4x32xf32>, vector<4x224xf32> -> vector<4x256xf32>
    %188 = vector.extract_strided_slice %11 {offsets = [4, 0], sizes = [1, 256], strides = [1, 1]} : vector<25x256xf32> to vector<1x256xf32>
    %189 = vector.broadcast %188 : vector<1x256xf32> to vector<4x256xf32>
    %190 = arith.mulf %187, %189 : vector<4x256xf32>
    %191 = arith.addf %172, %190 : vector<4x256xf32>
    %192 = vector.extract_strided_slice %22 {offsets = [4, 0], sizes = [1, 256], strides = [1, 1]} : vector<25x256xf32> to vector<1x256xf32>
    %193 = vector.broadcast %192 : vector<1x256xf32> to vector<4x256xf32>
    %194 = arith.mulf %187, %193 : vector<4x256xf32>
    %195 = arith.addf %176, %194 : vector<4x256xf32>
    %196 = vector.extract_strided_slice %33 {offsets = [4, 0], sizes = [1, 256], strides = [1, 1]} : vector<25x256xf32> to vector<1x256xf32>
    %197 = vector.broadcast %196 : vector<1x256xf32> to vector<4x256xf32>
    %198 = arith.mulf %187, %197 : vector<4x256xf32>
    %199 = arith.addf %180, %198 : vector<4x256xf32>
    %200 = vector.extract_strided_slice %44 {offsets = [4, 0], sizes = [1, 256], strides = [1, 1]} : vector<25x256xf32> to vector<1x256xf32>
    %201 = vector.broadcast %200 : vector<1x256xf32> to vector<4x256xf32>
    %202 = arith.mulf %187, %201 : vector<4x256xf32>
    %203 = arith.addf %184, %202 : vector<4x256xf32>
    %cst_49 = arith.constant 0.000000e+00 : f32
    %204 = vector.broadcast %cst_49 : f32 to vector<4x16xf32>
    %205 = vector.extract_strided_slice %64 {offsets = [0, 0], sizes = [4, 240], strides = [1, 1]} : vector<4x256xf32> to vector<4x240xf32>
    %206 = tpu.concatenate %204, %205 in 1 : vector<4x16xf32>, vector<4x240xf32> -> vector<4x256xf32>
    %207 = vector.extract_strided_slice %11 {offsets = [5, 0], sizes = [1, 256], strides = [1, 1]} : vector<25x256xf32> to vector<1x256xf32>
    %208 = vector.broadcast %207 : vector<1x256xf32> to vector<4x256xf32>
    %209 = arith.mulf %206, %208 : vector<4x256xf32>
    %210 = arith.addf %191, %209 : vector<4x256xf32>
    %211 = vector.extract_strided_slice %22 {offsets = [5, 0], sizes = [1, 256], strides = [1, 1]} : vector<25x256xf32> to vector<1x256xf32>
    %212 = vector.broadcast %211 : vector<1x256xf32> to vector<4x256xf32>
    %213 = arith.mulf %206, %212 : vector<4x256xf32>
    %214 = arith.addf %195, %213 : vector<4x256xf32>
    %215 = vector.extract_strided_slice %33 {offsets = [5, 0], sizes = [1, 256], strides = [1, 1]} : vector<25x256xf32> to vector<1x256xf32>
    %216 = vector.broadcast %215 : vector<1x256xf32> to vector<4x256xf32>
    %217 = arith.mulf %206, %216 : vector<4x256xf32>
    %218 = arith.addf %199, %217 : vector<4x256xf32>
    %219 = vector.extract_strided_slice %44 {offsets = [5, 0], sizes = [1, 256], strides = [1, 1]} : vector<25x256xf32> to vector<1x256xf32>
    %220 = vector.broadcast %219 : vector<1x256xf32> to vector<4x256xf32>
    %221 = arith.mulf %206, %220 : vector<4x256xf32>
    %222 = arith.addf %203, %221 : vector<4x256xf32>
    %cst_50 = arith.constant 0.000000e+00 : f32
    %223 = vector.broadcast %cst_50 : f32 to vector<4x16xf32>
    %224 = vector.extract_strided_slice %80 {offsets = [0, 0], sizes = [4, 240], strides = [1, 1]} : vector<4x256xf32> to vector<4x240xf32>
    %225 = tpu.concatenate %223, %224 in 1 : vector<4x16xf32>, vector<4x240xf32> -> vector<4x256xf32>
    %226 = vector.extract_strided_slice %11 {offsets = [6, 0], sizes = [1, 256], strides = [1, 1]} : vector<25x256xf32> to vector<1x256xf32>
    %227 = vector.broadcast %226 : vector<1x256xf32> to vector<4x256xf32>
    %228 = arith.mulf %225, %227 : vector<4x256xf32>
    %229 = arith.addf %210, %228 : vector<4x256xf32>
    %230 = vector.extract_strided_slice %22 {offsets = [6, 0], sizes = [1, 256], strides = [1, 1]} : vector<25x256xf32> to vector<1x256xf32>
    %231 = vector.broadcast %230 : vector<1x256xf32> to vector<4x256xf32>
    %232 = arith.mulf %225, %231 : vector<4x256xf32>
    %233 = arith.addf %214, %232 : vector<4x256xf32>
    %234 = vector.extract_strided_slice %33 {offsets = [6, 0], sizes = [1, 256], strides = [1, 1]} : vector<25x256xf32> to vector<1x256xf32>
    %235 = vector.broadcast %234 : vector<1x256xf32> to vector<4x256xf32>
    %236 = arith.mulf %225, %235 : vector<4x256xf32>
    %237 = arith.addf %218, %236 : vector<4x256xf32>
    %238 = vector.extract_strided_slice %44 {offsets = [6, 0], sizes = [1, 256], strides = [1, 1]} : vector<25x256xf32> to vector<1x256xf32>
    %239 = vector.broadcast %238 : vector<1x256xf32> to vector<4x256xf32>
    %240 = arith.mulf %225, %239 : vector<4x256xf32>
    %241 = arith.addf %222, %240 : vector<4x256xf32>
    %cst_51 = arith.constant 0.000000e+00 : f32
    %242 = vector.broadcast %cst_51 : f32 to vector<4x16xf32>
    %243 = vector.extract_strided_slice %1 {offsets = [0, 0], sizes = [4, 240], strides = [1, 1]} : vector<4x256xf32> to vector<4x240xf32>
    %244 = tpu.concatenate %242, %243 in 1 : vector<4x16xf32>, vector<4x240xf32> -> vector<4x256xf32>
    %245 = vector.extract_strided_slice %11 {offsets = [7, 0], sizes = [1, 256], strides = [1, 1]} : vector<25x256xf32> to vector<1x256xf32>
    %246 = vector.broadcast %245 : vector<1x256xf32> to vector<4x256xf32>
    %247 = arith.mulf %244, %246 : vector<4x256xf32>
    %248 = arith.addf %229, %247 : vector<4x256xf32>
    %249 = vector.extract_strided_slice %22 {offsets = [7, 0], sizes = [1, 256], strides = [1, 1]} : vector<25x256xf32> to vector<1x256xf32>
    %250 = vector.broadcast %249 : vector<1x256xf32> to vector<4x256xf32>
    %251 = arith.mulf %244, %250 : vector<4x256xf32>
    %252 = arith.addf %233, %251 : vector<4x256xf32>
    %253 = vector.extract_strided_slice %33 {offsets = [7, 0], sizes = [1, 256], strides = [1, 1]} : vector<25x256xf32> to vector<1x256xf32>
    %254 = vector.broadcast %253 : vector<1x256xf32> to vector<4x256xf32>
    %255 = arith.mulf %244, %254 : vector<4x256xf32>
    %256 = arith.addf %237, %255 : vector<4x256xf32>
    %257 = vector.extract_strided_slice %44 {offsets = [7, 0], sizes = [1, 256], strides = [1, 1]} : vector<25x256xf32> to vector<1x256xf32>
    %258 = vector.broadcast %257 : vector<1x256xf32> to vector<4x256xf32>
    %259 = arith.mulf %244, %258 : vector<4x256xf32>
    %260 = arith.addf %241, %259 : vector<4x256xf32>
    %cst_52 = arith.constant 0.000000e+00 : f32
    %261 = vector.broadcast %cst_52 : f32 to vector<4x16xf32>
    %262 = vector.extract_strided_slice %96 {offsets = [0, 0], sizes = [4, 240], strides = [1, 1]} : vector<4x256xf32> to vector<4x240xf32>
    %263 = tpu.concatenate %261, %262 in 1 : vector<4x16xf32>, vector<4x240xf32> -> vector<4x256xf32>
    %264 = vector.extract_strided_slice %11 {offsets = [8, 0], sizes = [1, 256], strides = [1, 1]} : vector<25x256xf32> to vector<1x256xf32>
    %265 = vector.broadcast %264 : vector<1x256xf32> to vector<4x256xf32>
    %266 = arith.mulf %263, %265 : vector<4x256xf32>
    %267 = arith.addf %248, %266 : vector<4x256xf32>
    %268 = vector.extract_strided_slice %22 {offsets = [8, 0], sizes = [1, 256], strides = [1, 1]} : vector<25x256xf32> to vector<1x256xf32>
    %269 = vector.broadcast %268 : vector<1x256xf32> to vector<4x256xf32>
    %270 = arith.mulf %263, %269 : vector<4x256xf32>
    %271 = arith.addf %252, %270 : vector<4x256xf32>
    %272 = vector.extract_strided_slice %33 {offsets = [8, 0], sizes = [1, 256], strides = [1, 1]} : vector<25x256xf32> to vector<1x256xf32>
    %273 = vector.broadcast %272 : vector<1x256xf32> to vector<4x256xf32>
    %274 = arith.mulf %263, %273 : vector<4x256xf32>
    %275 = arith.addf %256, %274 : vector<4x256xf32>
    %276 = vector.extract_strided_slice %44 {offsets = [8, 0], sizes = [1, 256], strides = [1, 1]} : vector<25x256xf32> to vector<1x256xf32>
    %277 = vector.broadcast %276 : vector<1x256xf32> to vector<4x256xf32>
    %278 = arith.mulf %263, %277 : vector<4x256xf32>
    %279 = arith.addf %260, %278 : vector<4x256xf32>
    %cst_53 = arith.constant 0.000000e+00 : f32
    %280 = vector.broadcast %cst_53 : f32 to vector<4x16xf32>
    %281 = vector.extract_strided_slice %112 {offsets = [0, 0], sizes = [4, 240], strides = [1, 1]} : vector<4x256xf32> to vector<4x240xf32>
    %282 = tpu.concatenate %280, %281 in 1 : vector<4x16xf32>, vector<4x240xf32> -> vector<4x256xf32>
    %283 = vector.extract_strided_slice %11 {offsets = [9, 0], sizes = [1, 256], strides = [1, 1]} : vector<25x256xf32> to vector<1x256xf32>
    %284 = vector.broadcast %283 : vector<1x256xf32> to vector<4x256xf32>
    %285 = arith.mulf %282, %284 : vector<4x256xf32>
    %286 = arith.addf %267, %285 : vector<4x256xf32>
    %287 = vector.extract_strided_slice %22 {offsets = [9, 0], sizes = [1, 256], strides = [1, 1]} : vector<25x256xf32> to vector<1x256xf32>
    %288 = vector.broadcast %287 : vector<1x256xf32> to vector<4x256xf32>
    %289 = arith.mulf %282, %288 : vector<4x256xf32>
    %290 = arith.addf %271, %289 : vector<4x256xf32>
    %291 = vector.extract_strided_slice %33 {offsets = [9, 0], sizes = [1, 256], strides = [1, 1]} : vector<25x256xf32> to vector<1x256xf32>
    %292 = vector.broadcast %291 : vector<1x256xf32> to vector<4x256xf32>
    %293 = arith.mulf %282, %292 : vector<4x256xf32>
    %294 = arith.addf %275, %293 : vector<4x256xf32>
    %295 = vector.extract_strided_slice %44 {offsets = [9, 0], sizes = [1, 256], strides = [1, 1]} : vector<25x256xf32> to vector<1x256xf32>
    %296 = vector.broadcast %295 : vector<1x256xf32> to vector<4x256xf32>
    %297 = arith.mulf %282, %296 : vector<4x256xf32>
    %298 = arith.addf %279, %297 : vector<4x256xf32>
    %299 = vector.extract_strided_slice %11 {offsets = [10, 0], sizes = [1, 256], strides = [1, 1]} : vector<25x256xf32> to vector<1x256xf32>
    %300 = vector.broadcast %299 : vector<1x256xf32> to vector<4x256xf32>
    %301 = arith.mulf %64, %300 : vector<4x256xf32>
    %302 = arith.addf %286, %301 : vector<4x256xf32>
    %303 = vector.extract_strided_slice %22 {offsets = [10, 0], sizes = [1, 256], strides = [1, 1]} : vector<25x256xf32> to vector<1x256xf32>
    %304 = vector.broadcast %303 : vector<1x256xf32> to vector<4x256xf32>
    %305 = arith.mulf %64, %304 : vector<4x256xf32>
    %306 = arith.addf %290, %305 : vector<4x256xf32>
    %307 = vector.extract_strided_slice %33 {offsets = [10, 0], sizes = [1, 256], strides = [1, 1]} : vector<25x256xf32> to vector<1x256xf32>
    %308 = vector.broadcast %307 : vector<1x256xf32> to vector<4x256xf32>
    %309 = arith.mulf %64, %308 : vector<4x256xf32>
    %310 = arith.addf %294, %309 : vector<4x256xf32>
    %311 = vector.extract_strided_slice %44 {offsets = [10, 0], sizes = [1, 256], strides = [1, 1]} : vector<25x256xf32> to vector<1x256xf32>
    %312 = vector.broadcast %311 : vector<1x256xf32> to vector<4x256xf32>
    %313 = arith.mulf %64, %312 : vector<4x256xf32>
    %314 = arith.addf %298, %313 : vector<4x256xf32>
    %315 = vector.extract_strided_slice %11 {offsets = [11, 0], sizes = [1, 256], strides = [1, 1]} : vector<25x256xf32> to vector<1x256xf32>
    %316 = vector.broadcast %315 : vector<1x256xf32> to vector<4x256xf32>
    %317 = arith.mulf %80, %316 : vector<4x256xf32>
    %318 = arith.addf %302, %317 : vector<4x256xf32>
    %319 = vector.extract_strided_slice %22 {offsets = [11, 0], sizes = [1, 256], strides = [1, 1]} : vector<25x256xf32> to vector<1x256xf32>
    %320 = vector.broadcast %319 : vector<1x256xf32> to vector<4x256xf32>
    %321 = arith.mulf %80, %320 : vector<4x256xf32>
    %322 = arith.addf %306, %321 : vector<4x256xf32>
    %323 = vector.extract_strided_slice %33 {offsets = [11, 0], sizes = [1, 256], strides = [1, 1]} : vector<25x256xf32> to vector<1x256xf32>
    %324 = vector.broadcast %323 : vector<1x256xf32> to vector<4x256xf32>
    %325 = arith.mulf %80, %324 : vector<4x256xf32>
    %326 = arith.addf %310, %325 : vector<4x256xf32>
    %327 = vector.extract_strided_slice %44 {offsets = [11, 0], sizes = [1, 256], strides = [1, 1]} : vector<25x256xf32> to vector<1x256xf32>
    %328 = vector.broadcast %327 : vector<1x256xf32> to vector<4x256xf32>
    %329 = arith.mulf %80, %328 : vector<4x256xf32>
    %330 = arith.addf %314, %329 : vector<4x256xf32>
    %331 = vector.extract_strided_slice %11 {offsets = [12, 0], sizes = [1, 256], strides = [1, 1]} : vector<25x256xf32> to vector<1x256xf32>
    %332 = vector.broadcast %331 : vector<1x256xf32> to vector<4x256xf32>
    %333 = arith.mulf %1, %332 : vector<4x256xf32>
    %334 = arith.addf %318, %333 : vector<4x256xf32>
    %335 = vector.extract_strided_slice %22 {offsets = [12, 0], sizes = [1, 256], strides = [1, 1]} : vector<25x256xf32> to vector<1x256xf32>
    %336 = vector.broadcast %335 : vector<1x256xf32> to vector<4x256xf32>
    %337 = arith.mulf %1, %336 : vector<4x256xf32>
    %338 = arith.addf %322, %337 : vector<4x256xf32>
    %339 = vector.extract_strided_slice %33 {offsets = [12, 0], sizes = [1, 256], strides = [1, 1]} : vector<25x256xf32> to vector<1x256xf32>
    %340 = vector.broadcast %339 : vector<1x256xf32> to vector<4x256xf32>
    %341 = arith.mulf %1, %340 : vector<4x256xf32>
    %342 = arith.addf %326, %341 : vector<4x256xf32>
    %343 = vector.extract_strided_slice %44 {offsets = [12, 0], sizes = [1, 256], strides = [1, 1]} : vector<25x256xf32> to vector<1x256xf32>
    %344 = vector.broadcast %343 : vector<1x256xf32> to vector<4x256xf32>
    %345 = arith.mulf %1, %344 : vector<4x256xf32>
    %346 = arith.addf %330, %345 : vector<4x256xf32>
    %347 = vector.extract_strided_slice %11 {offsets = [13, 0], sizes = [1, 256], strides = [1, 1]} : vector<25x256xf32> to vector<1x256xf32>
    %348 = vector.broadcast %347 : vector<1x256xf32> to vector<4x256xf32>
    %349 = arith.mulf %96, %348 : vector<4x256xf32>
    %350 = arith.addf %334, %349 : vector<4x256xf32>
    %351 = vector.extract_strided_slice %22 {offsets = [13, 0], sizes = [1, 256], strides = [1, 1]} : vector<25x256xf32> to vector<1x256xf32>
    %352 = vector.broadcast %351 : vector<1x256xf32> to vector<4x256xf32>
    %353 = arith.mulf %96, %352 : vector<4x256xf32>
    %354 = arith.addf %338, %353 : vector<4x256xf32>
    %355 = vector.extract_strided_slice %33 {offsets = [13, 0], sizes = [1, 256], strides = [1, 1]} : vector<25x256xf32> to vector<1x256xf32>
    %356 = vector.broadcast %355 : vector<1x256xf32> to vector<4x256xf32>
    %357 = arith.mulf %96, %356 : vector<4x256xf32>
    %358 = arith.addf %342, %357 : vector<4x256xf32>
    %359 = vector.extract_strided_slice %44 {offsets = [13, 0], sizes = [1, 256], strides = [1, 1]} : vector<25x256xf32> to vector<1x256xf32>
    %360 = vector.broadcast %359 : vector<1x256xf32> to vector<4x256xf32>
    %361 = arith.mulf %96, %360 : vector<4x256xf32>
    %362 = arith.addf %346, %361 : vector<4x256xf32>
    %363 = vector.extract_strided_slice %11 {offsets = [14, 0], sizes = [1, 256], strides = [1, 1]} : vector<25x256xf32> to vector<1x256xf32>
    %364 = vector.broadcast %363 : vector<1x256xf32> to vector<4x256xf32>
    %365 = arith.mulf %112, %364 : vector<4x256xf32>
    %366 = arith.addf %350, %365 : vector<4x256xf32>
    %367 = vector.extract_strided_slice %22 {offsets = [14, 0], sizes = [1, 256], strides = [1, 1]} : vector<25x256xf32> to vector<1x256xf32>
    %368 = vector.broadcast %367 : vector<1x256xf32> to vector<4x256xf32>
    %369 = arith.mulf %112, %368 : vector<4x256xf32>
    %370 = arith.addf %354, %369 : vector<4x256xf32>
    %371 = vector.extract_strided_slice %33 {offsets = [14, 0], sizes = [1, 256], strides = [1, 1]} : vector<25x256xf32> to vector<1x256xf32>
    %372 = vector.broadcast %371 : vector<1x256xf32> to vector<4x256xf32>
    %373 = arith.mulf %112, %372 : vector<4x256xf32>
    %374 = arith.addf %358, %373 : vector<4x256xf32>
    %375 = vector.extract_strided_slice %44 {offsets = [14, 0], sizes = [1, 256], strides = [1, 1]} : vector<25x256xf32> to vector<1x256xf32>
    %376 = vector.broadcast %375 : vector<1x256xf32> to vector<4x256xf32>
    %377 = arith.mulf %112, %376 : vector<4x256xf32>
    %378 = arith.addf %362, %377 : vector<4x256xf32>
    %cst_54 = arith.constant 0.000000e+00 : f32
    %379 = vector.broadcast %cst_54 : f32 to vector<4x16xf32>
    %380 = vector.extract_strided_slice %64 {offsets = [0, 16], sizes = [4, 240], strides = [1, 1]} : vector<4x256xf32> to vector<4x240xf32>
    %381 = tpu.concatenate %380, %379 in 1 : vector<4x240xf32>, vector<4x16xf32> -> vector<4x256xf32>
    %382 = vector.extract_strided_slice %11 {offsets = [15, 0], sizes = [1, 256], strides = [1, 1]} : vector<25x256xf32> to vector<1x256xf32>
    %383 = vector.broadcast %382 : vector<1x256xf32> to vector<4x256xf32>
    %384 = arith.mulf %381, %383 : vector<4x256xf32>
    %385 = arith.addf %366, %384 : vector<4x256xf32>
    %386 = vector.extract_strided_slice %22 {offsets = [15, 0], sizes = [1, 256], strides = [1, 1]} : vector<25x256xf32> to vector<1x256xf32>
    %387 = vector.broadcast %386 : vector<1x256xf32> to vector<4x256xf32>
    %388 = arith.mulf %381, %387 : vector<4x256xf32>
    %389 = arith.addf %370, %388 : vector<4x256xf32>
    %390 = vector.extract_strided_slice %33 {offsets = [15, 0], sizes = [1, 256], strides = [1, 1]} : vector<25x256xf32> to vector<1x256xf32>
    %391 = vector.broadcast %390 : vector<1x256xf32> to vector<4x256xf32>
    %392 = arith.mulf %381, %391 : vector<4x256xf32>
    %393 = arith.addf %374, %392 : vector<4x256xf32>
    %394 = vector.extract_strided_slice %44 {offsets = [15, 0], sizes = [1, 256], strides = [1, 1]} : vector<25x256xf32> to vector<1x256xf32>
    %395 = vector.broadcast %394 : vector<1x256xf32> to vector<4x256xf32>
    %396 = arith.mulf %381, %395 : vector<4x256xf32>
    %397 = arith.addf %378, %396 : vector<4x256xf32>
    %cst_55 = arith.constant 0.000000e+00 : f32
    %398 = vector.broadcast %cst_55 : f32 to vector<4x16xf32>
    %399 = vector.extract_strided_slice %80 {offsets = [0, 16], sizes = [4, 240], strides = [1, 1]} : vector<4x256xf32> to vector<4x240xf32>
    %400 = tpu.concatenate %399, %398 in 1 : vector<4x240xf32>, vector<4x16xf32> -> vector<4x256xf32>
    %401 = vector.extract_strided_slice %11 {offsets = [16, 0], sizes = [1, 256], strides = [1, 1]} : vector<25x256xf32> to vector<1x256xf32>
    %402 = vector.broadcast %401 : vector<1x256xf32> to vector<4x256xf32>
    %403 = arith.mulf %400, %402 : vector<4x256xf32>
    %404 = arith.addf %385, %403 : vector<4x256xf32>
    %405 = vector.extract_strided_slice %22 {offsets = [16, 0], sizes = [1, 256], strides = [1, 1]} : vector<25x256xf32> to vector<1x256xf32>
    %406 = vector.broadcast %405 : vector<1x256xf32> to vector<4x256xf32>
    %407 = arith.mulf %400, %406 : vector<4x256xf32>
    %408 = arith.addf %389, %407 : vector<4x256xf32>
    %409 = vector.extract_strided_slice %33 {offsets = [16, 0], sizes = [1, 256], strides = [1, 1]} : vector<25x256xf32> to vector<1x256xf32>
    %410 = vector.broadcast %409 : vector<1x256xf32> to vector<4x256xf32>
    %411 = arith.mulf %400, %410 : vector<4x256xf32>
    %412 = arith.addf %393, %411 : vector<4x256xf32>
    %413 = vector.extract_strided_slice %44 {offsets = [16, 0], sizes = [1, 256], strides = [1, 1]} : vector<25x256xf32> to vector<1x256xf32>
    %414 = vector.broadcast %413 : vector<1x256xf32> to vector<4x256xf32>
    %415 = arith.mulf %400, %414 : vector<4x256xf32>
    %416 = arith.addf %397, %415 : vector<4x256xf32>
    %cst_56 = arith.constant 0.000000e+00 : f32
    %417 = vector.broadcast %cst_56 : f32 to vector<4x16xf32>
    %418 = vector.extract_strided_slice %1 {offsets = [0, 16], sizes = [4, 240], strides = [1, 1]} : vector<4x256xf32> to vector<4x240xf32>
    %419 = tpu.concatenate %418, %417 in 1 : vector<4x240xf32>, vector<4x16xf32> -> vector<4x256xf32>
    %420 = vector.extract_strided_slice %11 {offsets = [17, 0], sizes = [1, 256], strides = [1, 1]} : vector<25x256xf32> to vector<1x256xf32>
    %421 = vector.broadcast %420 : vector<1x256xf32> to vector<4x256xf32>
    %422 = arith.mulf %419, %421 : vector<4x256xf32>
    %423 = arith.addf %404, %422 : vector<4x256xf32>
    %424 = vector.extract_strided_slice %22 {offsets = [17, 0], sizes = [1, 256], strides = [1, 1]} : vector<25x256xf32> to vector<1x256xf32>
    %425 = vector.broadcast %424 : vector<1x256xf32> to vector<4x256xf32>
    %426 = arith.mulf %419, %425 : vector<4x256xf32>
    %427 = arith.addf %408, %426 : vector<4x256xf32>
    %428 = vector.extract_strided_slice %33 {offsets = [17, 0], sizes = [1, 256], strides = [1, 1]} : vector<25x256xf32> to vector<1x256xf32>
    %429 = vector.broadcast %428 : vector<1x256xf32> to vector<4x256xf32>
    %430 = arith.mulf %419, %429 : vector<4x256xf32>
    %431 = arith.addf %412, %430 : vector<4x256xf32>
    %432 = vector.extract_strided_slice %44 {offsets = [17, 0], sizes = [1, 256], strides = [1, 1]} : vector<25x256xf32> to vector<1x256xf32>
    %433 = vector.broadcast %432 : vector<1x256xf32> to vector<4x256xf32>
    %434 = arith.mulf %419, %433 : vector<4x256xf32>
    %435 = arith.addf %416, %434 : vector<4x256xf32>
    %cst_57 = arith.constant 0.000000e+00 : f32
    %436 = vector.broadcast %cst_57 : f32 to vector<4x16xf32>
    %437 = vector.extract_strided_slice %96 {offsets = [0, 16], sizes = [4, 240], strides = [1, 1]} : vector<4x256xf32> to vector<4x240xf32>
    %438 = tpu.concatenate %437, %436 in 1 : vector<4x240xf32>, vector<4x16xf32> -> vector<4x256xf32>
    %439 = vector.extract_strided_slice %11 {offsets = [18, 0], sizes = [1, 256], strides = [1, 1]} : vector<25x256xf32> to vector<1x256xf32>
    %440 = vector.broadcast %439 : vector<1x256xf32> to vector<4x256xf32>
    %441 = arith.mulf %438, %440 : vector<4x256xf32>
    %442 = arith.addf %423, %441 : vector<4x256xf32>
    %443 = vector.extract_strided_slice %22 {offsets = [18, 0], sizes = [1, 256], strides = [1, 1]} : vector<25x256xf32> to vector<1x256xf32>
    %444 = vector.broadcast %443 : vector<1x256xf32> to vector<4x256xf32>
    %445 = arith.mulf %438, %444 : vector<4x256xf32>
    %446 = arith.addf %427, %445 : vector<4x256xf32>
    %447 = vector.extract_strided_slice %33 {offsets = [18, 0], sizes = [1, 256], strides = [1, 1]} : vector<25x256xf32> to vector<1x256xf32>
    %448 = vector.broadcast %447 : vector<1x256xf32> to vector<4x256xf32>
    %449 = arith.mulf %438, %448 : vector<4x256xf32>
    %450 = arith.addf %431, %449 : vector<4x256xf32>
    %451 = vector.extract_strided_slice %44 {offsets = [18, 0], sizes = [1, 256], strides = [1, 1]} : vector<25x256xf32> to vector<1x256xf32>
    %452 = vector.broadcast %451 : vector<1x256xf32> to vector<4x256xf32>
    %453 = arith.mulf %438, %452 : vector<4x256xf32>
    %454 = arith.addf %435, %453 : vector<4x256xf32>
    %cst_58 = arith.constant 0.000000e+00 : f32
    %455 = vector.broadcast %cst_58 : f32 to vector<4x16xf32>
    %456 = vector.extract_strided_slice %112 {offsets = [0, 16], sizes = [4, 240], strides = [1, 1]} : vector<4x256xf32> to vector<4x240xf32>
    %457 = tpu.concatenate %456, %455 in 1 : vector<4x240xf32>, vector<4x16xf32> -> vector<4x256xf32>
    %458 = vector.extract_strided_slice %11 {offsets = [19, 0], sizes = [1, 256], strides = [1, 1]} : vector<25x256xf32> to vector<1x256xf32>
    %459 = vector.broadcast %458 : vector<1x256xf32> to vector<4x256xf32>
    %460 = arith.mulf %457, %459 : vector<4x256xf32>
    %461 = arith.addf %442, %460 : vector<4x256xf32>
    %462 = vector.extract_strided_slice %22 {offsets = [19, 0], sizes = [1, 256], strides = [1, 1]} : vector<25x256xf32> to vector<1x256xf32>
    %463 = vector.broadcast %462 : vector<1x256xf32> to vector<4x256xf32>
    %464 = arith.mulf %457, %463 : vector<4x256xf32>
    %465 = arith.addf %446, %464 : vector<4x256xf32>
    %466 = vector.extract_strided_slice %33 {offsets = [19, 0], sizes = [1, 256], strides = [1, 1]} : vector<25x256xf32> to vector<1x256xf32>
    %467 = vector.broadcast %466 : vector<1x256xf32> to vector<4x256xf32>
    %468 = arith.mulf %457, %467 : vector<4x256xf32>
    %469 = arith.addf %450, %468 : vector<4x256xf32>
    %470 = vector.extract_strided_slice %44 {offsets = [19, 0], sizes = [1, 256], strides = [1, 1]} : vector<25x256xf32> to vector<1x256xf32>
    %471 = vector.broadcast %470 : vector<1x256xf32> to vector<4x256xf32>
    %472 = arith.mulf %457, %471 : vector<4x256xf32>
    %473 = arith.addf %454, %472 : vector<4x256xf32>
    %cst_59 = arith.constant 0.000000e+00 : f32
    %474 = vector.broadcast %cst_59 : f32 to vector<4x32xf32>
    %475 = vector.extract_strided_slice %64 {offsets = [0, 32], sizes = [4, 224], strides = [1, 1]} : vector<4x256xf32> to vector<4x224xf32>
    %476 = tpu.concatenate %475, %474 in 1 : vector<4x224xf32>, vector<4x32xf32> -> vector<4x256xf32>
    %477 = vector.extract_strided_slice %11 {offsets = [20, 0], sizes = [1, 256], strides = [1, 1]} : vector<25x256xf32> to vector<1x256xf32>
    %478 = vector.broadcast %477 : vector<1x256xf32> to vector<4x256xf32>
    %479 = arith.mulf %476, %478 : vector<4x256xf32>
    %480 = arith.addf %461, %479 : vector<4x256xf32>
    %481 = vector.extract_strided_slice %22 {offsets = [20, 0], sizes = [1, 256], strides = [1, 1]} : vector<25x256xf32> to vector<1x256xf32>
    %482 = vector.broadcast %481 : vector<1x256xf32> to vector<4x256xf32>
    %483 = arith.mulf %476, %482 : vector<4x256xf32>
    %484 = arith.addf %465, %483 : vector<4x256xf32>
    %485 = vector.extract_strided_slice %33 {offsets = [20, 0], sizes = [1, 256], strides = [1, 1]} : vector<25x256xf32> to vector<1x256xf32>
    %486 = vector.broadcast %485 : vector<1x256xf32> to vector<4x256xf32>
    %487 = arith.mulf %476, %486 : vector<4x256xf32>
    %488 = arith.addf %469, %487 : vector<4x256xf32>
    %489 = vector.extract_strided_slice %44 {offsets = [20, 0], sizes = [1, 256], strides = [1, 1]} : vector<25x256xf32> to vector<1x256xf32>
    %490 = vector.broadcast %489 : vector<1x256xf32> to vector<4x256xf32>
    %491 = arith.mulf %476, %490 : vector<4x256xf32>
    %492 = arith.addf %473, %491 : vector<4x256xf32>
    %cst_60 = arith.constant 0.000000e+00 : f32
    %493 = vector.broadcast %cst_60 : f32 to vector<4x32xf32>
    %494 = vector.extract_strided_slice %80 {offsets = [0, 32], sizes = [4, 224], strides = [1, 1]} : vector<4x256xf32> to vector<4x224xf32>
    %495 = tpu.concatenate %494, %493 in 1 : vector<4x224xf32>, vector<4x32xf32> -> vector<4x256xf32>
    %496 = vector.extract_strided_slice %11 {offsets = [21, 0], sizes = [1, 256], strides = [1, 1]} : vector<25x256xf32> to vector<1x256xf32>
    %497 = vector.broadcast %496 : vector<1x256xf32> to vector<4x256xf32>
    %498 = arith.mulf %495, %497 : vector<4x256xf32>
    %499 = arith.addf %480, %498 : vector<4x256xf32>
    %500 = vector.extract_strided_slice %22 {offsets = [21, 0], sizes = [1, 256], strides = [1, 1]} : vector<25x256xf32> to vector<1x256xf32>
    %501 = vector.broadcast %500 : vector<1x256xf32> to vector<4x256xf32>
    %502 = arith.mulf %495, %501 : vector<4x256xf32>
    %503 = arith.addf %484, %502 : vector<4x256xf32>
    %504 = vector.extract_strided_slice %33 {offsets = [21, 0], sizes = [1, 256], strides = [1, 1]} : vector<25x256xf32> to vector<1x256xf32>
    %505 = vector.broadcast %504 : vector<1x256xf32> to vector<4x256xf32>
    %506 = arith.mulf %495, %505 : vector<4x256xf32>
    %507 = arith.addf %488, %506 : vector<4x256xf32>
    %508 = vector.extract_strided_slice %44 {offsets = [21, 0], sizes = [1, 256], strides = [1, 1]} : vector<25x256xf32> to vector<1x256xf32>
    %509 = vector.broadcast %508 : vector<1x256xf32> to vector<4x256xf32>
    %510 = arith.mulf %495, %509 : vector<4x256xf32>
    %511 = arith.addf %492, %510 : vector<4x256xf32>
    %cst_61 = arith.constant 0.000000e+00 : f32
    %512 = vector.broadcast %cst_61 : f32 to vector<4x32xf32>
    %513 = vector.extract_strided_slice %1 {offsets = [0, 32], sizes = [4, 224], strides = [1, 1]} : vector<4x256xf32> to vector<4x224xf32>
    %514 = tpu.concatenate %513, %512 in 1 : vector<4x224xf32>, vector<4x32xf32> -> vector<4x256xf32>
    %515 = vector.extract_strided_slice %11 {offsets = [22, 0], sizes = [1, 256], strides = [1, 1]} : vector<25x256xf32> to vector<1x256xf32>
    %516 = vector.broadcast %515 : vector<1x256xf32> to vector<4x256xf32>
    %517 = arith.mulf %514, %516 : vector<4x256xf32>
    %518 = arith.addf %499, %517 : vector<4x256xf32>
    %519 = vector.extract_strided_slice %22 {offsets = [22, 0], sizes = [1, 256], strides = [1, 1]} : vector<25x256xf32> to vector<1x256xf32>
    %520 = vector.broadcast %519 : vector<1x256xf32> to vector<4x256xf32>
    %521 = arith.mulf %514, %520 : vector<4x256xf32>
    %522 = arith.addf %503, %521 : vector<4x256xf32>
    %523 = vector.extract_strided_slice %33 {offsets = [22, 0], sizes = [1, 256], strides = [1, 1]} : vector<25x256xf32> to vector<1x256xf32>
    %524 = vector.broadcast %523 : vector<1x256xf32> to vector<4x256xf32>
    %525 = arith.mulf %514, %524 : vector<4x256xf32>
    %526 = arith.addf %507, %525 : vector<4x256xf32>
    %527 = vector.extract_strided_slice %44 {offsets = [22, 0], sizes = [1, 256], strides = [1, 1]} : vector<25x256xf32> to vector<1x256xf32>
    %528 = vector.broadcast %527 : vector<1x256xf32> to vector<4x256xf32>
    %529 = arith.mulf %514, %528 : vector<4x256xf32>
    %530 = arith.addf %511, %529 : vector<4x256xf32>
    %cst_62 = arith.constant 0.000000e+00 : f32
    %531 = vector.broadcast %cst_62 : f32 to vector<4x32xf32>
    %532 = vector.extract_strided_slice %96 {offsets = [0, 32], sizes = [4, 224], strides = [1, 1]} : vector<4x256xf32> to vector<4x224xf32>
    %533 = tpu.concatenate %532, %531 in 1 : vector<4x224xf32>, vector<4x32xf32> -> vector<4x256xf32>
    %534 = vector.extract_strided_slice %11 {offsets = [23, 0], sizes = [1, 256], strides = [1, 1]} : vector<25x256xf32> to vector<1x256xf32>
    %535 = vector.broadcast %534 : vector<1x256xf32> to vector<4x256xf32>
    %536 = arith.mulf %533, %535 : vector<4x256xf32>
    %537 = arith.addf %518, %536 : vector<4x256xf32>
    %538 = vector.extract_strided_slice %22 {offsets = [23, 0], sizes = [1, 256], strides = [1, 1]} : vector<25x256xf32> to vector<1x256xf32>
    %539 = vector.broadcast %538 : vector<1x256xf32> to vector<4x256xf32>
    %540 = arith.mulf %533, %539 : vector<4x256xf32>
    %541 = arith.addf %522, %540 : vector<4x256xf32>
    %542 = vector.extract_strided_slice %33 {offsets = [23, 0], sizes = [1, 256], strides = [1, 1]} : vector<25x256xf32> to vector<1x256xf32>
    %543 = vector.broadcast %542 : vector<1x256xf32> to vector<4x256xf32>
    %544 = arith.mulf %533, %543 : vector<4x256xf32>
    %545 = arith.addf %526, %544 : vector<4x256xf32>
    %546 = vector.extract_strided_slice %44 {offsets = [23, 0], sizes = [1, 256], strides = [1, 1]} : vector<25x256xf32> to vector<1x256xf32>
    %547 = vector.broadcast %546 : vector<1x256xf32> to vector<4x256xf32>
    %548 = arith.mulf %533, %547 : vector<4x256xf32>
    %549 = arith.addf %530, %548 : vector<4x256xf32>
    %cst_63 = arith.constant 0.000000e+00 : f32
    %550 = vector.broadcast %cst_63 : f32 to vector<4x32xf32>
    %551 = vector.extract_strided_slice %112 {offsets = [0, 32], sizes = [4, 224], strides = [1, 1]} : vector<4x256xf32> to vector<4x224xf32>
    %552 = tpu.concatenate %551, %550 in 1 : vector<4x224xf32>, vector<4x32xf32> -> vector<4x256xf32>
    %553 = vector.extract_strided_slice %11 {offsets = [24, 0], sizes = [1, 256], strides = [1, 1]} : vector<25x256xf32> to vector<1x256xf32>
    %554 = vector.broadcast %553 : vector<1x256xf32> to vector<4x256xf32>
    %555 = arith.mulf %552, %554 : vector<4x256xf32>
    %556 = arith.addf %537, %555 : vector<4x256xf32>
    %557 = vector.extract_strided_slice %22 {offsets = [24, 0], sizes = [1, 256], strides = [1, 1]} : vector<25x256xf32> to vector<1x256xf32>
    %558 = vector.broadcast %557 : vector<1x256xf32> to vector<4x256xf32>
    %559 = arith.mulf %552, %558 : vector<4x256xf32>
    %560 = arith.addf %541, %559 : vector<4x256xf32>
    %561 = vector.extract_strided_slice %33 {offsets = [24, 0], sizes = [1, 256], strides = [1, 1]} : vector<25x256xf32> to vector<1x256xf32>
    %562 = vector.broadcast %561 : vector<1x256xf32> to vector<4x256xf32>
    %563 = arith.mulf %552, %562 : vector<4x256xf32>
    %564 = arith.addf %545, %563 : vector<4x256xf32>
    %565 = vector.extract_strided_slice %44 {offsets = [24, 0], sizes = [1, 256], strides = [1, 1]} : vector<25x256xf32> to vector<1x256xf32>
    %566 = vector.broadcast %565 : vector<1x256xf32> to vector<4x256xf32>
    %567 = arith.mulf %552, %566 : vector<4x256xf32>
    %568 = arith.addf %549, %567 : vector<4x256xf32>
    %569 = vector.broadcast %15 : vector<1x256xf32> to vector<4x256xf32>
    %570 = arith.mulf %556, %569 : vector<4x256xf32>
    %571 = vector.broadcast %26 : vector<1x256xf32> to vector<4x256xf32>
    %572 = arith.mulf %560, %571 : vector<4x256xf32>
    %573 = vector.broadcast %37 : vector<1x256xf32> to vector<4x256xf32>
    %574 = arith.mulf %564, %573 : vector<4x256xf32>
    %575 = vector.broadcast %48 : vector<1x256xf32> to vector<4x256xf32>
    %576 = arith.mulf %568, %575 : vector<4x256xf32>
    %577 = tpu.concatenate %570, %572, %574, %576 in 0 : vector<4x256xf32>, vector<4x256xf32>, vector<4x256xf32>, vector<4x256xf32> -> vector<16x256xf32>
    %c0_64 = arith.constant 0 : index
    %c0_65 = arith.constant 0 : index
    %c0_66 = arith.constant 0 : index
    %578 = vector.load %arg3[%c0_64, %c0_65, %c0_66] : memref<1x16x256xf32, #tpu.memory_space<vmem>>, vector<1x16x256xf32>
    %579 = vector.shape_cast %578 : vector<1x16x256xf32> to vector<16x256xf32>
    %580 = vector.shape_cast %577 : vector<16x256xf32> to vector<1x16x256xf32>
    tpu.vector_store %arg3[%c0_64, %c0_65, %c0_66], %580 {strides = array<i32>} : memref<1x16x256xf32, #tpu.memory_space<vmem>>, vector<1x16x256xf32>,
    return
  }
  func.func @transform_0(%arg0: i32) -> (i32, i32, i32, i32) {
    %c0_i32 = arith.constant 0 : i32
    %c0_i32_0 = arith.constant 0 : i32
    %c0_i32_1 = arith.constant 0 : i32
    %c0_i32_2 = arith.constant 0 : i32
    return %arg0, %c0_i32, %c0_i32_0, %c0_i32_1 : i32, i32, i32, i32
  }
  func.func @transform_1(%arg0: i32) -> (i32, i32, i32) {
    %c0_i32 = arith.constant 0 : i32
    %c0_i32_0 = arith.constant 0 : i32
    %c0_i32_1 = arith.constant 0 : i32
    return %arg0, %c0_i32, %c0_i32_0 : i32, i32, i32
  }
  func.func @transform_2(%arg0: i32) -> (i32, i32, i32) {
    %c0_i32 = arith.constant 0 : i32
    %c0_i32_0 = arith.constant 0 : i32
    %c0_i32_1 = arith.constant 0 : i32
    return %arg0, %c0_i32, %c0_i32_0 : i32, i32, i32
  }
}

</mosaic_0001>

<bundles_post_ra>
// kernel: dea_carafe_forward.2
= control target key start
LH: loop header
LB: loop body
LE: loop exit
PB: predicated region body
PF: predicated region fallthrough
CT: control target
= control target key end

     0   :  { %s1689_s12 = smov 0   ;;  %s3044_s0 = inlined_call_operand.vmem [shape: f32[2,64,256], index: 0, kind: input, shape index: {}]   ;;  %s3045_s1 = inlined_call_operand.vmem [shape: f32[2,64,1], index: 1, kind: input, shape index: {}]   ;;  %s3046_s2 = inlined_call_operand.vmem [shape: f32[64,9], index: 2, kind: input, shape index: {}]   ;;  %s3047_s3 = inlined_call_operand.vmem [shape: f32[2,64,256], index: 3, kind: output, shape index: {}]  }
   0x1 LB: > { %s1571_s13 = sadd.s32 4294967295, %s1654_s12   ;;  %p1575_p0 = scmp.ge.s32.totalorder %s1654_s12, 1  ;;  %s1654_s12 = sphi %s1689_s12, %s13_s12  }
   0x2   : > { %p147_p1 = scmp.lt.s32.totalorder %s1654_s12, 3 }
   0x4   : > { %p148_p2 = pnand %p1575_p0, %p147_p1 }
   0x6   : > { %151 = sbr.rel (%p148_p2) target bundleno = 600 (0x258), region = 32 }
   0xb   : > { %p176_p3 = scmp.lt.s32.totalorder %s1571_s13, 1  ;;  %v1656_v0 = vmov 0   ;;  %s1657_s18 = smov 1   ;;  %v1794_v25 = vld [vmem:[%s3046_s2] sm:$0xff]  ;;  %v1799_v26 = vld [vmem:[%s3046_s2 + $0x8] sm:$0xff]  ;;  %v1806_v27 = vld [vmem:[%s3046_s2 + $0x10] sm:$0xff]  ;;  %v223_v33 = vlaneseq }
   0xc   : > { %1609 = vset.pattern.permute.xlu1 %v1656_v0  ;;  %1608 = vset.pattern.permute.xlu0 %v1656_v0  ;;  %s1658_s19 = smov 127   ;;  %3140 = vst [vmem:[#allocation7_spill] sm:$0xff] %v1794_v25  ;;  %v1811_v28 = vld [vmem:[%s3046_s2 + $0x18] sm:$0xff]  ;;  %v1818_v29 = vld [vmem:[%s3046_s2 + $0x20] sm:$0xff]  ;;  %v1823_v30 = vld [vmem:[%s3046_s2 + $0x28] sm:$0xff]  ;;  %v1659_v32 = vmov 1  }
   0xd   : > { %s3300_s13 = smov (!%p176_p3, %s1571_s13), 1  ;;  %3141 = vst [vmem:[#allocation8_spill] sm:$0xff] %v1818_v29  ;;  %v1830_v31 = vld [vmem:[%s3046_s2 + $0x30] sm:$0xff]  ;;  %v1834_v34 = vand.u32 127, %v223_v33  ;;  %vm276_vm0 = vcmask 7168   ;;  %s1660_s11 = smov 16  }
   0xe   : > { %s1584_s14 = sshll.u32 %s3300_s13, 7  ;;  %s1585_s20 = sshll.u32 %s3300_s13, 6  ;;  %3142 = vst [vmem:[#allocation9_spill] sm:$0xff] %v1830_v31  ;;  %vm369_vm3 = vcmask 1039360   ;;  %vm534_vm6 = vcmask 130048   ;;  %vm1135_vm7 = vcmask 916480  }
   0xf   : > { %s1705_s17 = scalar_lea.vmem %s3044_s0, %s1584_s14  ;;  %s185_s23 = scalar_lea.vmem %s3045_s1, %s1585_s20  ;;  %v226_v35 = vand.u32 15, %v1834_v34  ;;  %v1838_v36 = vadd.s32 128, %v1834_v34 }
  0x10   : > { %v1708_v1 = vld [vmem:[%s1705_s17 + $0x10] sm:$0xff]  ;;  %v1711_v2 = vld [vmem:[%s1705_s17] sm:$0xff]  ;;  %v1716_v3 = vld [vmem:[%s1705_s17 + $0x18] sm:$0xff]  ;;  %s2970_s5 = scalar_lea.vmem %s3047_s3, %s1584_s14 }
  0x11   : > { %248 = vrot.lane.b32.xlu1 %v1708_v1, %s1657_s18  ;;  %244 = vrot.lane.b32.xlu0 %v1711_v2, %s1657_s18  ;;  %v1719_v4 = vld [vmem:[%s1705_s17 + $0x8] sm:$0xff]  ;;  %v1727_v6 = vld [vmem:[%s1705_s17 + $0x20] sm:$0xff]  ;;  %v1842_v37 = vadd.s32 4294967295, %v226_v35  ;;  %v227_v38 = vand.u32 15, %v1838_v36 }
  0x12   : > { %v1724_v5 = vld [vmem:[%s1705_s17 + $0x28] sm:$0xff]  ;;  %v1732_v7 = vld [vmem:[%s1705_s17 + $0x38] sm:$0xff]  ;;  %v1735_v8 = vld [vmem:[%s1705_s17 + $0x30] sm:$0xff] }
  0x13   : > { %v1740_v9 = vld [vmem:[%s1705_s17 + $0x48] sm:$0xff]  ;;  %v1743_v10 = vld [vmem:[%s1705_s17 + $0x40] sm:$0xff]  ;;  %v1748_v11 = vld [vmem:[%s1705_s17 + $0x58] sm:$0xff]  ;;  %vm311_vm1 = vcmp.ge.s32.totalorder %v1842_v37, 0  ;;  %v1848_v39 = vadd.s32 4294967295, %v227_v38 }
  0x14   : > { %3135 = vst [vmem:[#allocation2_spill] sm:$0xff] %v1748_v11  ;;  %v1751_v12 = vld [vmem:[%s1705_s17 + $0x50] sm:$0xff]  ;;  %v1756_v13 = vld [vmem:[%s1705_s17 + $0x68] sm:$0xff]  ;;  %v1759_v14 = vld [vmem:[%s1705_s17 + $0x60] sm:$0xff] }
  0x15   : > { %250 = vrot.lane.b32.xlu1 %v1716_v3, %s1657_s18  ;;  %246 = vrot.lane.b32.xlu0 %v1719_v4, %s1657_s18  ;;  %3136 = vst [vmem:[#allocation3_spill] sm:$0xff] %v1756_v13  ;;  %3137 = vst [vmem:[#allocation4_spill] sm:$0xff] %v1759_v14  ;;  %v1764_v15 = vld [vmem:[%s1705_s17 + $0x78] sm:$0xff]  ;;  %v1767_v16 = vld [vmem:[%s1705_s17 + $0x70] sm:$0xff]  ;;  %vm312_vm2 = vcmp.ge.s32.totalorder %v1848_v39, 0 }
  0x16   : > { %3138 = vst [vmem:[#allocation5_spill] sm:$0xff] %v1764_v15  ;;  %3139 = vst [vmem:[#allocation6_spill] sm:$0xff] %v1767_v16  ;;  %v208_v17 = vld [vmem:[%s185_s23 + $0x8] sm:$0xff]  ;;  %v207_v18 = vld [vmem:[%s185_s23] sm:$0xff] }
  0x17   : > { %v209_v19 = vld [vmem:[%s185_s23 + $0x10] sm:$0xff]  ;;  %v210_v20 = vld [vmem:[%s185_s23 + $0x18] sm:$0xff]  ;;  %v211_v21 = vld [vmem:[%s185_s23 + $0x20] sm:$0xff] }
  0x18   : > { %v212_v22 = vld [vmem:[%s185_s23 + $0x28] sm:$0xff]  ;;  %v213_v23 = vld [vmem:[%s185_s23 + $0x30] sm:$0xff]  ;;  %v214_v24 = vld [vmem:[%s185_s23 + $0x38] sm:$0xff] }
  0x19   : > { %254 = vrot.lane.b32.xlu1 %v1724_v5, %s1657_s18  ;;  %252 = vrot.lane.b32.xlu0 %v1727_v6, %s1657_s18  ;;  %v1968_v37 = vld [vmem:[%s3046_s2 + $0x38] sm:$0xff] }
  0x1a   : > { %3159 = vst [vmem:[#allocation26_spill] sm:$0xff] %v1968_v37 }
  0x1d   : > { %258 = vrot.lane.b32.xlu1 %v1732_v7, %s1657_s18  ;;  %256 = vrot.lane.b32.xlu0 %v1735_v8, %s1657_s18 }
  0x21   : > { %262 = vrot.lane.b32.xlu1 %v1740_v9, %s1657_s18  ;;  %260 = vrot.lane.b32.xlu0 %v1743_v10, %s1657_s18 }
  0x25   : > { %266 = vrot.lane.b32.xlu1 %v1748_v11, %s1657_s18  ;;  %264 = vrot.lane.b32.xlu0 %v1751_v12, %s1657_s18 }
  0x29   : > { %270 = vrot.lane.b32.xlu1 %v1756_v13, %s1657_s18  ;;  %268 = vrot.lane.b32.xlu0 %v1759_v14, %s1657_s18 }
  0x2d   : > { %274 = vrot.lane.b32.xlu1 %v1764_v15, %s1657_s18  ;;  %272 = vrot.lane.b32.xlu0 %v1767_v16, %s1657_s18  ;;  %s1665_s18 = smov 112  }
  0x31   : > { %339 = vrot.lane.b32.xlu1 %v1719_v4, %s1658_s19  ;;  %337 = vrot.lane.b32.xlu0 %v1711_v2, %s1658_s19 }
  0x35   : > { %343 = vrot.lane.b32.xlu1 %v1716_v3, %s1658_s19  ;;  %341 = vrot.lane.b32.xlu0 %v1708_v1, %s1658_s19 }
  0x39   : > { %347 = vrot.lane.b32.xlu1 %v1724_v5, %s1658_s19  ;;  %345 = vrot.lane.b32.xlu0 %v1727_v6, %s1658_s19 }
  0x3d   : > { %351 = vrot.lane.b32.xlu1 %v1732_v7, %s1658_s19  ;;  %349 = vrot.lane.b32.xlu0 %v1735_v8, %s1658_s19 }
  0x41   : > { %355 = vrot.lane.b32.xlu1 %v1740_v9, %s1658_s19  ;;  %353 = vrot.lane.b32.xlu0 %v1743_v10, %s1658_s19 }
  0x45   : > { %359 = vrot.lane.b32.xlu1 %v1748_v11, %s1658_s19  ;;  %357 = vrot.lane.b32.xlu0 %v1751_v12, %s1658_s19 }
  0x49   : > { %363 = vrot.lane.b32.xlu1 %v1756_v13, %s1658_s19  ;;  %361 = vrot.lane.b32.xlu0 %v1759_v14, %s1658_s19 }
  0x4d   : > { %367 = vrot.lane.b32.xlu1 %v1764_v15, %s1658_s19  ;;  %365 = vrot.lane.b32.xlu0 %v1767_v16, %s1658_s19 }
  0x51   : > { %437 = vperm.xlu1 %1609, %v208_v17   ;;  %432 = vperm.xlu0 %1608, %v207_v18  }
  0x55   : > { %442 = vperm.xlu1 %1609, %v209_v19   ;;  %447 = vperm.xlu0 %1608, %v210_v20  }
  0x59   : > { %452 = vperm.xlu1 %1609, %v211_v21   ;;  %457 = vperm.xlu0 %1608, %v212_v22  }
  0x5d   : > { %462 = vperm.xlu1 %1609, %v213_v23   ;;  %467 = vperm.xlu0 %1608, %v214_v24  }
  0x61   : > { %569 = vperm.xlu1 %1609, %v1794_v25   ;;  %574 = vperm.xlu0 %1608, %v1799_v26  }
  0x65   : > { %579 = vperm.xlu1 %1609, %v1806_v27   ;;  %584 = vperm.xlu0 %1608, %v1811_v28  }
  0x69   : > { %589 = vperm.xlu1 %1609, %v1818_v29   ;;  %594 = vperm.xlu0 %1608, %v1823_v30  }
  0x6d   : > { %599 = vperm.xlu1 %1609, %v1830_v31  }
  0x71   : > { %1610 = vset.pattern.permute.xlu1 %v1659_v32 }
  0x83   : > { %v249_v40 = vpop.permute.xlu1 %248  ;;  %v245_v41 = vpop.permute.xlu0 %244 }
  0x84   : > { %v301_v42 = vsel %vm276_vm0, 0.0, %v245_v41  ;;  %v302_v43 = vsel %vm276_vm0, 0.0, %v249_v40 }
  0x85   : > { %v1854_v44 = vsel %vm311_vm1, %v301_v42, 0.0  ;;  %v1861_v47 = vsel %vm311_vm1, %v302_v43, 0.0 }
  0x86   : > { %3143 = vst [vmem:[#allocation10_spill] sm:$0xff] %v1854_v44  ;;  %502 = vrot.lane.b32.xlu1 %v1854_v44, %s1660_s11  ;;  %3144 = vst [vmem:[#allocation11_spill] sm:$0xff] %v1861_v47 }
  0x87   : > { %v251_v45 = vpop.permute.xlu1 %250  ;;  %v247_v46 = vpop.permute.xlu0 %246 }
  0x88   : > { %v277_v48 = vsel %vm276_vm0, %v245_v41, %v247_v46  ;;  %v278_v50 = vsel %vm276_vm0, %v249_v40, %v251_v45 }
  0x89   : > { %v1866_v49 = vsel %vm312_vm2, %v277_v48, 0.0  ;;  %v1876_v54 = vsel %vm312_vm2, %v278_v50, 0.0 }
  0x8a   : > { %3145 = vst [vmem:[#allocation12_spill] sm:$0xff] %v1866_v49  ;;  %506 = vrot.lane.b32.xlu1 %v1861_v47, %s1660_s11  ;;  %504 = vrot.lane.b32.xlu0 %v1866_v49, %s1660_s11  ;;  %3146 = vst [vmem:[#allocation13_spill] sm:$0xff] %v1876_v54 }
  0x8b   : > { %v255_v51 = vpop.permute.xlu1 %254  ;;  %v253_v52 = vpop.permute.xlu0 %252 }
  0x8c   : > { %v303_v53 = vsel %vm276_vm0, 0.0, %v253_v52  ;;  %v279_v56 = vsel %vm276_vm0, %v253_v52, %v255_v51 }
  0x8d   : > { %v1880_v55 = vsel %vm311_vm1, %v303_v53, 0.0  ;;  %v1890_v60 = vsel %vm312_vm2, %v279_v56, 0.0 }
  0x8e   : > { %3147 = vst [vmem:[#allocation14_spill] sm:$0xff] %v1880_v55  ;;  %508 = vrot.lane.b32.xlu0 %v1876_v54, %s1660_s11  ;;  %510 = vrot.lane.b32.xlu1 %v1880_v55, %s1660_s11  ;;  %3148 = vst [vmem:[#allocation15_spill] sm:$0xff] %v1890_v60 }
  0x8f   : > { %v259_v57 = vpop.permute.xlu1 %258  ;;  %v257_v58 = vpop.permute.xlu0 %256 }
  0x90   : > { %v304_v59 = vsel %vm276_vm0, 0.0, %v257_v58  ;;  %v280_v62 = vsel %vm276_vm0, %v257_v58, %v259_v57 }
  0x91   : > { %v1894_v61 = vsel %vm311_vm1, %v304_v59, 0.0  ;;  %v1904_v18 = vsel %vm312_vm2, %v280_v62, 0.0 }
  0x92   : > { %3149 = vst [vmem:[#allocation16_spill] sm:$0xff] %v1894_v61  ;;  %512 = vrot.lane.b32.xlu0 %v1890_v60, %s1660_s11  ;;  %514 = vrot.lane.b32.xlu1 %v1894_v61, %s1660_s11  ;;  %3150 = vst [vmem:[#allocation17_spill] sm:$0xff] %v1904_v18 }
  0x93   : > { %v263_v63 = vpop.permute.xlu1 %262  ;;  %v261_v0 = vpop.permute.xlu0 %260 }
  0x94   : > { %v305_v17 = vsel %vm276_vm0, 0.0, %v261_v0  ;;  %v281_v20 = vsel %vm276_vm0, %v261_v0, %v263_v63 }
  0x95   : > { %v1908_v19 = vsel %vm311_vm1, %v305_v17, 0.0  ;;  %v1918_v24 = vsel %vm312_vm2, %v281_v20, 0.0 }
  0x96   : > { %3151 = vst [vmem:[#allocation18_spill] sm:$0xff] %v1908_v19  ;;  %516 = vrot.lane.b32.xlu0 %v1904_v18, %s1660_s11  ;;  %518 = vrot.lane.b32.xlu1 %v1908_v19, %s1660_s11  ;;  %3152 = vst [vmem:[#allocation19_spill] sm:$0xff] %v1918_v24 }
  0x97   : > { %v267_v21 = vpop.permute.xlu1 %266  ;;  %v265_v22 = vpop.permute.xlu0 %264 }
  0x98   : > { %v306_v23 = vsel %vm276_vm0, 0.0, %v265_v22  ;;  %v282_v40 = vsel %vm276_vm0, %v265_v22, %v267_v21 }
  0x99   : > { %v1922_v33 = vsel %vm311_vm1, %v306_v23, 0.0  ;;  %v1932_v45 = vsel %vm312_vm2, %v282_v40, 0.0 }
  0x9a   : > { %3153 = vst [vmem:[#allocation20_spill] sm:$0xff] %v1922_v33  ;;  %520 = vrot.lane.b32.xlu0 %v1918_v24, %s1660_s11  ;;  %522 = vrot.lane.b32.xlu1 %v1922_v33, %s1660_s11  ;;  %3154 = vst [vmem:[#allocation21_spill] sm:$0xff] %v1932_v45 }
  0x9b   : > { %v271_v41 = vpop.permute.xlu1 %270  ;;  %v269_v42 = vpop.permute.xlu0 %268 }
  0x9c   : > { %v307_v43 = vsel %vm276_vm0, 0.0, %v269_v42  ;;  %v283_v48 = vsel %vm276_vm0, %v269_v42, %v271_v41 }
  0x9d   : > { %v1936_v46 = vsel %vm311_vm1, %v307_v43, 0.0  ;;  %v1946_v53 = vsel %vm312_vm2, %v283_v48, 0.0 }
  0x9e   : > { %3155 = vst [vmem:[#allocation22_spill] sm:$0xff] %v1936_v46  ;;  %524 = vrot.lane.b32.xlu0 %v1932_v45, %s1660_s11  ;;  %526 = vrot.lane.b32.xlu1 %v1936_v46, %s1660_s11  ;;  %3156 = vst [vmem:[#allocation23_spill] sm:$0xff] %v1946_v53 }
  0x9f   : > { %v275_v50 = vpop.permute.xlu1 %274  ;;  %v273_v51 = vpop.permute.xlu0 %272 }
  0xa0   : > { %v308_v52 = vsel %vm276_vm0, 0.0, %v273_v51  ;;  %v284_v57 = vsel %vm276_vm0, %v273_v51, %v275_v50 }
  0xa1   : > { %v1950_v56 = vsel %vm311_vm1, %v308_v52, 0.0  ;;  %v1959_v62 = vsel %vm312_vm2, %v284_v57, 0.0  ;;  %v2026_v52 = vadd.s32 1, %v226_v35  ;;  %v2032_v57 = vadd.s32 1, %v227_v38 }
  0xa2   : > { %3157 = vst [vmem:[#allocation24_spill] sm:$0xff] %v1950_v56  ;;  %528 = vrot.lane.b32.xlu0 %v1946_v53, %s1660_s11  ;;  %530 = vrot.lane.b32.xlu1 %v1950_v56, %s1660_s11  ;;  %3158 = vst [vmem:[#allocation25_spill] sm:$0xff] %v1959_v62 }
  0xa3   : > { %v340_v58 = vpop.permute.xlu1 %339  ;;  %v338_v59 = vpop.permute.xlu0 %337  ;;  %vm406_vm4 = vcmp.lt.s32.totalorder %v2026_v52, 16  ;;  %vm407_vm5 = vcmp.lt.s32.totalorder %v2032_v57, 16 }
  0xa4   : > { %v394_v34 = vsel %vm369_vm3, %v340_v58, 0.0 }
  0xa5   : > { %v2048_v36 = vsel %vm407_vm5, %v394_v34, 0.0 }
  0xa6   : > { %639 = vrot.lane.b32.xlu1 %v1711_v2, %s1660_s11  ;;  %532 = vrot.lane.b32.xlu0 %v1959_v62, %s1660_s11  ;;  %3160 = vst [vmem:[#allocation27_spill] sm:$0xff] %v2048_v36 }
  0xa7   : > { %v344_v63 = vpop.permute.xlu1 %343  ;;  %v342_v39 = vpop.permute.xlu0 %341 }
  0xaa   : > { %643 = vrot.lane.b32.xlu1 %v1708_v1, %s1660_s11  ;;  %604 = vperm.xlu0 %1608, %v1968_v37  }
  0xab   : > { %v348_v0 = vpop.permute.xlu1 %347  ;;  %v346_v20 = vpop.permute.xlu0 %345 }
  0xae   : > { %647 = vrot.lane.b32.xlu1 %v1727_v6, %s1660_s11  ;;  %641 = vrot.lane.b32.xlu0 %v1719_v4, %s1660_s11 }
  0xaf   : > { %v1977_v17 = vpop.permute.xlu1 %351  ;;  %1611 = vset.pattern.permute.xlu0 %v1659_v32  ;;  %v350_v22 = vpop.permute.xlu0 %349 }
  0xb2   : > { %651 = vrot.lane.b32.xlu1 %v1735_v8, %s1660_s11  ;;  %645 = vrot.lane.b32.xlu0 %v1716_v3, %s1660_s11 }
  0xb3   : > { %v1984_v21 = vpop.permute.xlu1 %355  ;;  %v354_v23 = vpop.permute.xlu0 %353 }
  0xb6   : > { %655 = vrot.lane.b32.xlu1 %v1743_v10, %s1660_s11  ;;  %649 = vrot.lane.b32.xlu0 %v1724_v5, %s1660_s11 }
  0xb7   : > { %v1994_v32 = vpop.permute.xlu1 %359  ;;  %v358_v41 = vpop.permute.xlu0 %357 }
  0xba   : > { %659 = vrot.lane.b32.xlu1 %v1751_v12, %s1660_s11  ;;  %653 = vrot.lane.b32.xlu0 %v1732_v7, %s1660_s11 }
  0xbb   : > { %v2000_v40 = vpop.permute.xlu1 %363  ;;  %v2011_v43 = vpop.permute.xlu0 %361 }
  0xbe   : > { %663 = vrot.lane.b32.xlu1 %v1759_v14, %s1660_s11  ;;  %657 = vrot.lane.b32.xlu0 %v1740_v9, %s1660_s11  ;;  %v1661_v14 = vmov 2  }
  0xbf   : > { %v2009_v42 = vpop.permute.xlu1 %367  ;;  %v2020_v50 = vpop.permute.xlu0 %365 }
  0xc2   : > { %667 = vrot.lane.b32.xlu1 %v1767_v16, %s1660_s11  ;;  %661 = vrot.lane.b32.xlu0 %v1748_v11, %s1660_s11  ;;  %v370_v16 = vsel %vm369_vm3, %v338_v59, %v340_v58  ;;  %v371_v59 = vsel %vm369_vm3, %v342_v39, %v344_v63  ;;  %v395_v58 = vsel %vm369_vm3, %v344_v63, 0.0  ;;  %v372_v39 = vsel %vm369_vm3, %v346_v20, %v348_v0 }
  0xc3   : > { %v2052_v38 = vsel %vm406_vm4, %v370_v16, 0.0  ;;  %v2064_v34 = vsel %vm407_vm5, %v395_v58, 0.0  ;;  %v2068_v16 = vsel %vm406_vm4, %v371_v59, 0.0  ;;  %v2084_v59 = vsel %vm406_vm4, %v372_v39, 0.0 }
  0xc4   : > { %3161 = vst [vmem:[#allocation28_spill] sm:$0xff] %v2052_v38  ;;  %3162 = vst [vmem:[#allocation29_spill] sm:$0xff] %v2064_v34  ;;  %v373_v20 = vsel %vm369_vm3, %v350_v22, %v1977_v17 }
  0xc5   : > { %3163 = vst [vmem:[#allocation30_spill] sm:$0xff] %v2068_v16  ;;  %3165 = vst [vmem:[#allocation32_spill] sm:$0xff] %v2084_v59  ;;  %v2104_v22 = vsel %vm406_vm4, %v373_v20, 0.0 }
  0xc6   : > { %704 = vperm.xlu1 %1610, %v1794_v25   ;;  %665 = vrot.lane.b32.xlu0 %v1756_v13, %s1660_s11  ;;  %3167 = vst [vmem:[#allocation34_spill] sm:$0xff] %v2104_v22 }
  0xca   : > { %712 = vperm.xlu1 %1610, %v1806_v27   ;;  %669 = vrot.lane.b32.xlu0 %v1764_v15, %s1660_s11 }
  0xcc   : > { %v2016_v48 = vpop.permute.xlu1 %437  ;;  %v2034_v15 = vpop.permute.xlu0 %432 }
  0xce   : > { %716 = vperm.xlu1 %1610, %v1811_v28   ;;  %708 = vperm.xlu0 %1611, %v1799_v26  }
  0xd0   : > { %v2022_v51 = vpop.permute.xlu1 %442  ;;  %v2044_v35 = vpop.permute.xlu0 %447 }
  0xd2   : > { %724 = vperm.xlu1 %1610, %v1823_v30   ;;  %720 = vperm.xlu0 %1611, %v1818_v29  }
  0xd4   : > { %v2038_v13 = vpop.permute.xlu1 %452  ;;  %v2076_v63 = vpop.permute.xlu0 %457 }
  0xd6   : > { %732 = vperm.xlu1 %1610, %v1968_v37   ;;  %728 = vperm.xlu0 %1611, %v1830_v31  }
  0xd8   : > { %v2060_v11 = vpop.permute.xlu1 %462 }
  0xda   : > { %785 = vrot.lane.b32.xlu1 %v2048_v36, %s1660_s11  ;;  %783 = vrot.lane.b32.xlu0 %v2052_v38, %s1660_s11 }
  0xdb   : > { %1613 = vset.pattern.permute.xlu1 %v1661_v14  ;;  %1612 = vset.pattern.permute.xlu0 %v1661_v14  ;;  %v396_v14 = vsel %vm369_vm3, %v348_v0, 0.0  ;;  %v397_v0 = vsel %vm369_vm3, %v1977_v17, 0.0 }
  0xdc   : > { %v2080_v58 = vsel %vm407_vm5, %v396_v14, 0.0  ;;  %v2088_v38 = vpop.permute.xlu1 %569  ;;  %v2096_v14 = vpop.permute.xlu0 %467  ;;  %v2100_v39 = vsel %vm407_vm5, %v397_v0, 0.0 }
  0xdd   : > { %3164 = vst [vmem:[#allocation31_spill] sm:$0xff] %v2080_v58  ;;  %3166 = vst [vmem:[#allocation33_spill] sm:$0xff] %v2100_v39 }
  0xde   : > { %789 = vrot.lane.b32.xlu1 %v2064_v34, %s1660_s11  ;;  %787 = vrot.lane.b32.xlu0 %v2068_v16, %s1660_s11  ;;  %v398_v34 = vsel %vm369_vm3, %v1984_v21, 0.0 }
  0xdf   : > { %v2118_v0 = vsel %vm407_vm5, %v398_v34, 0.0 }
  0xe0   : > { %v2114_v17 = vpop.permute.xlu1 %579  ;;  %3168 = vst [vmem:[#allocation35_spill] sm:$0xff] %v2118_v0 }
  0xe2   : > { %793 = vrot.lane.b32.xlu1 %v2080_v58, %s1660_s11  ;;  %791 = vrot.lane.b32.xlu0 %v2084_v59, %s1660_s11  ;;  %v374_v58 = vsel %vm369_vm3, %v354_v23, %v1984_v21  ;;  %v399_v59 = vsel %vm369_vm3, %v1994_v32, 0.0  ;;  %v375_v21 = vsel %vm369_vm3, %v358_v41, %v1994_v32  ;;  %v2132_v23 = vpop.permute.xlu0 %574  ;;  %v376_v32 = vsel %vm369_vm3, %v2011_v43, %v2000_v40 }
  0xe3   : > { %v2122_v20 = vsel %vm406_vm4, %v374_v58, 0.0  ;;  %v2136_v34 = vsel %vm407_vm5, %v399_v59, 0.0  ;;  %v2140_v58 = vsel %vm406_vm4, %v375_v21, 0.0  ;;  %v2157_v21 = vsel %vm406_vm4, %v376_v32, 0.0 }
  0xe4   : > { %3169 = vst [vmem:[#allocation36_spill] sm:$0xff] %v2122_v20  ;;  %3170 = vst [vmem:[#allocation37_spill] sm:$0xff] %v2136_v34  ;;  %v2147_v41 = vpop.permute.xlu1 %589  ;;  %v377_v43 = vsel %vm369_vm3, %v2020_v50, %v2009_v42 }
  0xe5   : > { %3171 = vst [vmem:[#allocation38_spill] sm:$0xff] %v2140_v58  ;;  %3172 = vst [vmem:[#allocation39_spill] sm:$0xff] %v2147_v41  ;;  %v2176_v32 = vsel %vm406_vm4, %v377_v43, 0.0 }
  0xe6   : > { %797 = vrot.lane.b32.xlu1 %v2100_v39, %s1660_s11  ;;  %795 = vrot.lane.b32.xlu0 %v2104_v22, %s1660_s11  ;;  %v400_v22 = vsel %vm369_vm3, %v2000_v40, 0.0  ;;  %v2153_v59 = vpop.permute.xlu0 %584  ;;  %3173 = vst [vmem:[#allocation40_spill] sm:$0xff] %v2157_v21  ;;  %v401_v40 = vsel %vm369_vm3, %v2009_v42, 0.0  ;;  %3176 = vst [vmem:[#allocation43_spill] sm:$0xff] %v2176_v32 }
  0xe7   : > { %v2161_v39 = vsel %vm407_vm5, %v400_v22, 0.0  ;;  %v2180_v22 = vsel %vm407_vm5, %v401_v40, 0.0 }
  0xe8   : > { %3174 = vst [vmem:[#allocation41_spill] sm:$0xff] %v2161_v39  ;;  %3177 = vst [vmem:[#allocation44_spill] sm:$0xff] %v2180_v22 }
  0xea   : > { %801 = vrot.lane.b32.xlu1 %v2118_v0, %s1660_s11  ;;  %799 = vrot.lane.b32.xlu0 %v2122_v20, %s1660_s11  ;;  %v2186_v42 = vpop.permute.xlu0 %594 }
  0xeb   : > { %3178 = vst [vmem:[#allocation45_spill] sm:$0xff] %v2186_v42 }
  0xee   : > { %805 = vrot.lane.b32.xlu1 %v2136_v34, %s1660_s11  ;;  %803 = vrot.lane.b32.xlu0 %v2140_v58, %s1660_s11  ;;  %v2172_v58 = vpop.permute.xlu1 %599 }
  0xef   : > { %3175 = vst [vmem:[#allocation42_spill] sm:$0xff] %v2172_v58  ;;  %v1663_v58 = vmov 4  }
  0xf2   : > { %809 = vrot.lane.b32.xlu1 %v2161_v39, %s1660_s11  ;;  %807 = vrot.lane.b32.xlu0 %v2157_v21, %s1660_s11  ;;  %v1662_v21 = vmov 3  }
  0xf6   : > { %813 = vrot.lane.b32.xlu1 %v2180_v22, %s1660_s11  ;;  %811 = vrot.lane.b32.xlu0 %v2176_v32, %s1660_s11 }
  0xf8   : > { %v2188_v50 = vpop.permute.xlu1 %502 }
  0xfa   : > { %852 = vperm.xlu1 %1613, %v1799_v26   ;;  %848 = vperm.xlu0 %1612, %v1794_v25  }
  0xfc   : > { %v2192_v52 = vpop.permute.xlu1 %506  ;;  %v2194_v43 = vpop.permute.xlu0 %504 }
  0xfe   : > { %856 = vperm.xlu1 %1613, %v1806_v27   ;;  %860 = vperm.xlu0 %1612, %v1811_v28  }
 0x100   : > { %v2198_v57 = vpop.permute.xlu1 %510  ;;  %v2200_v40 = vpop.permute.xlu0 %508 }
 0x102   : > { %864 = vperm.xlu1 %1613, %v1818_v29   ;;  %868 = vperm.xlu0 %1612, %v1823_v30  }
 0x104   : > { %v2204_v22 = vpop.permute.xlu1 %514  ;;  %v2206_v32 = vpop.permute.xlu0 %512 }
 0x106   : > { %872 = vperm.xlu1 %1613, %v1830_v31   ;;  %876 = vperm.xlu0 %1612, %v1968_v37  }
 0x108   : > { %v2210_v34 = vpop.permute.xlu1 %518  ;;  %v2212_v39 = vpop.permute.xlu0 %516 }
 0x10a   : > { %1614 = vset.pattern.permute.xlu1 %v1662_v21  ;;  %1615 = vset.pattern.permute.xlu0 %v1662_v21 }
 0x10b   : > { %912 = vperm.xlu1 %1614, %v1794_v25   ;;  %916 = vperm.xlu0 %1615, %v1799_v26  }
 0x10c   : > { %v2216_v0 = vpop.permute.xlu1 %522  ;;  %v2218_v20 = vpop.permute.xlu0 %520 }
 0x10f   : > { %920 = vperm.xlu1 %1614, %v1806_v27   ;;  %928 = vperm.xlu0 %1615, %v1818_v29  }
 0x110   : > { %v2222_v16 = vpop.permute.xlu1 %526  ;;  %v2228_v21 = vpop.permute.xlu0 %524 }
 0x111   : > { %3179 = vst [vmem:[#allocation46_spill] sm:$0xff] %v2222_v16  ;;  %3181 = vst [vmem:[#allocation48_spill] sm:$0xff] %v2228_v21 }
 0x113   : > { %924 = vperm.xlu1 %1614, %v1811_v28   ;;  %936 = vperm.xlu0 %1615, %v1830_v31  }
 0x114   : > { %v2226_v36 = vpop.permute.xlu1 %530  ;;  %v2234_v41 = vpop.permute.xlu0 %528 }
 0x115   : > { %3180 = vst [vmem:[#allocation47_spill] sm:$0xff] %v2226_v36  ;;  %3183 = vst [vmem:[#allocation50_spill] sm:$0xff] %v2234_v41 }
 0x117   : > { %932 = vperm.xlu1 %1614, %v1823_v30   ;;  %1616 = vset.pattern.permute.xlu0 %v1663_v58 }
 0x118   : > { %v2231_v42 = vpop.permute.xlu1 %639  ;;  %976 = vperm.xlu0 %1616, %v1794_v25   ;;  %v2244_v21 = vpop.permute.xlu0 %532 }
 0x119   : > { %3182 = vst [vmem:[#allocation49_spill] sm:$0xff] %v2231_v42  ;;  %3186 = vst [vmem:[#allocation53_spill] sm:$0xff] %v2244_v21 }
 0x11b   : > { %940 = vperm.xlu1 %1614, %v1968_v37  }
 0x11c   : > { %v2237_v16 = vpop.permute.xlu1 %643  ;;  %988 = vperm.xlu0 %1616, %v1811_v28  }
 0x11d   : > { %3184 = vst [vmem:[#allocation51_spill] sm:$0xff] %v2237_v16  ;;  %v1664_v16 = vmov 5  }
 0x11f   : > { %1617 = vset.pattern.permute.xlu1 %v1663_v58 }
 0x120   : > { %980 = vperm.xlu1 %1617, %v1799_v26   ;;  %v2241_v36 = vpop.permute.xlu1 %647  ;;  %996 = vperm.xlu0 %1616, %v1823_v30  }
 0x121   : > { %3185 = vst [vmem:[#allocation52_spill] sm:$0xff] %v2241_v36 }
 0x124   : > { %984 = vperm.xlu1 %1617, %v1806_v27   ;;  %1004 = vperm.xlu0 %1616, %v1968_v37   ;;  %v2248_v42 = vpop.permute.xlu1 %651 }
 0x125   : > { %3187 = vst [vmem:[#allocation54_spill] sm:$0xff] %v2248_v42  ;;  %v2250_v41 = vpop.permute.xlu0 %604 }
 0x126   : > { %3188 = vst [vmem:[#allocation55_spill] sm:$0xff] %v2250_v41 }
 0x128   : > { %992 = vperm.xlu1 %1617, %v1818_v29   ;;  %1619 = vset.pattern.permute.xlu0 %v1664_v16  ;;  %v2256_v36 = vpop.permute.xlu1 %655 }
 0x129   : > { %1044 = vperm.xlu0 %1619, %v1799_v26   ;;  %v2254_v58 = vpop.permute.xlu0 %641  ;;  %3190 = vst [vmem:[#allocation57_spill] sm:$0xff] %v2256_v36  ;;  %v1666_v36 = vmov 6  }
 0x12a   : > { %3189 = vst [vmem:[#allocation56_spill] sm:$0xff] %v2254_v58 }
 0x12c   : > { %1000 = vperm.xlu1 %1617, %v1830_v31   ;;  %v2262_v42 = vpop.permute.xlu1 %659 }
 0x12d   : > { %1056 = vperm.xlu0 %1619, %v1818_v29   ;;  %v2260_v21 = vpop.permute.xlu0 %645 }
 0x12e   : > { %3191 = vst [vmem:[#allocation58_spill] sm:$0xff] %v2260_v21 }
 0x130   : > { %1618 = vset.pattern.permute.xlu1 %v1664_v16  ;;  %v2273_v21 = vpop.permute.xlu1 %663 }
 0x131   : > { %1040 = vperm.xlu1 %1618, %v1794_v25   ;;  %1064 = vperm.xlu0 %1619, %v1830_v31   ;;  %v2266_v41 = vpop.permute.xlu0 %649  ;;  %3194 = vst [vmem:[#allocation61_spill] sm:$0xff] %v2273_v21 }
 0x132   : > { %3192 = vst [vmem:[#allocation59_spill] sm:$0xff] %v2266_v41 }
 0x134   : > { %v2280_v41 = vpop.permute.xlu1 %667 }
 0x135   : > { %1048 = vperm.xlu1 %1618, %v1806_v27   ;;  %1103 = vrot.lane.b32.xlu0 %v1854_v44, %s1665_s18  ;;  %v2271_v58 = vpop.permute.xlu0 %653 }
 0x136   : > { %3193 = vst [vmem:[#allocation60_spill] sm:$0xff] %v2271_v58  ;;  %1620 = vset.pattern.permute.xlu0 %v1666_v36 }
 0x139   : > { %1052 = vperm.xlu1 %1618, %v1811_v28   ;;  %1107 = vrot.lane.b32.xlu0 %v1861_v47, %s1665_s18  ;;  %v2278_v16 = vpop.permute.xlu0 %657 }
 0x13a   : > { %3195 = vst [vmem:[#allocation62_spill] sm:$0xff] %v2278_v16 }
 0x13d   : > { %1060 = vperm.xlu1 %1618, %v1823_v30   ;;  %1111 = vrot.lane.b32.xlu0 %v1880_v55, %s1665_s18  ;;  %v2285_v44 = vpop.permute.xlu0 %661 }
 0x141   : > { %1068 = vperm.xlu1 %1618, %v1968_v37   ;;  %v2288_v58 = vpop.permute.xlu1 %704  ;;  %1115 = vrot.lane.b32.xlu0 %v1894_v61, %s1665_s18  ;;  %v2292_v21 = vpop.permute.xlu0 %665 }
 0x142   : > { %3196 = vst [vmem:[#allocation63_spill] sm:$0xff] %v2292_v21 }
 0x145   : > { %1105 = vrot.lane.b32.xlu1 %v1866_v49, %s1665_s18  ;;  %v2296_v47 = vpop.permute.xlu1 %712  ;;  %1119 = vrot.lane.b32.xlu0 %v1908_v19, %s1665_s18  ;;  %v2300_v55 = vpop.permute.xlu0 %669  ;;  %v474_v49 = vmul.f32 %v2022_v51, %v1727_v6 }
 0x146   : > { %3197 = vst [vmem:[#allocation64_spill] sm:$0xff] %v2296_v47  ;;  %1621 = vset.pattern.permute.xlu1 %v1666_v36 }
 0x149   : > { %1109 = vrot.lane.b32.xlu1 %v1876_v54, %s1665_s18  ;;  %v2304_v16 = vpop.permute.xlu1 %716  ;;  %1123 = vrot.lane.b32.xlu0 %v1922_v33, %s1665_s18  ;;  %v2308_v21 = vpop.permute.xlu0 %708 }
 0x14d   : > { %1113 = vrot.lane.b32.xlu1 %v1890_v60, %s1665_s18  ;;  %v2312_v47 = vpop.permute.xlu1 %724  ;;  %1127 = vrot.lane.b32.xlu0 %v1936_v46, %s1665_s18  ;;  %v2316_v19 = vpop.permute.xlu0 %720 }
 0x14e   : > { %3198 = vst [vmem:[#allocation65_spill] sm:$0xff] %v2316_v19 }
 0x151   : > { %1117 = vrot.lane.b32.xlu1 %v1904_v18, %s1665_s18  ;;  %v2320_v36 = vpop.permute.xlu1 %732  ;;  %1131 = vrot.lane.b32.xlu0 %v1950_v56, %s1665_s18  ;;  %v2324_v54 = vpop.permute.xlu0 %728 }
 0x152   : > { %3199 = vst [vmem:[#allocation66_spill] sm:$0xff] %v2324_v54 }
 0x155   : > { %1121 = vrot.lane.b32.xlu1 %v1918_v24, %s1665_s18  ;;  %v2328_v60 = vpop.permute.xlu1 %785  ;;  %1169 = vperm.xlu0 %1620, %v1794_v25   ;;  %v2331_v46 = vpop.permute.xlu0 %783 }
 0x156   : > { %3200 = vst [vmem:[#allocation67_spill] sm:$0xff] %v2328_v60  ;;  %3201 = vst [vmem:[#allocation68_spill] sm:$0xff] %v2331_v46 }
 0x159   : > { %1125 = vrot.lane.b32.xlu1 %v1932_v45, %s1665_s18  ;;  %v2335_v19 = vpop.permute.xlu1 %789  ;;  %1181 = vperm.xlu0 %1620, %v1811_v28   ;;  %v2338_v33 = vpop.permute.xlu0 %787  ;;  %v473_v45 = vmul.f32 %v2016_v48, %v1716_v3 }
 0x15a   : > { %3202 = vst [vmem:[#allocation69_spill] sm:$0xff] %v2335_v19  ;;  %3203 = vst [vmem:[#allocation70_spill] sm:$0xff] %v2338_v33  ;;  %v476_v33 = vmul.f32 %v2044_v35, %v1735_v8  ;;  %v477_v19 = vmul.f32 %v2044_v35, %v1732_v7 }
 0x15d   : > { %1129 = vrot.lane.b32.xlu1 %v1946_v53, %s1665_s18  ;;  %v2342_v54 = vpop.permute.xlu1 %793  ;;  %1189 = vperm.xlu0 %1620, %v1823_v30   ;;  %v2345_v24 = vpop.permute.xlu0 %791  ;;  %v1667_v30 = vmov 7  }
 0x15e   : > { %3204 = vst [vmem:[#allocation71_spill] sm:$0xff] %v2342_v54  ;;  %3205 = vst [vmem:[#allocation72_spill] sm:$0xff] %v2345_v24 }
 0x161   : > { %v2347_v56 = vpop.permute.xlu1 %797  ;;  %1133 = vrot.lane.b32.xlu1 %v1959_v62, %s1665_s18  ;;  %1197 = vperm.xlu0 %1620, %v1968_v37   ;;  %v2352_v25 = vpop.permute.xlu0 %795  ;;  %v472_v62 = vmul.f32 %v2016_v48, %v1708_v1 }
 0x165   : > { %v2354_v28 = vpop.permute.xlu1 %801  ;;  %1173 = vperm.xlu1 %1621, %v1799_v26   ;;  %1234 = vrot.lane.b32.xlu0 %v1719_v4, %s1665_s18  ;;  %v2359_v54 = vpop.permute.xlu0 %799 }
 0x166   : > { %3206 = vst [vmem:[#allocation73_spill] sm:$0xff] %v2354_v28  ;;  %3207 = vst [vmem:[#allocation74_spill] sm:$0xff] %v2359_v54  ;;  %1623 = vset.pattern.permute.xlu0 %v1667_v30 }
 0x169   : > { %v2361_v24 = vpop.permute.xlu1 %805  ;;  %1177 = vperm.xlu1 %1621, %v1806_v27   ;;  %1238 = vrot.lane.b32.xlu0 %v1716_v3, %s1665_s18  ;;  %v2366_v53 = vpop.permute.xlu0 %803  ;;  %v478_v3 = vmul.f32 %v2038_v13, %v1743_v10 }
 0x16a   : > { %3208 = vst [vmem:[#allocation75_spill] sm:$0xff] %v2361_v24  ;;  %3209 = vst [vmem:[#allocation76_spill] sm:$0xff] %v2366_v53 }
 0x16d   : > { %v2368_v37 = vpop.permute.xlu1 %809  ;;  %1185 = vperm.xlu1 %1621, %v1818_v29   ;;  %1242 = vrot.lane.b32.xlu0 %v1724_v5, %s1665_s18  ;;  %v2373_v28 = vpop.permute.xlu0 %807 }
 0x16e   : > { %3210 = vst [vmem:[#allocation77_spill] sm:$0xff] %v2368_v37  ;;  %3211 = vst [vmem:[#allocation78_spill] sm:$0xff] %v2373_v28  ;;  %v559_v37 = vsel %vm534_vm6, 0.0, %v2188_v50  ;;  %v470_v28 = vmul.f32 %v2034_v15, %v1711_v2 }
 0x16f   : > { %v607_v48 = vmul.f32 %v2088_v38, %v559_v37  ;;  %v480_v37 = vmul.f32 %v2076_v63, %v1751_v12 }
 0x171   : > { %v2375_v54 = vpop.permute.xlu1 %813  ;;  %1193 = vperm.xlu1 %1621, %v1830_v31   ;;  %1246 = vrot.lane.b32.xlu0 %v1732_v7, %s1665_s18  ;;  %v2380_v27 = vpop.permute.xlu0 %811  ;;  %v479_v7 = vmul.f32 %v2038_v13, %v1740_v9  ;;  %v3219_v31 = vld [vmem:[#allocation6_spill] sm:$0xff]  ;;  %v3220_v13 = vld [vmem:[#allocation5_spill] sm:$0xff]  ;;  %v2439_v24 = vadd.f32 %v607_v48, %v470_v28  ;;  %v538_v28 = vsel %vm534_vm6, %v2204_v22, %v2212_v39 }
 0x172   : > { %3212 = vst [vmem:[#allocation79_spill] sm:$0xff] %v2375_v54  ;;  %3213 = vst [vmem:[#allocation80_spill] sm:$0xff] %v2380_v27  ;;  %v471_v54 = vmul.f32 %v2034_v15, %v1719_v4  ;;  %v475_v27 = vmul.f32 %v2022_v51, %v1724_v5  ;;  %v560_v4 = vsel %vm534_vm6, 0.0, %v2192_v52  ;;  %v535_v15 = vsel %vm534_vm6, %v2188_v50, %v2194_v43  ;;  %v3216_v51 = vld [vmem:[#allocation2_spill] sm:$0xff]  ;;  %v3217_v43 = vld [vmem:[#allocation4_spill] sm:$0xff] }
 0x173   : > { %v481_v35 = vmul.f32 %v2076_v63, %v3216_v51  ;;  %v561_v50 = vsel %vm534_vm6, 0.0, %v2198_v57  ;;  %v485_v63 = vmul.f32 %v2096_v14, %v3220_v13  ;;  %v609_v53 = vmul.f32 %v2132_v23, %v560_v4  ;;  %v3222_v48 = vld [vmem:[#allocation46_spill] sm:$0xff] }
 0x174   : > { %v565_v4 = vsel %vm534_vm6, 0.0, %v3222_v48 }
 0x175   : > { %v2408_v18 = vpop.permute.xlu1 %852  ;;  %1232 = vrot.lane.b32.xlu1 %v1711_v2, %s1665_s18  ;;  %1250 = vrot.lane.b32.xlu0 %v1740_v9, %s1665_s18  ;;  %v2414_v5 = vpop.permute.xlu0 %848  ;;  %v482_v2 = vmul.f32 %v2060_v11, %v3217_v43  ;;  %v536_v9 = vsel %vm534_vm6, %v2192_v52, %v2200_v40  ;;  %v562_v43 = vsel %vm534_vm6, 0.0, %v2204_v22  ;;  %v563_v52 = vsel %vm534_vm6, 0.0, %v2210_v34 }
 0x176   : > { %3214 = vst [vmem:[#allocation81_spill] sm:$0xff] %v2408_v18  ;;  %3215 = vst [vmem:[#allocation82_spill] sm:$0xff] %v2414_v5  ;;  %1622 = vset.pattern.permute.xlu1 %v1667_v30  ;;  %v3218_v18 = vld [vmem:[#allocation3_spill] sm:$0xff]  ;;  %v484_v5 = vmul.f32 %v2096_v14, %v3219_v31  ;;  %v608_v30 = vmul.f32 %v2088_v38, %v535_v15  ;;  %v537_v31 = vsel %vm534_vm6, %v2198_v57, %v2206_v32  ;;  %v3223_v15 = vld [vmem:[#allocation48_spill] sm:$0xff] }
 0x177   : > { %v483_v61 = vmul.f32 %v2060_v11, %v3218_v18  ;;  %v611_v11 = vmul.f32 %v2114_v17, %v561_v50  ;;  %v610_v14 = vmul.f32 %v2132_v23, %v536_v9  ;;  %v564_v32 = vsel %vm534_vm6, 0.0, %v2216_v0 }
 0x178   : > { %v539_v57 = vsel %vm534_vm6, %v2210_v34, %v2218_v20  ;;  %v540_v23 = vsel %vm534_vm6, %v2216_v0, %v3223_v15  ;;  %v2473_v22 = vadd.f32 %v609_v53, %v472_v62  ;;  %v2475_v50 = vadd.f32 %v608_v30, %v471_v54  ;;  %v3225_v20 = vld [vmem:[#allocation39_spill] sm:$0xff]  ;;  %v3227_v62 = vld [vmem:[#allocation42_spill] sm:$0xff] }
 0x179   : > { %v2447_v40 = vpop.permute.xlu1 %856  ;;  %1236 = vrot.lane.b32.xlu1 %v1708_v1, %s1665_s18  ;;  %1254 = vrot.lane.b32.xlu0 %v3216_v51, %s1665_s18  ;;  %v2453_v38 = vpop.permute.xlu0 %860  ;;  %v613_v1 = vmul.f32 %v2153_v59, %v562_v43  ;;  %v3224_v51 = vld [vmem:[#allocation50_spill] sm:$0xff]  ;;  %v612_v9 = vmul.f32 %v2114_v17, %v537_v31  ;;  %v615_v34 = vmul.f32 %v3225_v20, %v563_v52  ;;  %v3228_v52 = vld [vmem:[#allocation47_spill] sm:$0xff] }
 0x17a   : > { %3221 = vst [vmem:[#allocation2_spill] sm:$0xff] %v2447_v40  ;;  %v541_v39 = vsel %vm534_vm6, %v3222_v48, %v3224_v51  ;;  %v614_v43 = vmul.f32 %v2153_v59, %v538_v28  ;;  %v3226_v40 = vld [vmem:[#allocation45_spill] sm:$0xff]  ;;  %v616_v60 = vmul.f32 %v3225_v20, %v539_v57  ;;  %v2490_v53 = vadd.f32 %v611_v11, %v474_v49  ;;  %v3230_v49 = vld [vmem:[#allocation55_spill] sm:$0xff]  ;;  %v3237_v20 = vld [vmem:[#allocation58_spill] sm:$0xff] }
 0x17b   : > { %v617_v46 = vmul.f32 %v3226_v40, %v564_v32  ;;  %v619_v17 = vmul.f32 %v3227_v62, %v565_v4  ;;  %v618_v0 = vmul.f32 %v3226_v40, %v540_v23  ;;  %v620_v59 = vmul.f32 %v3227_v62, %v541_v39  ;;  %v3229_v32 = vld [vmem:[#allocation53_spill] sm:$0xff] }
 0x17c   : > { %v626_v30 = vadd.f32 %v610_v14, %v473_v45  ;;  %v629_v31 = vadd.f32 %v613_v1, %v476_v33  ;;  %v566_v28 = vsel %vm534_vm6, 0.0, %v3228_v52  ;;  %v2502_v57 = vadd.f32 %v615_v34, %v478_v3  ;;  %v3231_v1 = vld [vmem:[#allocation49_spill] sm:$0xff] }
 0x17d   : > { %v2482_v29 = vpop.permute.xlu1 %864  ;;  %1240 = vrot.lane.b32.xlu1 %v1727_v6, %s1665_s18  ;;  %1258 = vrot.lane.b32.xlu0 %v3218_v18, %s1665_s18  ;;  %v2488_v54 = vpop.permute.xlu0 %868  ;;  %v542_v6 = vsel %vm534_vm6, %v3228_v52, %v3229_v32  ;;  %v2500_v18 = vadd.f32 %v612_v9, %v475_v27  ;;  %v621_v11 = vmul.f32 %v3230_v49, %v566_v28  ;;  %v700_v9 = vsel %vm534_vm6, 0.0, %v2262_v42 }
 0x17e   : > { %v622_v48 = vmul.f32 %v3230_v49, %v542_v6  ;;  %v630_v40 = vadd.f32 %v614_v43, %v477_v19  ;;  %v633_v4 = vadd.f32 %v617_v46, %v480_v37  ;;  %v2506_v15 = vadd.f32 %v616_v60, %v479_v7  ;;  %v3232_v60 = vld [vmem:[#allocation51_spill] sm:$0xff]  ;;  %v3233_v7 = vld [vmem:[#allocation52_spill] sm:$0xff] }
 0x17f   : > { %v2516_v27 = vadd.f32 %v619_v17, %v482_v2  ;;  %v634_v3 = vadd.f32 %v618_v0, %v481_v35  ;;  %v2518_v14 = vadd.f32 %v620_v59, %v483_v61  ;;  %v695_v19 = vsel %vm534_vm6, 0.0, %v3231_v1  ;;  %v3235_v2 = vld [vmem:[#allocation57_spill] sm:$0xff]  ;;  %v3236_v61 = vld [vmem:[#allocation56_spill] sm:$0xff] }
 0x180   : > { %v696_v46 = vsel %vm534_vm6, 0.0, %v3232_v60  ;;  %v2526_v37 = vsel %vm534_vm6, 0.0, %v3233_v7  ;;  %v637_v23 = vadd.f32 %v621_v11, %v484_v5  ;;  %v638_v51 = vadd.f32 %v622_v48, %v485_v63  ;;  %v3238_v5 = vld [vmem:[#allocation60_spill] sm:$0xff]  ;;  %v3240_v11 = vld [vmem:[#allocation62_spill] sm:$0xff] }
 0x181   : > { %v2508_v33 = vpop.permute.xlu1 %872  ;;  %1244 = vrot.lane.b32.xlu1 %v1735_v8, %s1665_s18  ;;  %1262 = vrot.lane.b32.xlu0 %v3220_v13, %s1665_s18  ;;  %v2514_v45 = vpop.permute.xlu0 %876  ;;  %v3234_v8 = vld [vmem:[#allocation54_spill] sm:$0xff]  ;;  %v2532_v35 = vsel %vm534_vm6, 0.0, %v3235_v2  ;;  %v671_v39 = vsel %vm534_vm6, %v3231_v1, %v3236_v61  ;;  %v672_v34 = vsel %vm534_vm6, %v3232_v60, %v3237_v20  ;;  %v702_v43 = vsel %vm534_vm6, 0.0, %v2280_v41  ;;  %v3241_v60 = vld [vmem:[#allocation8_spill] sm:$0xff] }
 0x182   : > { %v698_v13 = vsel %vm534_vm6, 0.0, %v3234_v8  ;;  %v674_v63 = vsel %vm534_vm6, %v3234_v8, %v3238_v5  ;;  %v676_v62 = vsel %vm534_vm6, %v2262_v42, %v2285_v44  ;;  %v735_v17 = vmul.f32 %v2288_v58, %v695_v19  ;;  %v3247_v5 = vld [vmem:[#allocation9_spill] sm:$0xff] }
 0x183   : > { %v736_v0 = vmul.f32 %v2288_v58, %v671_v39  ;;  %v678_v59 = vsel %vm534_vm6, %v2280_v41, %v2300_v55  ;;  %v741_v32 = vmul.f32 %v2304_v16, %v698_v13  ;;  %v738_v6 = vmul.f32 %v2308_v21, %v672_v34  ;;  %v3239_v55 = vld [vmem:[#allocation61_spill] sm:$0xff]  ;;  %v3242_v39 = vld [vmem:[#allocation67_spill] sm:$0xff] }
 0x184   : > { %v745_v44 = vmul.f32 %v2312_v47, %v700_v9  ;;  %v746_v42 = vmul.f32 %v2312_v47, %v676_v62  ;;  %v749_v58 = vmul.f32 %v2320_v36, %v702_v43  ;;  %v750_v49 = vmul.f32 %v2320_v36, %v678_v59  ;;  %v3244_v34 = vld [vmem:[#allocation75_spill] sm:$0xff]  ;;  %v3245_v43 = vld [vmem:[#allocation76_spill] sm:$0xff] }
 0x185   : > { %1248 = vrot.lane.b32.xlu1 %v1743_v10, %s1665_s18  ;;  %1301 = vperm.xlu0 %1623, %v1799_v26   ;;  %v742_v10 = vmul.f32 %v2304_v16, %v674_v63  ;;  %v737_v26 = vmul.f32 %v2308_v21, %v696_v46  ;;  %v2570_v41 = vsel %vm534_vm6, 0.0, %v3239_v55  ;;  %v2575_v16 = vsel %vm534_vm6, %v3235_v2, %v3240_v11  ;;  %v3248_v59 = vld [vmem:[#allocation16_spill] sm:$0xff] }
 0x186   : > { %v913_v52 = vpop.permute.xlu1 %912  ;;  %v2558_v28 = vpop.permute.xlu0 %916  ;;  %v818_v21 = vsel %vm534_vm6, %v2352_v25, %v2347_v56  ;;  %v842_v47 = vsel %vm534_vm6, 0.0, %v2352_v25  ;;  %v751_v36 = vadd.f32 %v735_v17, %v2439_v24  ;;  %v752_v48 = vadd.f32 %v736_v0, %v2475_v50 }
 0x187   : > { %v885_v1 = vmul.f32 %v2453_v38, %v842_v47  ;;  %v886_v19 = vmul.f32 %v2453_v38, %v818_v21  ;;  %v757_v8 = vadd.f32 %v741_v32, %v629_v31  ;;  %v758_v25 = vadd.f32 %v742_v10, %v630_v40  ;;  %v3243_v38 = vld [vmem:[#allocation68_spill] sm:$0xff]  ;;  %v3246_v40 = vld [vmem:[#allocation82_spill] sm:$0xff]  ;;  %v3249_v10 = vld [vmem:[#allocation17_spill] sm:$0xff] }
 0x188   : > { %v2594_v13 = vadd.f32 %v737_v26, %v2473_v22  ;;  %v761_v24 = vadd.f32 %v745_v44, %v633_v4  ;;  %v762_v50 = vadd.f32 %v746_v42, %v634_v3  ;;  %v765_v2 = vadd.f32 %v749_v58, %v637_v23  ;;  %v3251_v44 = vld [vmem:[#allocation70_spill] sm:$0xff]  ;;  %v3253_v21 = vld [vmem:[#allocation12_spill] sm:$0xff] }
 0x189   : > { %1252 = vrot.lane.b32.xlu1 %v1751_v12, %s1665_s18  ;;  %1313 = vperm.xlu0 %1623, %v3241_v60   ;;  %v2596_v12 = vadd.f32 %v738_v6, %v626_v30  ;;  %v766_v61 = vadd.f32 %v750_v49, %v638_v51  ;;  %v815_v9 = vsel %vm534_vm6, %v3243_v38, %v3242_v39  ;;  %v839_v20 = vsel %vm534_vm6, 0.0, %v3243_v38  ;;  %v2609_v30 = vld [vmem:[%s1705_s17 + $0x60] sm:$0xff]  ;;  %v3250_v6 = vld [vmem:[#allocation69_spill] sm:$0xff]  ;;  %v2635_v39 = vld [vmem:[%s1705_s17 + $0x70] sm:$0xff] }
 0x18a   : > { %v2589_v46 = vpop.permute.xlu1 %920  ;;  %v2591_v56 = vpop.permute.xlu0 %928  ;;  %v820_v31 = vsel %vm534_vm6, %v3245_v43, %v3244_v34  ;;  %v844_v22 = vsel %vm534_vm6, 0.0, %v3245_v43  ;;  %v879_v4 = vmul.f32 %v3246_v40, %v839_v20  ;;  %v880_v3 = vmul.f32 %v3246_v40, %v815_v9  ;;  %v3252_v49 = vld [vmem:[#allocation10_spill] sm:$0xff]  ;;  %v3256_v40 = vld [vmem:[#allocation20_spill] sm:$0xff] }
 0x18b   : > { %v901_v23 = vadd.f32 %v885_v1, %v757_v8  ;;  %v902_v51 = vadd.f32 %v886_v19, %v758_v25  ;;  %v889_v17 = vmul.f32 %v2488_v54, %v844_v22  ;;  %v890_v0 = vmul.f32 %v2488_v54, %v820_v31  ;;  %v3254_v1 = vld [vmem:[#allocation79_spill] sm:$0xff]  ;;  %v3255_v19 = vld [vmem:[#allocation80_spill] sm:$0xff] }
 0x18c   : > { %v816_v42 = vsel %vm534_vm6, %v3251_v44, %v3250_v6  ;;  %v840_v58 = vsel %vm534_vm6, 0.0, %v3251_v44  ;;  %v943_v11 = vmul.f32 %v913_v52, %v3252_v49  ;;  %v944_v47 = vmul.f32 %v913_v52, %v3253_v21  ;;  %v3260_v21 = vld [vmem:[#allocation11_spill] sm:$0xff] }
 0x18d   : > { %1256 = vrot.lane.b32.xlu1 %v2609_v30, %s1665_s18  ;;  %1321 = vperm.xlu0 %1623, %v3247_v5   ;;  %v822_v60 = vsel %vm534_vm6, %v3255_v19, %v3254_v1  ;;  %v846_v54 = vsel %vm534_vm6, 0.0, %v3255_v19  ;;  %v895_v38 = vadd.f32 %v879_v4, %v751_v36  ;;  %v896_v9 = vadd.f32 %v880_v3, %v752_v48  ;;  %v1628_v4 = vld [vmem:[%s1705_s17] sm:$0xff]  ;;  %v3261_v1 = vld [vmem:[#allocation13_spill] sm:$0xff] }
 0x18e   : > { %v925_v63 = vpop.permute.xlu1 %924  ;;  %v2616_v62 = vpop.permute.xlu0 %936  ;;  %v893_v52 = vmul.f32 %v2514_v45, %v846_v54  ;;  %v894_v20 = vmul.f32 %v2514_v45, %v822_v60  ;;  %v1668_v34 = vmov 8   ;;  %v905_v31 = vadd.f32 %v889_v17, %v761_v24  ;;  %v3259_v45 = vld [vmem:[#allocation81_spill] sm:$0xff] }
 0x18f   : > { %v949_v32 = vmul.f32 %v925_v63, %v3248_v59  ;;  %v950_v26 = vmul.f32 %v925_v63, %v3249_v10  ;;  %v906_v22 = vadd.f32 %v890_v0, %v762_v50  ;;  %v3258_v63 = vld [vmem:[#allocation7_spill] sm:$0xff]  ;;  %v959_v36 = vadd.f32 %v943_v11, %v895_v38  ;;  %v3263_v60 = vld [vmem:[#allocation25_spill] sm:$0xff] }
 0x190   : > { %v960_v48 = vadd.f32 %v944_v47, %v896_v9  ;;  %v882_v6 = vmul.f32 %v3259_v45, %v816_v42  ;;  %v909_v50 = vadd.f32 %v893_v52, %v765_v2  ;;  %v910_v17 = vadd.f32 %v894_v20, %v766_v61  ;;  %v3262_v42 = vld [vmem:[#allocation24_spill] sm:$0xff]  ;;  %v1630_v2 = vld [vmem:[%s3046_s2 + $0x18] sm:$0xff] }
 0x191   : > { %v965_v8 = vadd.f32 %v949_v32, %v901_v23  ;;  %v966_v25 = vadd.f32 %v950_v26, %v902_v51  ;;  %1260 = vrot.lane.b32.xlu1 %v2635_v39, %s1665_s18  ;;  %1624 = vset.pattern.permute.xlu0 %v1668_v34  ;;  %v3257_v51 = vld [vmem:[#allocation21_spill] sm:$0xff]  ;;  %v1629_v32 = vld [vmem:[%s1705_s17 + $0x8] sm:$0xff]  ;;  %v881_v26 = vmul.f32 %v3259_v45, %v840_v58  ;;  %v1631_v20 = vld [vmem:[%s1705_s17 + $0x30] sm:$0xff] }
 0x192   : > { %v933_v43 = vpop.permute.xlu1 %932  ;;  %1425 = vperm.xlu0 %1624, %v3258_v63   ;;  %v945_v47 = vmul.f32 %v2558_v28, %v3260_v21  ;;  %v946_v58 = vmul.f32 %v2558_v28, %v3261_v1  ;;  %v3264_v38 = vld [vmem:[#allocation65_spill] sm:$0xff]  ;;  %v1635_v45 = vld [vmem:[%s1705_s17 + $0x10] sm:$0xff] }
 0x193   : > { %v953_v23 = vmul.f32 %v933_v43, %v3256_v40  ;;  %v954_v5 = vmul.f32 %v933_v43, %v3257_v51  ;;  %v977_v59 = vpop.permute.xlu0 %976  ;;  %v743_v9 = vmul.f32 %v3264_v38, %v2532_v35  ;;  %v744_v52 = vmul.f32 %v3264_v38, %v2575_v16  ;;  %v3265_v35 = vld [vmem:[#allocation59_spill] sm:$0xff]  ;;  %v3269_v38 = vld [vmem:[#allocation66_spill] sm:$0xff] }
 0x194   : > { %v1007_v3 = vmul.f32 %v1628_v4, %v977_v59  ;;  %v1008_v10 = vmul.f32 %v1629_v32, %v977_v59  ;;  %v898_v40 = vadd.f32 %v882_v6, %v2596_v12  ;;  %v673_v16 = vsel %vm534_vm6, %v3233_v7, %v3265_v35  ;;  %v1634_v7 = vld [vmem:[%s3046_s2 + $0x28] sm:$0xff]  ;;  %v3274_v35 = vld [vmem:[#allocation77_spill] sm:$0xff] }
 0x195   : > { %v969_v44 = vadd.f32 %v953_v23, %v905_v31  ;;  %v970_v24 = vadd.f32 %v954_v5, %v906_v22  ;;  %1297 = vperm.xlu1 %1622, %v3258_v63   ;;  %v1632_v31 = vld [vmem:[%s1705_s17 + $0x38] sm:$0xff]  ;;  %v897_v22 = vadd.f32 %v881_v26, %v2594_v13  ;;  %v2674_v5 = vld [vmem:[%s3046_s2 + $0x10] sm:$0xff]  ;;  %v3266_v63 = vld [vmem:[#allocation63_spill] sm:$0xff]  ;;  %v759_v1 = vadd.f32 %v743_v9, %v2502_v57 }
 0x196   : > { %v2650_v0 = vadd.f32 %v1007_v3, %v959_v36  ;;  %v2652_v49 = vadd.f32 %v1008_v10, %v960_v48  ;;  %v941_v11 = vpop.permute.xlu1 %940  ;;  %1437 = vperm.xlu0 %1624, %v1630_v2   ;;  %v677_v13 = vsel %vm534_vm6, %v3239_v55, %v3266_v63  ;;  %v3267_v36 = vld [vmem:[#allocation73_spill] sm:$0xff]  ;;  %v3268_v48 = vld [vmem:[#allocation74_spill] sm:$0xff]  ;;  %v962_v10 = vadd.f32 %v946_v58, %v898_v40  ;;  %v3271_v9 = vld [vmem:[#allocation19_spill] sm:$0xff] }
 0x197   : > { %v957_v19 = vmul.f32 %v941_v11, %v3262_v42  ;;  %v958_v54 = vmul.f32 %v941_v11, %v3263_v60  ;;  %v989_v61 = vpop.permute.xlu0 %988  ;;  %v819_v4 = vsel %vm534_vm6, %v3268_v48, %v3267_v36  ;;  %v843_v3 = vsel %vm534_vm6, 0.0, %v3268_v48  ;;  %v1638_v11 = vld [vmem:[%s1705_s17 + $0x58] sm:$0xff]  ;;  %v3270_v57 = vld [vmem:[#allocation18_spill] sm:$0xff] }
 0x198   : > { %v1013_v43 = vmul.f32 %v1631_v20, %v989_v61  ;;  %v1014_v28 = vmul.f32 %v1632_v31, %v989_v61  ;;  %v961_v32 = vadd.f32 %v945_v47, %v897_v22  ;;  %v760_v47 = vadd.f32 %v744_v52, %v2506_v15  ;;  %v1639_v22 = vld [vmem:[%s1705_s17 + $0x78] sm:$0xff]  ;;  %v3275_v63 = vld [vmem:[#allocation78_spill] sm:$0xff] }
 0x199   : > { %v973_v23 = vadd.f32 %v957_v19, %v909_v50  ;;  %v974_v51 = vadd.f32 %v958_v54, %v910_v17  ;;  %1305 = vperm.xlu1 %1622, %v2674_v5   ;;  %v1637_v50 = vld [vmem:[%s1705_s17 + $0x50] sm:$0xff]  ;;  %v887_v58 = vmul.f32 %v2482_v29, %v843_v3  ;;  %v888_v42 = vmul.f32 %v2482_v29, %v819_v4  ;;  %v3272_v29 = vld [vmem:[#allocation26_spill] sm:$0xff] }
 0x19a   : > { %v2683_v12 = vadd.f32 %v1013_v43, %v965_v8  ;;  %v2685_v59 = vadd.f32 %v1014_v28, %v966_v25  ;;  %1445 = vperm.xlu0 %1624, %v1634_v7   ;;  %v1636_v25 = vld [vmem:[%s1705_s17 + $0x18] sm:$0xff]  ;;  %v747_v20 = vmul.f32 %v3269_v38, %v2570_v41  ;;  %v748_v43 = vmul.f32 %v3269_v38, %v677_v13 }
 0x19b   : > { %v981_v55 = vpop.permute.xlu1 %980  ;;  %v997_v8 = vpop.permute.xlu0 %996  ;;  %v951_v15 = vmul.f32 %v2591_v56, %v3270_v57  ;;  %v952_v52 = vmul.f32 %v2591_v56, %v3271_v9  ;;  %v821_v13 = vsel %vm534_vm6, %v3275_v63, %v3274_v35  ;;  %v845_v56 = vsel %vm534_vm6, 0.0, %v3275_v63  ;;  %v3283_v57 = vld [vmem:[#allocation2_spill] sm:$0xff] }
 0x19c   : > { %v1009_v26 = vmul.f32 %v1635_v45, %v981_v55  ;;  %v1010_v6 = vmul.f32 %v1636_v25, %v981_v55  ;;  %v1017_v17 = vmul.f32 %v1637_v50, %v997_v8  ;;  %v1018_v21 = vmul.f32 %v1638_v11, %v997_v8  ;;  %v3276_v8 = vld [vmem:[#allocation27_spill] sm:$0xff]  ;;  %v3280_v11 = vld [vmem:[#allocation72_spill] sm:$0xff] }
 0x19d   : > { %1309 = vperm.xlu1 %1622, %v1630_v2   ;;  %v903_v36 = vadd.f32 %v887_v58, %v759_v1  ;;  %v904_v48 = vadd.f32 %v888_v42, %v760_v47  ;;  %v763_v3 = vadd.f32 %v747_v20, %v2516_v27  ;;  %v3278_v25 = vld [vmem:[#allocation23_spill] sm:$0xff]  ;;  %v3281_v1 = vld [vmem:[#allocation30_spill] sm:$0xff]  ;;  %v3282_v58 = vld [vmem:[#allocation29_spill] sm:$0xff] }
 0x19e   : > { %v1025_v19 = vadd.f32 %v1009_v26, %v961_v32  ;;  %v1026_v60 = vadd.f32 %v1010_v6, %v962_v10  ;;  %v2703_v54 = vadd.f32 %v1017_v17, %v969_v44  ;;  %v2705_v61 = vadd.f32 %v1018_v21, %v970_v24  ;;  %1453 = vperm.xlu0 %1624, %v3272_v29   ;;  %v3273_v44 = vld [vmem:[#allocation64_spill] sm:$0xff]  ;;  %v3277_v26 = vld [vmem:[#allocation22_spill] sm:$0xff]  ;;  %v3279_v27 = vld [vmem:[#allocation71_spill] sm:$0xff] }
 0x19f   : > { %v2715_v2 = vpop.permute.xlu1 %984  ;;  %v1005_v31 = vpop.permute.xlu0 %1004  ;;  %v739_v24 = vmul.f32 %v3273_v44, %v2526_v37  ;;  %v740_v28 = vmul.f32 %v3273_v44, %v673_v16  ;;  %v891_v37 = vmul.f32 %v2508_v33, %v845_v56  ;;  %v892_v16 = vmul.f32 %v2508_v33, %v821_v13 }
 0x1a0   : > { %v1021_v41 = vmul.f32 %v2635_v39, %v1005_v31  ;;  %v1022_v40 = vmul.f32 %v1639_v22, %v1005_v31  ;;  %v764_v32 = vadd.f32 %v748_v43, %v2518_v14  ;;  %v967_v10 = vadd.f32 %v951_v15, %v903_v36 }
 0x1a1   : > { %1317 = vperm.xlu1 %1622, %v1634_v7   ;;  %v968_v55 = vadd.f32 %v952_v52, %v904_v48  ;;  %v955_v7 = vmul.f32 %v2616_v62, %v3277_v26  ;;  %v956_v33 = vmul.f32 %v2616_v62, %v3278_v25  ;;  %v817_v14 = vsel %vm534_vm6, %v3280_v11, %v3279_v27  ;;  %v3291_v27 = vld [vmem:[#allocation41_spill] sm:$0xff] }
 0x1a2   : > { %v2729_v4 = vadd.f32 %v1021_v41, %v973_v23  ;;  %v2731_v39 = vadd.f32 %v1022_v40, %v974_v51  ;;  %1362 = vrot.lane.b32.xlu0 %v3276_v8, %s1665_s18  ;;  %v1640_v23 = vld [vmem:[%s1705_s17 + $0x40] sm:$0xff]  ;;  %v1641_v51 = vld [vmem:[%s1705_s17 + $0x48] sm:$0xff]  ;;  %v841_v21 = vsel %vm534_vm6, 0.0, %v3280_v11  ;;  %v907_v62 = vadd.f32 %v891_v37, %v763_v3 }
 0x1a3   : > { %v993_v45 = vpop.permute.xlu1 %992  ;;  %v908_v38 = vadd.f32 %v892_v16, %v764_v32  ;;  %v883_v15 = vmul.f32 %v3283_v57, %v841_v21  ;;  %v884_v9 = vmul.f32 %v3283_v57, %v817_v14  ;;  %v1642_v40 = vld [vmem:[%s1705_s17 + $0x68] sm:$0xff]  ;;  %v755_v13 = vadd.f32 %v739_v24, %v2490_v53  ;;  %v3286_v37 = vld [vmem:[#allocation14_spill] sm:$0xff]  ;;  %v3293_v57 = vld [vmem:[#allocation32_spill] sm:$0xff] }
 0x1a4   : > { %v1015_v6 = vmul.f32 %v1640_v23, %v993_v45  ;;  %v1016_v50 = vmul.f32 %v1641_v51, %v993_v45  ;;  %v1045_v17 = vpop.permute.xlu0 %1044  ;;  %v971_v41 = vadd.f32 %v955_v7, %v907_v62  ;;  %v756_v56 = vadd.f32 %v740_v28, %v2500_v18  ;;  %v3287_v3 = vld [vmem:[#allocation15_spill] sm:$0xff]  ;;  %v1644_v45 = vld [vmem:[%s1705_s17 + $0x20] sm:$0xff]  ;;  %v3289_v23 = vld [vmem:[#allocation28_spill] sm:$0xff] }
 0x1a5   : > { %v1073_v47 = vmul.f32 %v1045_v17, %v3281_v1  ;;  %v1074_v42 = vmul.f32 %v1045_v17, %v3282_v58  ;;  %1325 = vperm.xlu1 %1622, %v3272_v29   ;;  %v972_v22 = vadd.f32 %v956_v33, %v908_v38  ;;  %v947_v16 = vmul.f32 %v2589_v46, %v3286_v37  ;;  %v1643_v53 = vld [vmem:[%s3046_s2 + $0x8] sm:$0xff] }
 0x1a6   : > { %v1031_v20 = vadd.f32 %v1015_v6, %v967_v10  ;;  %v1032_v43 = vadd.f32 %v1016_v50, %v968_v55  ;;  %1366 = vrot.lane.b32.xlu0 %v3282_v58, %s1665_s18  ;;  %v3288_v28 = vld [vmem:[#allocation31_spill] sm:$0xff]  ;;  %v900_v55 = vadd.f32 %v884_v9, %v756_v56  ;;  %v1011_v26 = vmul.f32 %v1644_v45, %v2715_v2  ;;  %v3290_v50 = vld [vmem:[#allocation40_spill] sm:$0xff]  ;;  %v3295_v56 = vld [vmem:[#allocation37_spill] sm:$0xff] }
 0x1a7   : > { %v2753_v52 = vadd.f32 %v1073_v47, %v1025_v19  ;;  %v2755_v31 = vadd.f32 %v1074_v42, %v1026_v60  ;;  %v1001_v44 = vpop.permute.xlu1 %1000  ;;  %v3284_v19 = vld [vmem:[#allocation36_spill] sm:$0xff]  ;;  %v3285_v60 = vld [vmem:[#allocation35_spill] sm:$0xff] }
 0x1a8   : > { %v1019_v29 = vmul.f32 %v2609_v30, %v1001_v44  ;;  %v1020_v35 = vmul.f32 %v1642_v40, %v1001_v44  ;;  %v1057_v63 = vpop.permute.xlu0 %1056  ;;  %v948_v30 = vmul.f32 %v2589_v46, %v3287_v3  ;;  %v1645_v46 = vld [vmem:[%s1705_s17 + $0x28] sm:$0xff] }
 0x1a9   : > { %v1079_v36 = vmul.f32 %v1057_v63, %v3284_v19  ;;  %v1080_v48 = vmul.f32 %v1057_v63, %v3285_v60  ;;  %1625 = vset.pattern.permute.xlu1 %v1668_v34  ;;  %v899_v34 = vadd.f32 %v883_v15, %v755_v13  ;;  %v1012_v7 = vmul.f32 %v1645_v46, %v2715_v2 }
 0x1aa   : > { %v1035_v32 = vadd.f32 %v1019_v29, %v971_v41  ;;  %v1036_v10 = vadd.f32 %v1020_v35, %v972_v22  ;;  %1429 = vperm.xlu1 %1625, %v1643_v53   ;;  %1370 = vrot.lane.b32.xlu0 %v3288_v28, %s1665_s18  ;;  %v964_v21 = vadd.f32 %v948_v30, %v900_v55  ;;  %v3294_v22 = vld [vmem:[#allocation34_spill] sm:$0xff]  ;;  %v1647_v35 = vld [vmem:[%s3046_s2 + $0x30] sm:$0xff] }
 0x1ab   : > { %v2773_v18 = vadd.f32 %v1079_v36, %v1031_v20  ;;  %v2775_v24 = vadd.f32 %v1080_v48, %v1032_v43  ;;  %v963_v14 = vadd.f32 %v947_v16, %v899_v34  ;;  %v3296_v48 = vld [vmem:[#allocation38_spill] sm:$0xff]  ;;  %v3298_v53 = vld [vmem:[#allocation44_spill] sm:$0xff] }
 0x1ac   : > { %v1041_v25 = vpop.permute.xlu1 %1040  ;;  %v1065_v33 = vpop.permute.xlu0 %1064  ;;  %v1028_v43 = vadd.f32 %v1012_v7, %v964_v21 }
 0x1ad   : > { %v1071_v6 = vmul.f32 %v1041_v25, %v3289_v23  ;;  %v1072_v51 = vmul.f32 %v1041_v25, %v3276_v8  ;;  %v1083_v17 = vmul.f32 %v1065_v33, %v3290_v50  ;;  %v1084_v11 = vmul.f32 %v1065_v33, %v3291_v27  ;;  %v3292_v8 = vld [vmem:[#allocation33_spill] sm:$0xff] }
 0x1ae   : > { %1433 = vperm.xlu1 %1625, %v2674_v5   ;;  %1374 = vrot.lane.b32.xlu0 %v3292_v8, %s1665_s18  ;;  %v1027_v20 = vadd.f32 %v1011_v26, %v963_v14 }
 0x1af   : > { %v2789_v47 = vadd.f32 %v1071_v6, %v2650_v0  ;;  %v2792_v58 = vadd.f32 %v1072_v51, %v2652_v49  ;;  %v2794_v2 = vadd.f32 %v1083_v17, %v1035_v32  ;;  %v2796_v42 = vadd.f32 %v1084_v11, %v1036_v10  ;;  %v1646_v0 = vld [vmem:[%s3046_s2 + $0x20] sm:$0xff]  ;;  %v3297_v32 = vld [vmem:[#allocation43_spill] sm:$0xff] }
 0x1b0   : > { %v1049_v62 = vpop.permute.xlu1 %1048  ;;  %v1104_v38 = vpop.permute.xlu0 %1103 }
 0x1b1   : > { %v1075_v15 = vmul.f32 %v1049_v62, %v3293_v57  ;;  %v1076_v5 = vmul.f32 %v1049_v62, %v3288_v28 }
 0x1b2   : > { %1441 = vperm.xlu1 %1625, %v1646_v0   ;;  %1378 = vrot.lane.b32.xlu0 %v3285_v60, %s1665_s18 }
 0x1b3   : > { %v2805_v49 = vadd.f32 %v1075_v15, %v1027_v20  ;;  %v2807_v9 = vadd.f32 %v1076_v5, %v1028_v43 }
 0x1b4   : > { %v1053_v44 = vpop.permute.xlu1 %1052  ;;  %v1108_v41 = vpop.permute.xlu0 %1107 }
 0x1b5   : > { %v1077_v29 = vmul.f32 %v1053_v44, %v3294_v22  ;;  %v1078_v40 = vmul.f32 %v1053_v44, %v3292_v8 }
 0x1b6   : > { %1449 = vperm.xlu1 %1625, %v1647_v35   ;;  %1382 = vrot.lane.b32.xlu0 %v3295_v56, %s1665_s18 }
 0x1b7   : > { %v1093_v63 = vadd.f32 %v1077_v29, %v2683_v12  ;;  %v1094_v13 = vadd.f32 %v1078_v40, %v2685_v59 }
 0x1b8   : > { %v1061_v36 = vpop.permute.xlu1 %1060  ;;  %v1112_v60 = vpop.permute.xlu0 %1111 }
 0x1b9   : > { %v1081_v37 = vmul.f32 %v1061_v36, %v3296_v48  ;;  %v1082_v16 = vmul.f32 %v1061_v36, %v3295_v56 }
 0x1ba   : > { %1360 = vrot.lane.b32.xlu1 %v3289_v23, %s1665_s18  ;;  %1386 = vrot.lane.b32.xlu0 %v3291_v27, %s1665_s18 }
 0x1bb   : > { %v1097_v3 = vadd.f32 %v1081_v37, %v2703_v54  ;;  %v1098_v30 = vadd.f32 %v1082_v16, %v2705_v61 }
 0x1bc   : > { %v1069_v12 = vpop.permute.xlu1 %1068  ;;  %v1116_v59 = vpop.permute.xlu0 %1115 }
 0x1bd   : > { %v1085_v10 = vmul.f32 %v1069_v12, %v3297_v32  ;;  %v1086_v28 = vmul.f32 %v1069_v12, %v3298_v53 }
 0x1be   : > { %1364 = vrot.lane.b32.xlu1 %v3281_v1, %s1665_s18  ;;  %1390 = vrot.lane.b32.xlu0 %v3298_v53, %s1665_s18 }
 0x1bf   : > { %v1101_v34 = vadd.f32 %v1085_v10, %v2729_v4  ;;  %v1102_v55 = vadd.f32 %v1086_v28, %v2731_v39 }
 0x1c0   : > { %v1106_v54 = vpop.permute.xlu1 %1105  ;;  %v1120_v61 = vpop.permute.xlu0 %1119 }
 0x1c1   : > { %v1136_v45 = vsel %vm1135_vm7, %v1104_v38, %v1106_v54  ;;  %v1160_v6 = vsel %vm1135_vm7, %v1106_v54, 0.0 }
 0x1c2   : > { %1368 = vrot.lane.b32.xlu1 %v3293_v57, %s1665_s18 }
 0x1c4   : > { %v1110_v26 = vpop.permute.xlu1 %1109  ;;  %v1124_v46 = vpop.permute.xlu0 %1123 }
 0x1c5   : > { %v1137_v7 = vsel %vm1135_vm7, %v1108_v41, %v1110_v26 }
 0x1c6   : > { %1372 = vrot.lane.b32.xlu1 %v3294_v22, %s1665_s18 }
 0x1c8   : > { %v1114_v4 = vpop.permute.xlu1 %1113  ;;  %v1128_v1 = vpop.permute.xlu0 %1127 }
 0x1c9   : > { %v1138_v39 = vsel %vm1135_vm7, %v1112_v60, %v1114_v4  ;;  %v1161_v60 = vsel %vm1135_vm7, %v1110_v26, 0.0  ;;  %v1162_v10 = vsel %vm1135_vm7, %v1114_v4, 0.0 }
 0x1ca   : > { %1376 = vrot.lane.b32.xlu1 %v3284_v19, %s1665_s18 }
 0x1cc   : > { %v1118_v25 = vpop.permute.xlu1 %1117  ;;  %v1132_v33 = vpop.permute.xlu0 %1131 }
 0x1cd   : > { %v1139_v23 = vsel %vm1135_vm7, %v1116_v59, %v1118_v25  ;;  %v1163_v8 = vsel %vm1135_vm7, %v1118_v25, 0.0 }
 0x1ce   : > { %1380 = vrot.lane.b32.xlu1 %v3296_v48, %s1665_s18 }
 0x1d0   : > { %v1122_v51 = vpop.permute.xlu1 %1121  ;;  %v1170_v17 = vpop.permute.xlu0 %1169 }
 0x1d1   : > { %v1140_v27 = vsel %vm1135_vm7, %v1120_v61, %v1122_v51  ;;  %v1200_v11 = vmul.f32 %v1170_v17, %v1136_v45  ;;  %v1201_v14 = vmul.f32 %v1170_v17, %v1160_v6  ;;  %v1164_v45 = vsel %vm1135_vm7, %v1122_v51, 0.0 }
 0x1d2   : > { %1384 = vrot.lane.b32.xlu1 %v3290_v50, %s1665_s18 }
 0x1d3   : > { %v2853_v19 = vadd.f32 %v1200_v11, %v2789_v47  ;;  %v2856_v21 = vadd.f32 %v1201_v14, %v2792_v58 }
 0x1d4   : > { %v1126_v62 = vpop.permute.xlu1 %1125  ;;  %v1182_v38 = vpop.permute.xlu0 %1181 }
 0x1d5   : > { %v1141_v20 = vsel %vm1135_vm7, %v1124_v46, %v1126_v62  ;;  %v1206_v43 = vmul.f32 %v1182_v38, %v1139_v23  ;;  %v1207_v57 = vmul.f32 %v1182_v38, %v1163_v8  ;;  %v1165_v47 = vsel %vm1135_vm7, %v1126_v62, 0.0 }
 0x1d6   : > { %1388 = vrot.lane.b32.xlu1 %v3297_v32, %s1665_s18 }
 0x1d7   : > { %v2862_v15 = vadd.f32 %v1206_v43, %v1093_v63  ;;  %v2864_v50 = vadd.f32 %v1207_v57, %v1094_v13 }
 0x1d8   : > { %v1130_v5 = vpop.permute.xlu1 %1129  ;;  %v1190_v58 = vpop.permute.xlu0 %1189 }
 0x1d9   : > { %v1142_v0 = vsel %vm1135_vm7, %v1128_v1, %v1130_v5  ;;  %v1210_v44 = vmul.f32 %v1190_v58, %v1141_v20  ;;  %v1211_v41 = vmul.f32 %v1190_v58, %v1165_v47  ;;  %v1166_v1 = vsel %vm1135_vm7, %v1130_v5, 0.0 }
 0x1db   : > { %v2868_v22 = vadd.f32 %v1210_v44, %v1097_v3  ;;  %v2870_v29 = vadd.f32 %v1211_v41, %v1098_v30 }
 0x1dc   : > { %v1134_v40 = vpop.permute.xlu1 %1133  ;;  %v1198_v35 = vpop.permute.xlu0 %1197 }
 0x1dd   : > { %v1143_v56 = vsel %vm1135_vm7, %v1132_v33, %v1134_v40  ;;  %v1167_v63 = vsel %vm1135_vm7, %v1134_v40, 0.0 }
 0x1de   : > { %v1214_v13 = vmul.f32 %v1198_v35, %v1143_v56  ;;  %v1215_v36 = vmul.f32 %v1198_v35, %v1167_v63 }
 0x1e0   : > { %v2875_v48 = vadd.f32 %v1214_v13, %v1101_v34  ;;  %v2877_v37 = vadd.f32 %v1215_v36, %v1102_v55  ;;  %v1174_v16 = vpop.permute.xlu1 %1173  ;;  %v2879_v12 = vpop.permute.xlu0 %1234 }
 0x1e1   : > { %v1202_v3 = vmul.f32 %v1174_v16, %v1137_v7  ;;  %v1203_v30 = vmul.f32 %v1174_v16, %v1161_v60 }
 0x1e3   : > { %v1218_v59 = vadd.f32 %v1202_v3, %v2753_v52  ;;  %v2883_v32 = vadd.f32 %v1203_v30, %v2755_v31 }
 0x1e4   : > { %v1178_v53 = vpop.permute.xlu1 %1177  ;;  %v2886_v28 = vpop.permute.xlu0 %1238 }
 0x1e5   : > { %v1204_v54 = vmul.f32 %v1178_v53, %v1138_v39  ;;  %v1205_v34 = vmul.f32 %v1178_v53, %v1162_v10 }
 0x1e7   : > { %v1220_v55 = vadd.f32 %v1204_v54, %v2805_v49  ;;  %v2890_v61 = vadd.f32 %v1205_v34, %v2807_v9 }
 0x1e8   : > { %v1186_v26 = vpop.permute.xlu1 %1185  ;;  %v2893_v46 = vpop.permute.xlu0 %1242 }
 0x1e9   : > { %v1208_v52 = vmul.f32 %v1186_v26, %v1140_v27  ;;  %v1209_v31 = vmul.f32 %v1186_v26, %v1164_v45 }
 0x1eb   : > { %v1224_v7 = vadd.f32 %v1208_v52, %v2773_v18  ;;  %v2897_v4 = vadd.f32 %v1209_v31, %v2775_v24 }
 0x1ec   : > { %v1194_v39 = vpop.permute.xlu1 %1193  ;;  %v2900_v25 = vpop.permute.xlu0 %1246 }
 0x1ed   : > { %v1212_v49 = vmul.f32 %v1194_v39, %v1142_v0  ;;  %v1213_v9 = vmul.f32 %v1194_v39, %v1166_v1 }
 0x1ef   : > { %v1228_v33 = vadd.f32 %v1212_v49, %v2794_v2  ;;  %v2904_v23 = vadd.f32 %v1213_v9, %v2796_v42 }
 0x1f0   : > { %v1233_v6 = vpop.permute.xlu1 %1232  ;;  %v2906_v51 = vpop.permute.xlu0 %1250 }
 0x1f1   : > { %v1264_v18 = vsel %vm1135_vm7, %v1233_v6, %v2879_v12 }
 0x1f4   : > { %v1237_v24 = vpop.permute.xlu1 %1236  ;;  %v2910_v17 = vpop.permute.xlu0 %1254 }
 0x1f5   : > { %v1265_v27 = vsel %vm1135_vm7, %v1237_v24, %v2886_v28 }
 0x1f8   : > { %v1241_v11 = vpop.permute.xlu1 %1240  ;;  %v2914_v14 = vpop.permute.xlu0 %1258 }
 0x1f9   : > { %v1266_v2 = vsel %vm1135_vm7, %v1241_v11, %v2893_v46 }
 0x1fc   : > { %v1245_v42 = vpop.permute.xlu1 %1244  ;;  %v2918_v8 = vpop.permute.xlu0 %1262 }
 0x1fd   : > { %v1267_v62 = vsel %vm1135_vm7, %v1245_v42, %v2900_v25 }
 0x200   : > { %v1249_v38 = vpop.permute.xlu1 %1248  ;;  %v1302_v20 = vpop.permute.xlu0 %1301 }
 0x201   : > { %v1268_v43 = vsel %vm1135_vm7, %v1249_v38, %v2906_v51  ;;  %v1330_v57 = vmul.f32 %v1302_v20, %v1265_v27 }
 0x203   : > { %v2924_v47 = vadd.f32 %v1330_v57, %v1218_v59 }
 0x204   : > { %v1253_v5 = vpop.permute.xlu1 %1252  ;;  %v1314_v0 = vpop.permute.xlu0 %1313 }
 0x205   : > { %v1269_v58 = vsel %vm1135_vm7, %v1253_v5, %v2910_v17  ;;  %v1336_v44 = vmul.f32 %v1314_v0, %v1268_v43 }
 0x207   : > { %v2928_v41 = vadd.f32 %v1336_v44, %v1224_v7  ;;  %v1288_v7 = vsel %vm1135_vm7, %v2879_v12, 0.0  ;;  %v1289_v12 = vsel %vm1135_vm7, %v2886_v28, 0.0 }
 0x208   : > { %v1257_v40 = vpop.permute.xlu1 %1256  ;;  %v2932_v56 = vpop.permute.xlu0 %1321 }
 0x209   : > { %v1270_v35 = vsel %vm1135_vm7, %v1257_v40, %v2914_v14 }
 0x20a   : > { %v1340_v63 = vmul.f32 %v2932_v56, %v1270_v35 }
 0x20c   : > { %v2935_v13 = vadd.f32 %v1340_v63, %v1228_v33  ;;  %v1261_v36 = vpop.permute.xlu1 %1260 }
 0x20d   : > { %v1271_v60 = vsel %vm1135_vm7, %v1261_v36, %v2918_v8  ;;  %v2939_v16 = vpop.permute.xlu0 %1425 }
 0x210   : > { %v1298_v3 = vpop.permute.xlu1 %1297 }
 0x211   : > { %v1328_v30 = vmul.f32 %v1298_v3, %v1264_v18  ;;  %v2941_v59 = vpop.permute.xlu0 %1437  ;;  %v1329_v39 = vmul.f32 %v1298_v3, %v1288_v7 }
 0x213   : > { %v2944_v10 = vadd.f32 %v1328_v30, %v2853_v19  ;;  %v1345_v6 = vadd.f32 %v1329_v39, %v2856_v21 }
 0x214   : > { %v1306_v53 = vpop.permute.xlu1 %1305 }
 0x215   : > { %v1332_v54 = vmul.f32 %v1306_v53, %v1266_v2  ;;  %v2946_v34 = vpop.permute.xlu0 %1445  ;;  %v1290_v2 = vsel %vm1135_vm7, %v2893_v46, 0.0 }
 0x216   : > { %v1333_v38 = vmul.f32 %v1306_v53, %v1290_v2 }
 0x217   : > { %v2948_v45 = vadd.f32 %v1332_v54, %v1220_v55  ;;  %v1293_v54 = vsel %vm1135_vm7, %v2910_v17, 0.0 }
 0x218   : > { %v1310_v26 = vpop.permute.xlu1 %1309  ;;  %v1349_v40 = vadd.f32 %v1333_v38, %v2890_v61 }
 0x219   : > { %v1334_v52 = vmul.f32 %v1310_v26, %v1267_v62  ;;  %v2950_v31 = vpop.permute.xlu0 %1453 }
 0x21b   : > { %v2955_v1 = vadd.f32 %v1334_v52, %v2862_v15 }
 0x21c   : > { %v1318_v19 = vpop.permute.xlu1 %1317 }
 0x21d   : > { %v1338_v49 = vmul.f32 %v1318_v19, %v1269_v58  ;;  %v1363_v9 = vpop.permute.xlu0 %1362  ;;  %v1339_v52 = vmul.f32 %v1318_v19, %v1293_v54 }
 0x21e   : > { %v1416_v55 = vsel %vm1135_vm7, %v1363_v9, 0.0 }
 0x21f   : > { %v2958_v33 = vadd.f32 %v1338_v49, %v2868_v22  ;;  %v1457_v18 = vmul.f32 %v2939_v16, %v1416_v55  ;;  %v1331_v22 = vmul.f32 %v1302_v20, %v1289_v12  ;;  %v1291_v20 = vsel %vm1135_vm7, %v2900_v25, 0.0 }
 0x220   : > { %v1326_v24 = vpop.permute.xlu1 %1325  ;;  %v1335_v5 = vmul.f32 %v1310_v26, %v1291_v20  ;;  %v1355_v17 = vadd.f32 %v1339_v52, %v2870_v29 }
 0x221   : > { %v1342_v15 = vmul.f32 %v1326_v24, %v1271_v60  ;;  %v1473_v27 = vadd.f32 %v1457_v18, %v1345_v6  ;;  %v1367_v11 = vpop.permute.xlu0 %1366  ;;  %v1347_v62 = vadd.f32 %v1331_v22, %v2883_v32  ;;  %v1292_v32 = vsel %vm1135_vm7, %v2906_v51, 0.0 }
 0x222   : > { %v1417_v28 = vsel %vm1135_vm7, %v1367_v11, 0.0  ;;  %v1337_v36 = vmul.f32 %v1314_v0, %v1292_v32  ;;  %v1351_v25 = vadd.f32 %v1335_v5, %v2864_v50  ;;  %v1294_v50 = vsel %vm1135_vm7, %v2914_v14, 0.0 }
 0x223   : > { %v2973_v21 = vadd.f32 %v1342_v15, %v2875_v48  ;;  %1489 = vst [vmem:[%s2970_s5 + $0x8] sm:$0xff] %v1473_v27  ;;  %v1341_v6 = vmul.f32 %v2932_v56, %v1294_v50  ;;  %v1295_v14 = vsel %vm1135_vm7, %v2918_v8, 0.0 }
 0x224   : > { %v1353_v51 = vadd.f32 %v1337_v36, %v2897_v4  ;;  %v1343_v29 = vmul.f32 %v1326_v24, %v1295_v14 }
 0x225   : > { %v1430_v42 = vpop.permute.xlu1 %1429  ;;  %v1371_v57 = vpop.permute.xlu0 %1370  ;;  %v1357_v56 = vadd.f32 %v1341_v6, %v2904_v23 }
 0x226   : > { %v1459_v43 = vmul.f32 %v1430_v42, %v1417_v28  ;;  %v1418_v48 = vsel %vm1135_vm7, %v1371_v57, 0.0  ;;  %v1359_v20 = vadd.f32 %v1343_v29, %v2877_v37 }
 0x228   : > { %v1475_v58 = vadd.f32 %v1459_v43, %v1347_v62 }
 0x229   : > { %v1434_v44 = vpop.permute.xlu1 %1433  ;;  %v1375_v35 = vpop.permute.xlu0 %1374 }
 0x22a   : > { %1491 = vst [vmem:[%s2970_s5 + $0x18] sm:$0xff] %v1475_v58  ;;  %v1461_v46 = vmul.f32 %v1434_v44, %v1418_v48  ;;  %v1419_v63 = vsel %vm1135_vm7, %v1375_v35, 0.0 }
 0x22b   : > { %v1463_v3 = vmul.f32 %v2941_v59, %v1419_v63 }
 0x22c   : > { %v1477_v60 = vadd.f32 %v1461_v46, %v1349_v40 }
 0x22d   : > { %v1442_v30 = vpop.permute.xlu1 %1441  ;;  %v1479_v53 = vadd.f32 %v1463_v3, %v1351_v25  ;;  %v1379_v61 = vpop.permute.xlu0 %1378 }
 0x22e   : > { %1493 = vst [vmem:[%s2970_s5 + $0x28] sm:$0xff] %v1477_v60  ;;  %v1420_v26 = vsel %vm1135_vm7, %v1379_v61, 0.0 }
 0x22f   : > { %1495 = vst [vmem:[%s2970_s5 + $0x38] sm:$0xff] %v1479_v53  ;;  %v1465_v0 = vmul.f32 %v1442_v30, %v1420_v26 }
 0x231   : > { %v1450_v7 = vpop.permute.xlu1 %1449  ;;  %v1481_v39 = vadd.f32 %v1465_v0, %v1353_v51  ;;  %v1383_v49 = vpop.permute.xlu0 %1382 }
 0x232   : > { %v1421_v55 = vsel %vm1135_vm7, %v1383_v49, 0.0 }
 0x233   : > { %1497 = vst [vmem:[%s2970_s5 + $0x48] sm:$0xff] %v1481_v39  ;;  %v1467_v18 = vmul.f32 %v2946_v34, %v1421_v55 }
 0x235   : > { %v1361_v4 = vpop.permute.xlu1 %1360  ;;  %v1483_v19 = vadd.f32 %v1467_v18, %v1355_v17  ;;  %v1387_v15 = vpop.permute.xlu0 %1386 }
 0x236   : > { %v1392_v12 = vsel %vm1135_vm7, %v1361_v4, %v1363_v9  ;;  %v1422_v27 = vsel %vm1135_vm7, %v1387_v15, 0.0 }
 0x237   : > { %v1456_v22 = vmul.f32 %v2939_v16, %v1392_v12  ;;  %1499 = vst [vmem:[%s2970_s5 + $0x58] sm:$0xff] %v1483_v19  ;;  %v1469_v2 = vmul.f32 %v1450_v7, %v1422_v27 }
 0x239   : > { %v1472_v28 = vadd.f32 %v1456_v22, %v2944_v10  ;;  %v1365_v62 = vpop.permute.xlu1 %1364  ;;  %v1485_v9 = vadd.f32 %v1469_v2, %v1357_v56  ;;  %v1391_v43 = vpop.permute.xlu0 %1390 }
 0x23a   : > { %v1393_v38 = vsel %vm1135_vm7, %v1365_v62, %v1367_v11  ;;  %v1423_v16 = vsel %vm1135_vm7, %v1391_v43, 0.0 }
 0x23b   : > { %1488 = vst [vmem:[%s2970_s5] sm:$0xff] %v1472_v28  ;;  %v1458_v8 = vmul.f32 %v1430_v42, %v1393_v38  ;;  %1501 = vst [vmem:[%s2970_s5 + $0x68] sm:$0xff] %v1485_v9  ;;  %v1471_v23 = vmul.f32 %v2950_v31, %v1423_v16 }
 0x23d   : > { %v1474_v24 = vadd.f32 %v1458_v8, %v2924_v47  ;;  %v1369_v10 = vpop.permute.xlu1 %1368  ;;  %v1487_v5 = vadd.f32 %v1471_v23, %v1359_v20 }
 0x23e   : > { %v1394_v58 = vsel %vm1135_vm7, %v1369_v10, %v1371_v57 }
 0x23f   : > { %1490 = vst [vmem:[%s2970_s5 + $0x10] sm:$0xff] %v1474_v24  ;;  %v1460_v11 = vmul.f32 %v1434_v44, %v1394_v58  ;;  %1503 = vst [vmem:[%s2970_s5 + $0x78] sm:$0xff] %v1487_v5 }
 0x241   : > { %v1476_v42 = vadd.f32 %v1460_v11, %v2948_v45  ;;  %v1373_v48 = vpop.permute.xlu1 %1372 }
 0x242   : > { %v1395_v40 = vsel %vm1135_vm7, %v1373_v48, %v1375_v35 }
 0x243   : > { %1492 = vst [vmem:[%s2970_s5 + $0x20] sm:$0xff] %v1476_v42  ;;  %v1462_v37 = vmul.f32 %v2941_v59, %v1395_v40 }
 0x245   : > { %v1478_v46 = vadd.f32 %v1462_v37, %v2955_v1  ;;  %v1377_v47 = vpop.permute.xlu1 %1376 }
 0x246   : > { %v1396_v32 = vsel %vm1135_vm7, %v1377_v47, %v1379_v61 }
 0x247   : > { %1494 = vst [vmem:[%s2970_s5 + $0x30] sm:$0xff] %v1478_v46  ;;  %v1464_v57 = vmul.f32 %v1442_v30, %v1396_v32 }
 0x249   : > { %v1480_v44 = vadd.f32 %v1464_v57, %v2928_v41  ;;  %v1381_v63 = vpop.permute.xlu1 %1380 }
 0x24a   : > { %v1397_v45 = vsel %vm1135_vm7, %v1381_v63, %v1383_v49 }
 0x24b   : > { %1496 = vst [vmem:[%s2970_s5 + $0x40] sm:$0xff] %v1480_v44  ;;  %v1466_v35 = vmul.f32 %v2946_v34, %v1397_v45 }
 0x24d   : > { %v1482_v36 = vadd.f32 %v1466_v35, %v2958_v33  ;;  %v1385_v59 = vpop.permute.xlu1 %1384 }
 0x24e   : > { %v1398_v1 = vsel %vm1135_vm7, %v1385_v59, %v1387_v15 }
 0x24f   : > { %1498 = vst [vmem:[%s2970_s5 + $0x50] sm:$0xff] %v1482_v36  ;;  %v1468_v25 = vmul.f32 %v1450_v7, %v1398_v1 }
 0x251   : > { %v1484_v60 = vadd.f32 %v1468_v25, %v2935_v13  ;;  %v1389_v3 = vpop.permute.xlu1 %1388 }
 0x252   : > { %v1399_v30 = vsel %vm1135_vm7, %v1389_v3, %v1391_v43 }
 0x253   : > { %1500 = vst [vmem:[%s2970_s5 + $0x60] sm:$0xff] %v1484_v60  ;;  %v1470_v41 = vmul.f32 %v2950_v31, %v1399_v30 }
 0x255   : > { %v1486_v53 = vadd.f32 %v1470_v41, %v2973_v21 }
 0x257   : > { %1502 = vst [vmem:[%s2970_s5 + $0x70] sm:$0xff] %v1486_v53 }
 0x258 PF: > { %s13_s12 = sadd.s32 1, %s1654_s12  }
 0x259   : > { %p10_p4 = scmp.ge.s32.totalorder %s13_s12, 4  }
 0x25b   :  { %12 = sbr.rel (!%p10_p4) target bundleno = 1 (0x1), region = 65 }

// kernel: dea_carafe_forward.3
= control target key start
LH: loop header
LB: loop body
LE: loop exit
PB: predicated region body
PF: predicated region fallthrough
CT: control target
= control target key end

     0   :  { %s2225_s9 = smov 0   ;;  %s3995_s0 = inlined_call_operand.vmem [shape: f32[2,4,25,256], index: 0, kind: input, shape index: {}]   ;;  %s3996_s1 = inlined_call_operand.vmem [shape: f32[2,4,256], index: 1, kind: input, shape index: {}]   ;;  %s3997_s2 = inlined_call_operand.vmem [shape: f32[2,16,256], index: 2, kind: output, shape index: {}]  }
   0x1 LB: > { %s2056_s10 = sadd.s32 4294967295, %s2200_s9   ;;  %p2060_p0 = scmp.ge.s32.totalorder %s2200_s9, 1  ;;  %s2200_s9 = sphi %s2225_s9, %s12_s9  }
   0x2   : > { %p122_p1 = scmp.lt.s32.totalorder %s2200_s9, 3 }
   0x4   : > { %p123_p2 = pnand %p2060_p0, %p122_p1 }
   0x6   : > { %126 = sbr.rel (%p123_p2) target bundleno = 390 (0x186), region = 28 }
   0xb   : > { %p149_p3 = scmp.lt.s32.totalorder %s2056_s10, 1  ;;  %s2202_s15 = smov 1   ;;  %vm179_vm0 = vcmask 1040384   ;;  %vm507_vm1 = vcmask 7168   ;;  %vm484_vm3 = vcmask 15360   ;;  %vm530_vm7 = vcmask 1039360  }
   0xc   : > { %s2203_s16 = smov 2   ;;  %s2204_s17 = smov 127   ;;  %vm553_vm10 = vcmask 1031168   ;;  %vm578_vm13 = vcmask 261120   ;;  %vm857_vm14 = vcmask 130048   ;;  %vm1402_vm15 = vcmask 916480  }
   0xd   : > { %s4423_s10 = smov (!%p149_p3, %s2056_s10), 1  ;;  %s2205_s18 = smov 126  }
   0xe   : > { %s2094_s11 = sshll.u32 %s4423_s10, 3  ;;  %s2206_s19 = smov 32  }
   0xf   : > { %s2239_s14 = scalar_lea.vmem %s3996_s1, %s2094_s11  ;;  %s2207_s20 = smov 16  }
  0x10   : > { %v2242_v0 = vld [vmem:[%s2239_s14] sm:$0xff]  ;;  %s2093_s21 = sshll.u32 %s4423_s10, 8  ;;  %s2208_s25 = smov 112  }
  0x11   : > { %503 = vrot.lane.b32.xlu1 %v2242_v0, %s2202_s15  ;;  %480 = vrot.lane.b32.xlu0 %v2242_v0, %s2203_s16  ;;  %v2248_v1 = vcombine.high %v2242_v0, %v2242_v0  ;;  %s2268_s24 = scalar_lea.vmem %s3995_s0, %s2093_s21  ;;  %s2209_s26 = smov 96  }
  0x12   : > { %v2271_v2 = vld [vmem:[%s2268_s24 + $0x30] sm:$0x1]  ;;  %v2274_v3 = vld [vmem:[%s2268_s24] sm:$0xff]  ;;  %v2314_v17 = vld [vmem:[%s2268_s24 + $0x38] sm:$0x1]  ;;  %s2095_s27 = sshll.u32 %s4423_s10, 5 }
  0x13   : > { %4066 = vst [vmem:[#allocation2_spill] sm:$0xff] %v2271_v2  ;;  %v2277_v4 = vld [vmem:[%s2268_s24 + $0x10] sm:$0xff]  ;;  %v2280_v5 = vld [vmem:[%s2268_s24 + $0x20] sm:$0xff]  ;;  %v180_v10 = vsel %vm179_vm0, %v2271_v2, -inf  ;;  %4073 = vst [vmem:[#allocation9_spill] sm:$0xff] %v2314_v17  ;;  %v190_v32 = vsel %vm179_vm0, %v2314_v17, -inf  ;;  %s163_s30 = scalar_lea.vmem %s3997_s2, %s2095_s27 }
  0x14   : > { %4067 = vst [vmem:[#allocation3_spill] sm:$0xff] %v2280_v5  ;;  %v2283_v6 = vld [vmem:[%s2268_s24 + $0x70] sm:$0x1]  ;;  %v2286_v7 = vld [vmem:[%s2268_s24 + $0x40] sm:$0xff]  ;;  %v2325_v21 = vld [vmem:[%s2268_s24 + $0x78] sm:$0x1]  ;;  %v178_v22 = vmax.f32 %v2274_v3, %v2280_v5  ;;  %v181_v23 = vmax.f32 %v2277_v4, %v180_v10 }
  0x15   : > { %505 = vrot.lane.b32.xlu1 %v2248_v1, %s2202_s15  ;;  %482 = vrot.lane.b32.xlu0 %v2248_v1, %s2203_s16  ;;  %4068 = vst [vmem:[#allocation4_spill] sm:$0xff] %v2283_v6  ;;  %v2289_v8 = vld [vmem:[%s2268_s24 + $0x50] sm:$0xff]  ;;  %v2297_v11 = vld [vmem:[%s2268_s24 + $0x60] sm:$0xff]  ;;  %v257_v14 = vsel %vm179_vm0, %v2283_v6, -inf  ;;  %4074 = vst [vmem:[#allocation10_spill] sm:$0xff] %v2325_v21  ;;  %v267_v39 = vsel %vm179_vm0, %v2325_v21, -inf }
  0x16   : > { %v2292_v9 = vld [vmem:[%s2268_s24 + $0xb0] sm:$0x1]  ;;  %4070 = vst [vmem:[#allocation6_spill] sm:$0xff] %v2297_v11  ;;  %v2300_v12 = vld [vmem:[%s2268_s24 + $0x80] sm:$0xff]  ;;  %v2336_v26 = vld [vmem:[%s2268_s24 + $0x8] sm:$0xff]  ;;  %v256_v28 = vmax.f32 %v2286_v7, %v2297_v11  ;;  %v258_v29 = vmax.f32 %v2289_v8, %v257_v14  ;;  %v182_v46 = vmax.f32 %v178_v22, %v181_v23 }
  0x17   : > { %4069 = vst [vmem:[#allocation5_spill] sm:$0xff] %v2292_v9  ;;  %v2303_v13 = vld [vmem:[%s2268_s24 + $0xf0] sm:$0x1]  ;;  %v2311_v16 = vld [vmem:[%s2268_s24 + $0xa0] sm:$0xff]  ;;  %v334_v18 = vsel %vm179_vm0, %v2292_v9, -inf  ;;  %v2345_v30 = vld [vmem:[%s2268_s24 + $0x18] sm:$0xff] }
  0x18   : > { %4071 = vst [vmem:[#allocation7_spill] sm:$0xff] %v2303_v13  ;;  %v2308_v15 = vld [vmem:[%s2268_s24 + $0x90] sm:$0xff]  ;;  %4072 = vst [vmem:[#allocation8_spill] sm:$0xff] %v2311_v16  ;;  %v2319_v19 = vld [vmem:[%s2268_s24 + $0xc0] sm:$0xff]  ;;  %v411_v25 = vsel %vm179_vm0, %v2303_v13, -inf  ;;  %v333_v34 = vmax.f32 %v2300_v12, %v2311_v16  ;;  %v191_v48 = vmax.f32 %v2345_v30, %v190_v32  ;;  %v259_v53 = vmax.f32 %v256_v28, %v258_v29 }
  0x19   : > { %528 = vrot.lane.b32.xlu1 %v2248_v1, %s2204_s17  ;;  %526 = vrot.lane.b32.xlu0 %v2242_v0, %s2204_s17  ;;  %v2322_v20 = vld [vmem:[%s2268_s24 + $0xd0] sm:$0xff]  ;;  %v2331_v24 = vld [vmem:[%s2268_s24 + $0xe0] sm:$0xff]  ;;  %v335_v35 = vmax.f32 %v2308_v15, %v334_v18  ;;  %v183_v62 = vrot.slane %v182_v46, 4 }
  0x1a   : > { %4075 = vst [vmem:[#allocation11_spill] sm:$0xff] %v2331_v24  ;;  %v2339_v27 = vld [vmem:[%s2268_s24 + $0xb8] sm:$0x1]  ;;  %v2348_v31 = vld [vmem:[%s2268_s24 + $0x28] sm:$0xff]  ;;  %v410_v40 = vmax.f32 %v2319_v19, %v2331_v24  ;;  %v412_v41 = vmax.f32 %v2322_v20, %v411_v25  ;;  %v260_v10 = vrot.slane %v259_v53, 4 }
  0x1b   : > { %4076 = vst [vmem:[#allocation12_spill] sm:$0xff] %v2339_v27  ;;  %4077 = vst [vmem:[#allocation13_spill] sm:$0xff] %v2348_v31  ;;  %v2353_v33 = vld [vmem:[%s2268_s24 + $0xf8] sm:$0x1]  ;;  %v2359_v36 = vld [vmem:[%s2268_s24 + $0x48] sm:$0xff]  ;;  %v344_v45 = vsel %vm179_vm0, %v2339_v27, -inf  ;;  %v189_v47 = vmax.f32 %v2336_v26, %v2348_v31  ;;  %v336_v56 = vmax.f32 %v333_v34, %v335_v35  ;;  %v184_v28 = vmax.f32 %v182_v46, %v183_v62 }
  0x1c   : > { %4078 = vst [vmem:[#allocation14_spill] sm:$0xff] %v2353_v33  ;;  %v2362_v37 = vld [vmem:[%s2268_s24 + $0x58] sm:$0xff]  ;;  %v2365_v38 = vld [vmem:[%s2268_s24 + $0x68] sm:$0xff]  ;;  %v421_v52 = vsel %vm179_vm0, %v2353_v33, -inf  ;;  %v413_v59 = vmax.f32 %v410_v40, %v412_v41  ;;  %v261_v32 = vmax.f32 %v259_v53, %v260_v10 }
  0x1d   : > { %551 = vrot.lane.b32.xlu1 %v2248_v1, %s2205_s18  ;;  %549 = vrot.lane.b32.xlu0 %v2242_v0, %s2205_s18  ;;  %4079 = vst [vmem:[#allocation15_spill] sm:$0xff] %v2365_v38  ;;  %v2373_v42 = vld [vmem:[%s2268_s24 + $0x88] sm:$0xff]  ;;  %v2376_v43 = vld [vmem:[%s2268_s24 + $0x98] sm:$0xff]  ;;  %v266_v54 = vmax.f32 %v2359_v36, %v2365_v38  ;;  %v268_v55 = vmax.f32 %v2362_v37, %v267_v39  ;;  %v337_v18 = vrot.slane %v336_v56, 4 }
  0x1e   : > { %v2379_v44 = vld [vmem:[%s2268_s24 + $0xa8] sm:$0xff]  ;;  %v2390_v50 = vld [vmem:[%s2268_s24 + $0xd8] sm:$0xff]  ;;  %v345_v58 = vmax.f32 %v2376_v43, %v344_v45  ;;  %v192_v63 = vmax.f32 %v189_v47, %v191_v48  ;;  %v414_v23 = vrot.slane %v413_v59, 4  ;;  %v185_v45 = vrot.slane %v184_v28, 2 }
  0x1f   : > { %4080 = vst [vmem:[#allocation16_spill] sm:$0xff] %v2379_v44  ;;  %v2387_v49 = vld [vmem:[%s2268_s24 + $0xc8] sm:$0xff]  ;;  %v343_v57 = vmax.f32 %v2373_v42, %v2379_v44  ;;  %v422_v61 = vmax.f32 %v2390_v50, %v421_v52  ;;  %v269_v14 = vmax.f32 %v266_v54, %v268_v55  ;;  %v338_v35 = vmax.f32 %v336_v56, %v337_v18 }
  0x20   : > { %v2393_v51 = vld [vmem:[%s2268_s24 + $0xe8] sm:$0xff]  ;;  %v193_v29 = vrot.slane %v192_v63, 4  ;;  %v415_v40 = vmax.f32 %v413_v59, %v414_v23  ;;  %v262_v13 = vrot.slane %v261_v32, 2  ;;  %v186_v55 = vmax.f32 %v184_v28, %v185_v45 }
  0x21   : > { %681 = vrot.lane.b32.xlu0 %v2242_v0, %s2206_s19  ;;  %683 = vrot.lane.b32.xlu1 %v2248_v1, %s2206_s19  ;;  %4081 = vst [vmem:[#allocation17_spill] sm:$0xff] %v2393_v51  ;;  %v420_v60 = vmax.f32 %v2387_v49, %v2393_v51  ;;  %v346_v22 = vmax.f32 %v343_v57, %v345_v58  ;;  %v270_v34 = vrot.slane %v269_v14, 4  ;;  %v339_v27 = vrot.slane %v338_v35, 2 }
  0x22   : > { %v194_v33 = vmax.f32 %v192_v63, %v193_v29  ;;  %v416_v48 = vrot.slane %v415_v40, 2  ;;  %v263_v58 = vmax.f32 %v261_v32, %v262_v13  ;;  %v187_v56 = vrot.slane %v186_v55, 1 }
  0x23   : > { %v423_v25 = vmax.f32 %v420_v60, %v422_v61  ;;  %v347_v39 = vrot.slane %v346_v22, 4  ;;  %v271_v52 = vmax.f32 %v269_v14, %v270_v34  ;;  %v340_v46 = vmax.f32 %v338_v35, %v339_v27 }
  0x24   : > { %v195_v57 = vrot.slane %v194_v33, 2  ;;  %v417_v53 = vmax.f32 %v415_v40, %v416_v48  ;;  %v264_v59 = vrot.slane %v263_v58, 1  ;;  %v2406_v34 = vmax.f32 %v186_v55, %v187_v56 }
  0x25   : > { %966 = vrot.lane.b32.xlu0 %v2242_v0, %s2207_s20  ;;  %968 = vrot.lane.b32.xlu1 %v2248_v1, %s2207_s20  ;;  %v424_v41 = vrot.slane %v423_v25, 4  ;;  %v348_v47 = vmax.f32 %v346_v22, %v347_v39  ;;  %v272_v60 = vrot.slane %v271_v52, 2  ;;  %v341_v23 = vrot.slane %v340_v46, 1 }
  0x26   : > { %v196_v10 = vmax.f32 %v194_v33, %v195_v57  ;;  %v418_v29 = vrot.slane %v417_v53, 1  ;;  %v201_v33 = vsub.f32 %v2277_v4, %v2406_v34 }
  0x27   : > { %v425_v54 = vmax.f32 %v423_v25, %v424_v41  ;;  %v349_v61 = vrot.slane %v348_v47, 2  ;;  %v273_v18 = vmax.f32 %v271_v52, %v272_v60  ;;  %v2408_v25 = vmax.f32 %v263_v58, %v264_v59 }
  0x28   : > { %v197_v22 = vrot.slane %v196_v10, 1  ;;  %v2410_v13 = vmax.f32 %v340_v46, %v341_v23  ;;  %v2412_v32 = vmax.f32 %v417_v53, %v418_v29  ;;  %v211_v55 = vmul.f32 1.442695, %v201_v33 }
  0x29   : > { %v426_v62 = vrot.slane %v425_v54, 2  ;;  %v350_v63 = vmax.f32 %v348_v47, %v349_v61  ;;  %v274_v28 = vrot.slane %v273_v18, 1  ;;  %v278_v41 = vsub.f32 %v2289_v8, %v2408_v25 }
  0x2a   : > { %v2414_v39 = vmax.f32 %v196_v10, %v197_v22  ;;  %v355_v52 = vsub.f32 %v2308_v15, %v2410_v13  ;;  %v432_v48 = vsub.f32 %v2322_v20, %v2412_v32  ;;  %v165_v46 = vlaneseq }
  0x2b   : > { %v427_v14 = vmax.f32 %v425_v54, %v426_v62  ;;  %v351_v27 = vrot.slane %v350_v63, 1  ;;  %v2418_v40 = vmax.f32 %v273_v18, %v274_v28  ;;  %v288_v57 = vmul.f32 1.442695, %v278_v41 }
  0x2c   : > { %v202_v54 = vsub.f32 %v2345_v30, %v2414_v39  ;;  %v365_v58 = vmul.f32 1.442695, %v355_v52  ;;  %v442_v60 = vmul.f32 1.442695, %v432_v48  ;;  %2113 = vpow2.f32 %v211_v55 }
  0x2d   : > { %v428_v35 = vrot.slane %v427_v14, 1  ;;  %v2422_v45 = vmax.f32 %v350_v63, %v351_v27  ;;  %v279_v4 = vsub.f32 %v2362_v37, %v2418_v40  ;;  %2115 = vpow2.f32 %v288_v57 }
  0x2e   : > { %v213_v61 = vmul.f32 1.442695, %v202_v54  ;;  %2117 = vpow2.f32 %v365_v58  ;;  %v166_v62 = vand.u32 127, %v165_v46 }
  0x2f   : > { %v2426_v47 = vmax.f32 %v427_v14, %v428_v35  ;;  %v356_v8 = vsub.f32 %v2376_v43, %v2422_v45  ;;  %v290_v20 = vmul.f32 1.442695, %v279_v4  ;;  %2119 = vpow2.f32 %v442_v60 }
  0x30   : > { %2121 = vpow2.f32 %v213_v61  ;;  %v167_v37 = vadd.s32 128, %v166_v62  ;;  %v2438_v43 = vand.u32 15, %v166_v62 }
  0x31   : > { %v433_v15 = vsub.f32 %v2390_v50, %v2426_v47  ;;  %v367_v30 = vmul.f32 1.442695, %v356_v8  ;;  %2123 = vpow2.f32 %v290_v20  ;;  %v2442_v50 = vshrl.u32 %v165_v46, 7 }
  0x32   : > { %v2440_v56 = vand.u32 15, %v167_v37  ;;  %v512_v59 = vadd.s32 4294967295, %v2438_v43  ;;  %v489_v23 = vadd.s32 4294967294, %v2438_v43  ;;  %v2461_v27 = vadd.s32 1, %v2438_v43 }
  0x33   : > { %v444_v53 = vmul.f32 1.442695, %v433_v15  ;;  %2125 = vpow2.f32 %v367_v30  ;;  %v2455_v22 = vsub.s32 2, %v2442_v50  ;;  %v2458_v28 = vsub.s32 3, %v2442_v50 }
  0x34   : > { %v513_v63 = vadd.s32 4294967295, %v2440_v56  ;;  %v490_v29 = vadd.s32 4294967294, %v2440_v56  ;;  %vm514_vm2 = vcmp.ge.s32.totalorder %v512_v59, 0  ;;  %v2468_v41 = vsub.s32 5, %v2442_v50 }
  0x35   : > { %2127 = vpow2.f32 %v444_v53  ;;  %4085 = vst [vmem:[#allocation21_spill] sm:$0xff] %v2455_v22  ;;  %4086 = vst [vmem:[#allocation22_spill] sm:$0xff] %v2458_v28  ;;  %vm491_vm4 = vcmp.ge.s32.totalorder %v489_v23, 0  ;;  %v536_v48 = vadd.s32 1, %v2440_v56  ;;  %vm539_vm8 = vcmp.lt.s32.totalorder %v2461_v27, 16 }
  0x36   : > { %4089 = vst [vmem:[#allocation25_spill] sm:$0xff] %v2468_v41  ;;  %vm515_vm5 = vcmp.ge.s32.totalorder %v513_v63, 0  ;;  %vm492_vm6 = vcmp.ge.s32.totalorder %v490_v29, 0 }
  0x37   : > { %vm540_vm9 = vcmp.lt.s32.totalorder %v536_v48, 16 }
  0x39   : > { %v2444_v10 = vpop.eup %2113 }
  0x3a   : > { %4082 = vst [vmem:[#allocation18_spill] sm:$0xff] %v2444_v10  ;;  %v2447_v18 = vpop.eup %2115  ;;  %v1137_v55 = vrot.slane %v2444_v10, %v2455_v22  ;;  %v1185_v57 = vrot.slane %v2444_v10, %v2458_v28 }
  0x3b   : > { %4083 = vst [vmem:[#allocation19_spill] sm:$0xff] %v2447_v18  ;;  %v2452_v14 = vpop.eup %2117  ;;  %v1149_v4 = vrot.slane %v2447_v18, %v2455_v22  ;;  %v1197_v8 = vrot.slane %v2447_v18, %v2458_v28 }
  0x3c   : > { %4084 = vst [vmem:[#allocation20_spill] sm:$0xff] %v2452_v14  ;;  %v2463_v35 = vpop.eup %2119  ;;  %v1161_v46 = vrot.slane %v2452_v14, %v2455_v22  ;;  %v1209_v20 = vrot.slane %v2452_v14, %v2458_v28 }
  0x3d   : > { %4087 = vst [vmem:[#allocation23_spill] sm:$0xff] %v2463_v35  ;;  %v2465_v33 = vpop.eup %2121  ;;  %v1173_v61 = vrot.slane %v2463_v35, %v2455_v22  ;;  %v1221_v30 = vrot.slane %v2463_v35, %v2458_v28 }
  0x3e   : > { %4088 = vst [vmem:[#allocation24_spill] sm:$0xff] %v2465_v33  ;;  %v2470_v52 = vpop.eup %2123  ;;  %v1141_v37 = vrot.slane %v2465_v33, %v2455_v22  ;;  %v1189_v9 = vrot.slane %v2465_v33, %v2458_v28 }
  0x3f   : > { %4090 = vst [vmem:[#allocation26_spill] sm:$0xff] %v2470_v52  ;;  %v1153_v17 = vrot.slane %v2470_v52, %v2455_v22  ;;  %v1201_v2 = vrot.slane %v2470_v52, %v2458_v28 }
  0x40   : > { %v2473_v54 = vpop.eup %2125 }
  0x41   : > { %4091 = vst [vmem:[#allocation27_spill] sm:$0xff] %v2473_v54  ;;  %v1165_v24 = vrot.slane %v2473_v54, %v2455_v22  ;;  %v1213_v23 = vrot.slane %v2473_v54, %v2458_v28 }
  0x42   : > { %v2484_v58 = vpop.eup %2127 }
  0x43   : > { %4092 = vst [vmem:[#allocation28_spill] sm:$0xff] %v2484_v58  ;;  %v1177_v59 = vrot.slane %v2484_v58, %v2455_v22 }
  0x83   : > { %v504_v15 = vpop.permute.xlu1 %503  ;;  %v481_v60 = vpop.permute.xlu0 %480 }
  0x84   : > { %v511_v53 = vsel %vm507_vm1, 0.0, %v504_v15  ;;  %v488_v62 = vsel %vm484_vm3, 0.0, %v481_v60 }
  0x85   : > { %v2501_v21 = vsel %vm514_vm2, %v511_v53, 0.0  ;;  %v2504_v6 = vsel %vm491_vm4, %v488_v62, 0.0  ;;  %v1225_v53 = vrot.slane %v2484_v58, %v2458_v28 }
  0x86   : > { %574 = vrot.lane.b32.xlu0 %v2504_v6, %s2206_s19  ;;  %v2521_v11 = vmul.f32 %v1137_v55, %v2504_v6  ;;  %v2524_v5 = vmul.f32 %v1149_v4, %v2504_v6  ;;  %v2527_v51 = vmul.f32 %v1161_v46, %v2504_v6  ;;  %v2530_v44 = vmul.f32 %v1173_v61, %v2504_v6 }
  0x87   : > { %v506_v62 = vpop.permute.xlu1 %505  ;;  %v483_v16 = vpop.permute.xlu0 %482  ;;  %v2535_v28 = vmul.f32 %v1185_v57, %v2501_v21  ;;  %v2538_v22 = vmul.f32 %v1197_v8, %v2501_v21  ;;  %v2547_v46 = vmul.f32 %v1209_v20, %v2501_v21  ;;  %v2550_v61 = vmul.f32 %v1221_v30, %v2501_v21 }
  0x88   : > { %4093 = vst [vmem:[#allocation29_spill] sm:$0xff] %v2521_v11  ;;  %4094 = vst [vmem:[#allocation30_spill] sm:$0xff] %v2524_v5  ;;  %v508_v38 = vsel %vm507_vm1, %v504_v15, %v506_v62  ;;  %v485_v31 = vsel %vm484_vm3, %v481_v60, %v483_v16  ;;  %v559_v16 = vadd.s32 2, %v2440_v56  ;;  %v1305_v20 = vrot.slane %v2444_v10, %v2468_v41 }
  0x89   : > { %4095 = vst [vmem:[#allocation31_spill] sm:$0xff] %v2527_v51  ;;  %4096 = vst [vmem:[#allocation32_spill] sm:$0xff] %v2530_v44  ;;  %v2541_v55 = vsel %vm515_vm5, %v508_v38, 0.0  ;;  %v2544_v4 = vsel %vm492_vm6, %v485_v31, 0.0  ;;  %v1321_v62 = vrot.slane %v2470_v52, %v2468_v41  ;;  %v4143_v51 = vld [vmem:[#allocation8_spill] sm:$0xff]  ;;  %v4152_v44 = vld [vmem:[#allocation11_spill] sm:$0xff] }
  0x8a   : > { %4097 = vst [vmem:[#allocation33_spill] sm:$0xff] %v2535_v28  ;;  %4098 = vst [vmem:[#allocation34_spill] sm:$0xff] %v2538_v22  ;;  %625 = vrot.lane.b32.xlu0 %v2501_v21, %s2206_s19  ;;  %576 = vrot.lane.b32.xlu1 %v2544_v4, %s2206_s19  ;;  %v2558_v38 = vmul.f32 %v1141_v37, %v2544_v4  ;;  %v2561_v31 = vmul.f32 %v1153_v17, %v2544_v4  ;;  %vm563_vm11 = vcmp.lt.s32.totalorder %v559_v16, 16  ;;  %vm1980_vm1 = vcmask 1043456  }
  0x8b   : > { %4099 = vst [vmem:[#allocation35_spill] sm:$0xff] %v2547_v46  ;;  %4100 = vst [vmem:[#allocation36_spill] sm:$0xff] %v2550_v61  ;;  %v2564_v63 = vmul.f32 %v1165_v24, %v2544_v4  ;;  %v529_v29 = vpop.permute.xlu1 %528  ;;  %v527_v57 = vpop.permute.xlu0 %526  ;;  %v2567_v8 = vmul.f32 %v1177_v59, %v2544_v4  ;;  %v2570_v15 = vmul.f32 %v1189_v9, %v2541_v55  ;;  %v2606_v16 = vsub.s32 6, %v2442_v50 }
  0x8c   : > { %4101 = vst [vmem:[#allocation37_spill] sm:$0xff] %v2558_v38  ;;  %4102 = vst [vmem:[#allocation38_spill] sm:$0xff] %v2561_v31  ;;  %v2573_v60 = vmul.f32 %v1201_v2, %v2541_v55  ;;  %v2576_v56 = vmul.f32 %v1213_v23, %v2541_v55  ;;  %v534_v17 = vsel %vm530_vm7, %v529_v29, 0.0  ;;  %v531_v24 = vsel %vm530_vm7, %v527_v57, %v529_v29  ;;  %v4162_v38 = vld [vmem:[#allocation9_spill] sm:$0xff] }
  0x8d   : > { %4103 = vst [vmem:[#allocation39_spill] sm:$0xff] %v2564_v63  ;;  %4104 = vst [vmem:[#allocation40_spill] sm:$0xff] %v2567_v8  ;;  %v2584_v30 = vsel %vm539_vm8, %v531_v24, 0.0  ;;  %v2590_v2 = vsel %vm540_vm9, %v534_v17, 0.0  ;;  %v2593_v48 = vmul.f32 %v1225_v53, %v2541_v55  ;;  %v1309_v37 = vrot.slane %v2465_v33, %v2468_v41  ;;  %v4157_v63 = vld [vmem:[#allocation2_spill] sm:$0xff] }
  0x8e   : > { %4105 = vst [vmem:[#allocation41_spill] sm:$0xff] %v2570_v15  ;;  %4106 = vst [vmem:[#allocation42_spill] sm:$0xff] %v2573_v60  ;;  %853 = vrot.lane.b32.xlu0 %v2504_v6, %s2207_s20  ;;  %627 = vrot.lane.b32.xlu1 %v2541_v55, %s2206_s19  ;;  %v2599_v59 = vmul.f32 %v1305_v20, %v2584_v30  ;;  %v1317_v23 = vrot.slane %v2447_v18, %v2468_v41  ;;  %v558_v53 = vadd.s32 2, %v2438_v43 }
  0x8f   : > { %4107 = vst [vmem:[#allocation43_spill] sm:$0xff] %v2576_v56  ;;  %v552_v9 = vpop.permute.xlu1 %551  ;;  %4108 = vst [vmem:[#allocation44_spill] sm:$0xff] %v2593_v48  ;;  %v2616_v57 = vmul.f32 %v1309_v37, %v2590_v2  ;;  %v2622_v24 = vmul.f32 %v1321_v62, %v2590_v2  ;;  %v199_v20 = vsub.f32 %v2274_v3, %v2406_v34 }
  0x90   : > { %v557_v27 = vsel %vm553_vm10, %v552_v9, 0.0  ;;  %4109 = vst [vmem:[#allocation45_spill] sm:$0xff] %v2599_v59  ;;  %v2619_v17 = vmul.f32 %v1317_v23, %v2584_v30  ;;  %vm562_vm12 = vcmp.lt.s32.totalorder %v558_v53, 16  ;;  %v550_v59 = vpop.permute.xlu0 %549  ;;  %v276_v43 = vsub.f32 %v2286_v7, %v2408_v25 }
  0x91   : > { %v2613_v29 = vsel %vm563_vm11, %v557_v27, 0.0  ;;  %4110 = vst [vmem:[#allocation46_spill] sm:$0xff] %v2616_v57  ;;  %4112 = vst [vmem:[#allocation48_spill] sm:$0xff] %v2622_v24  ;;  %v1353_v37 = vrot.slane %v2444_v10, %v2606_v16  ;;  %v353_v27 = vsub.f32 %v2300_v12, %v2410_v13  ;;  %v1329_v3 = vrot.slane %v2452_v14, %v2468_v41 }
  0x92   : > { %910 = vrot.lane.b32.xlu0 %v2501_v21, %s2207_s20  ;;  %741 = vrot.lane.b32.xlu1 %v2590_v2, %s2206_s19  ;;  %4111 = vst [vmem:[#allocation47_spill] sm:$0xff] %v2619_v17  ;;  %v1365_v23 = vrot.slane %v2447_v18, %v2606_v16  ;;  %v1377_v62 = vrot.slane %v2452_v14, %v2606_v16  ;;  %v207_v48 = vmul.f32 1.442695, %v199_v20 }
  0x93   : > { %v430_v17 = vsub.f32 %v2319_v19, %v2412_v32  ;;  %v200_v7 = vsub.f32 %v2336_v26, %v2414_v39  ;;  %v1341_v24 = vrot.slane %v2463_v35, %v2468_v41  ;;  %v1389_v12 = vrot.slane %v2463_v35, %v2606_v16 }
  0x94   : > { %v554_v57 = vsel %vm553_vm10, %v550_v59, %v552_v9  ;;  %v277_v61 = vsub.f32 %v2359_v36, %v2418_v40  ;;  %v354_v46 = vsub.f32 %v2373_v42, %v2422_v45  ;;  %v284_v19 = vmul.f32 1.442695, %v276_v43 }
  0x95   : > { %v431_v26 = vsub.f32 %v2387_v49, %v2426_v47  ;;  %v1333_v9 = vrot.slane %v2473_v54, %v2468_v41  ;;  %v1357_v59 = vrot.slane %v2465_v33, %v2606_v16  ;;  %v361_v36 = vmul.f32 1.442695, %v353_v27 }
  0x96   : > { %1398 = vrot.lane.b32.xlu0 %v2504_v6, %s2208_s25  ;;  %799 = vrot.lane.b32.xlu1 %v2613_v29, %s2206_s19  ;;  %v1345_v42 = vrot.slane %v2484_v58, %v2468_v41  ;;  %v1369_v20 = vrot.slane %v2470_v52, %v2606_v16  ;;  %v1381_v22 = vrot.slane %v2473_v54, %v2606_v16  ;;  %v2672_v43 = vsel %vm562_vm12, %v554_v57, 0.0 }
  0x97   : > { %v438_v49 = vmul.f32 1.442695, %v430_v17  ;;  %v209_v28 = vmul.f32 1.442695, %v200_v7  ;;  %v1393_v56 = vrot.slane %v2484_v58, %v2606_v16  ;;  %2129 = vpow2.f32 %v207_v48 }
  0x98   : > { %v286_v60 = vmul.f32 1.442695, %v277_v61  ;;  %v363_v27 = vmul.f32 1.442695, %v354_v46  ;;  %v2677_v15 = vmul.f32 %v1329_v3, %v2584_v30  ;;  %2131 = vpow2.f32 %v284_v19 }
  0x99   : > { %v440_v53 = vmul.f32 1.442695, %v431_v26  ;;  %v2684_v57 = vmul.f32 %v1333_v9, %v2590_v2  ;;  %v2687_v17 = vmul.f32 %v1341_v24, %v2584_v30  ;;  %2133 = vpow2.f32 %v361_v36 }
  0x9a   : > { %1455 = vrot.lane.b32.xlu0 %v2501_v21, %s2208_s25  ;;  %855 = vrot.lane.b32.xlu1 %v2544_v4, %s2207_s20  ;;  %4113 = vst [vmem:[#allocation49_spill] sm:$0xff] %v2677_v15  ;;  %v2690_v46 = vmul.f32 %v1345_v42, %v2590_v2  ;;  %v2693_v61 = vmul.f32 %v1353_v37, %v2672_v43  ;;  %2135 = vpow2.f32 %v438_v49  ;;  %v2753_v36 = vsub.s32 1, %v2442_v50  ;;  %v4127_v42 = vld [vmem:[#allocation21_spill] sm:$0xff] }
  0x9b   : > { %4114 = vst [vmem:[#allocation50_spill] sm:$0xff] %v2684_v57  ;;  %4115 = vst [vmem:[#allocation51_spill] sm:$0xff] %v2687_v17  ;;  %v2696_v48 = vmul.f32 %v1357_v59, %v2613_v29  ;;  %v2699_v3 = vmul.f32 %v1365_v23, %v2672_v43  ;;  %v2702_v7 = vmul.f32 %v1369_v20, %v2613_v29  ;;  %2137 = vpow2.f32 %v209_v28  ;;  %v4128_v49 = vld [vmem:[#allocation13_spill] sm:$0xff]  ;;  %v4140_v17 = vld [vmem:[#allocation3_spill] sm:$0xff] }
  0x9c   : > { %4116 = vst [vmem:[#allocation52_spill] sm:$0xff] %v2690_v46  ;;  %4117 = vst [vmem:[#allocation53_spill] sm:$0xff] %v2693_v61  ;;  %v2705_v24 = vmul.f32 %v1377_v62, %v2672_v43  ;;  %v2708_v19 = vmul.f32 %v1381_v22, %v2613_v29  ;;  %v2711_v37 = vmul.f32 %v1389_v12, %v2672_v43  ;;  %2139 = vpow2.f32 %v286_v60 }
  0x9d   : > { %4118 = vst [vmem:[#allocation54_spill] sm:$0xff] %v2696_v48  ;;  %4119 = vst [vmem:[#allocation55_spill] sm:$0xff] %v2699_v3  ;;  %v2714_v26 = vmul.f32 %v1393_v56, %v2613_v29  ;;  %2141 = vpow2.f32 %v363_v27  ;;  %v2735_v60 = vsub.s32 7, %v2442_v50  ;;  %v2750_v59 = vsub.s32 0, %v2442_v50 }
  0x9e   : > { %912 = vrot.lane.b32.xlu1 %v2541_v55, %s2207_s20  ;;  %739 = vrot.lane.b32.xlu0 %v2584_v30, %s2206_s19  ;;  %4120 = vst [vmem:[#allocation56_spill] sm:$0xff] %v2702_v7  ;;  %4121 = vst [vmem:[#allocation57_spill] sm:$0xff] %v2705_v24  ;;  %2143 = vpow2.f32 %v440_v53  ;;  %v2770_v3 = vsub.s32 4, %v2442_v50  ;;  %v204_v20 = vsub.f32 %v4128_v49, %v2414_v39  ;;  %v4129_v53 = vld [vmem:[#allocation15_spill] sm:$0xff]  ;;  %v4130_v49 = vld [vmem:[#allocation16_spill] sm:$0xff]  ;;  %v682_v24 = vpop.permute.xlu0 %681  ;;  %v684_v50 = vpop.permute.xlu1 %683 }
  0x9f   : > { %4122 = vst [vmem:[#allocation58_spill] sm:$0xff] %v2708_v19  ;;  %4123 = vst [vmem:[#allocation59_spill] sm:$0xff] %v2711_v37  ;;  %v281_v37 = vsub.f32 %v4129_v53, %v2418_v40  ;;  %v358_v61 = vsub.f32 %v4130_v49, %v2422_v45  ;;  %v4131_v53 = vld [vmem:[#allocation17_spill] sm:$0xff]  ;;  %v203_v15 = vsub.f32 %v4140_v17, %v2406_v34 }
  0xa0   : > { %4124 = vst [vmem:[#allocation60_spill] sm:$0xff] %v2714_v26  ;;  %4125 = vst [vmem:[#allocation61_spill] sm:$0xff] %v2735_v60  ;;  %v217_v19 = vmul.f32 1.442695, %v204_v20  ;;  %v435_v7 = vsub.f32 %v4131_v53, %v2426_v47  ;;  %v688_v20 = vsel %vm578_vm13, 0.0, %v682_v24  ;;  %v685_v53 = vsel %vm578_vm13, %v682_v24, %v684_v50 }
  0xa1   : > { %4126 = vst [vmem:[#allocation62_spill] sm:$0xff] %v2750_v59  ;;  %v371_v48 = vmul.f32 1.442695, %v358_v61  ;;  %v4133_v61 = vld [vmem:[#allocation22_spill] sm:$0xff]  ;;  %v357_v5 = vsub.f32 %v4143_v51, %v2410_v13  ;;  %v205_v31 = vsub.f32 %v4157_v63, %v2406_v34 }
  0xa2   : > { %1024 = vrot.lane.b32.xlu1 %v2590_v2, %s2207_s20  ;;  %797 = vrot.lane.b32.xlu0 %v2672_v43, %s2206_s19  ;;  %2145 = vpow2.f32 %v217_v19  ;;  %v969_v46 = vpop.permute.xlu1 %968 }
  0xa4   : > { %v2724_v22 = vpop.eup %2129 }
  0xa5   : > { %v2730_v28 = vpop.eup %2131  ;;  %v4132_v24 = vrot.slane %v2724_v22, %v4127_v42 }
  0xa6   : > { %1513 = vrot.lane.b32.xlu1 %v2248_v1, %s2208_s25  ;;  %1022 = vrot.lane.b32.xlu0 %v2584_v30, %s2207_s20  ;;  %v2732_v56 = vpop.eup %2133 }
  0xa7   : > { %v2737_v23 = vpop.eup %2135  ;;  %v2885_v50 = vmul.f32 %v4132_v24, %v688_v20  ;;  %v4148_v51 = vrot.slane %v2732_v56, %v2735_v60 }
  0xa8   : > { %v2739_v62 = vpop.eup %2137  ;;  %v4136_v24 = vrot.slane %v2737_v23, %v4127_v42 }
  0xa9   : > { %v2745_v12 = vpop.eup %2139  ;;  %v4137_v49 = vrot.slane %v2739_v62, %v4127_v42 }
  0xaa   : > { %1080 = vrot.lane.b32.xlu1 %v2613_v29, %s2207_s20  ;;  %1078 = vrot.lane.b32.xlu0 %v2672_v43, %s2207_s20  ;;  %v2747_v9 = vpop.eup %2141 }
  0xab   : > { %v2759_v27 = vpop.eup %2143 }
  0xae   : > { %1400 = vrot.lane.b32.xlu1 %v2544_v4, %s2208_s25  ;;  %1511 = vrot.lane.b32.xlu0 %v2242_v0, %s2208_s25 }
  0xb2   : > { %1457 = vrot.lane.b32.xlu1 %v2541_v55, %s2208_s25  ;;  %1679 = vrot.lane.b32.xlu0 %v2504_v6, %s2209_s26  ;;  %v2904_v6 = vmul.f32 %v4136_v24, %v688_v20 }
  0xb6   : > { %1569 = vrot.lane.b32.xlu1 %v2590_v2, %s2208_s25  ;;  %1736 = vrot.lane.b32.xlu0 %v2501_v21, %s2209_s26  ;;  %v294_v21 = vmul.f32 1.442695, %v281_v37  ;;  %v448_v37 = vmul.f32 1.442695, %v435_v7  ;;  %v4135_v7 = vrot.slane %v2732_v56, %v4127_v42 }
  0xb8   : > { %2147 = vpow2.f32 %v294_v21  ;;  %v2899_v26 = vmul.f32 %v4135_v7, %v688_v20  ;;  %v2909_v21 = vmul.f32 %v4137_v49, %v685_v53 }
  0xb9   : > { %2149 = vpow2.f32 %v371_v48  ;;  %v967_v48 = vpop.permute.xlu0 %966 }
  0xba   : > { %1794 = vrot.lane.b32.xlu1 %v2248_v1, %s2209_s26  ;;  %1567 = vrot.lane.b32.xlu0 %v2584_v30, %s2208_s25  ;;  %v4134_v1 = vrot.slane %v2730_v28, %v4127_v42  ;;  %v973_v49 = vsel %vm857_vm14, 0.0, %v967_v48  ;;  %2151 = vpow2.f32 %v448_v37  ;;  %v4146_v37 = vrot.slane %v2730_v28, %v2735_v60 }
  0xbc   : > { %v2894_v19 = vmul.f32 %v4134_v1, %v688_v20  ;;  %v4138_v1 = vrot.slane %v2745_v12, %v4127_v42  ;;  %v4139_v20 = vrot.slane %v2747_v9, %v4127_v42 }
  0xbe   : > { %1625 = vrot.lane.b32.xlu1 %v2613_v29, %s2208_s25  ;;  %1623 = vrot.lane.b32.xlu0 %v2672_v43, %s2208_s25  ;;  %v2918_v7 = vmul.f32 %v4138_v1, %v685_v53  ;;  %v2923_v24 = vmul.f32 %v4139_v20, %v685_v53  ;;  %v4142_v1 = vld [vmem:[#allocation6_spill] sm:$0xff]  ;;  %v970_v20 = vsel %vm857_vm14, %v967_v48, %v969_v46  ;;  %v215_v46 = vmul.f32 1.442695, %v203_v15 }
  0xbf   : > { %v280_v8 = vsub.f32 %v4142_v1, %v2408_v25  ;;  %v2952_v1 = vmul.f32 %v4146_v37, %v973_v49  ;;  %v4150_v37 = vrot.slane %v2737_v23, %v2735_v60  ;;  %v434_v48 = vsub.f32 %v4152_v44, %v2412_v32 }
  0xc0   : > { %v4158_v15 = vrot.slane %v2747_v9, %v2735_v60  ;;  %v4160_v44 = vrot.slane %v2759_v27, %v2735_v60  ;;  %2153 = vpow2.f32 %v215_v46  ;;  %v4166_v46 = vld [vmem:[#allocation12_spill] sm:$0xff] }
  0xc1   : > { %4147 = vst [vmem:[#allocation15_spill] sm:$0xff] %v2952_v1  ;;  %v2970_v17 = vmul.f32 %v4150_v37, %v973_v49 }
  0xc2   : > { %1681 = vrot.lane.b32.xlu1 %v2544_v4, %s2209_s26  ;;  %1792 = vrot.lane.b32.xlu0 %v2242_v0, %s2209_s26  ;;  %v4141_v4 = vrot.slane %v2759_v27, %v4127_v42  ;;  %v2994_v37 = vmul.f32 %v4160_v44, %v970_v20 }
  0xc3   : > { %4151 = vst [vmem:[#allocation17_spill] sm:$0xff] %v2970_v17  ;;  %v206_v17 = vsub.f32 %v4162_v38, %v2414_v39  ;;  %v446_v39 = vmul.f32 1.442695, %v434_v48  ;;  %v4164_v38 = vld [vmem:[#allocation10_spill] sm:$0xff]  ;;  %v360_v48 = vsub.f32 %v4166_v46, %v2422_v45  ;;  %v1269_v46 = vrot.slane %v2452_v14, %v2770_v3 }
  0xc4   : > { %v2931_v57 = vmul.f32 %v4141_v4, %v685_v53  ;;  %v4144_v53 = vrot.slane %v2724_v22, %v2735_v60  ;;  %4161 = vst [vmem:[#allocation11_spill] sm:$0xff] %v2994_v37 }
  0xc6   : > { %v2947_v4 = vmul.f32 %v4144_v53, %v973_v49  ;;  %1738 = vrot.lane.b32.xlu1 %v2541_v55, %s2209_s26  ;;  %1848 = vrot.lane.b32.xlu0 %v2584_v30, %s2209_s26  ;;  %v2965_v53 = vmul.f32 %v4148_v51, %v973_v49  ;;  %v4153_v55 = vrot.slane %v2739_v62, %v2735_v60  ;;  %v292_v51 = vmul.f32 1.442695, %v280_v8 }
  0xc7   : > { %v4155_v30 = vrot.slane %v2745_v12, %v2735_v60  ;;  %v2989_v49 = vmul.f32 %v4158_v15, %v970_v20 }
  0xc8   : > { %4145 = vst [vmem:[#allocation13_spill] sm:$0xff] %v2947_v4  ;;  %4149 = vst [vmem:[#allocation16_spill] sm:$0xff] %v2965_v53  ;;  %v2977_v0 = vmul.f32 %v4153_v55, %v970_v20  ;;  %v369_v55 = vmul.f32 1.442695, %v357_v5  ;;  %2155 = vpow2.f32 %v292_v51  ;;  %v221_v5 = vmul.f32 1.442695, %v206_v17 }
  0xc9   : > { %v2982_v11 = vmul.f32 %v4155_v30, %v970_v20  ;;  %4159 = vst [vmem:[#allocation8_spill] sm:$0xff] %v2989_v49  ;;  %v4163_v30 = vld [vmem:[#allocation4_spill] sm:$0xff]  ;;  %v3006_v49 = vpop.eup %2145  ;;  %v283_v20 = vsub.f32 %v4164_v38, %v2418_v40  ;;  %v1237_v40 = vrot.slane %v2465_v33, %v2770_v3  ;;  %v1251_v51 = vrot.slane %v2447_v18, %v2770_v3  ;;  %v4167_v38 = vld [vmem:[#allocation7_spill] sm:$0xff] }
  0xca   : > { %4154 = vst [vmem:[#allocation3_spill] sm:$0xff] %v2977_v0  ;;  %v282_v15 = vsub.f32 %v4163_v30, %v2408_v25  ;;  %1850 = vrot.lane.b32.xlu1 %v2590_v2, %s2209_s26  ;;  %1904 = vrot.lane.b32.xlu0 %v2672_v43, %s2209_s26  ;;  %v3016_v44 = vpop.eup %2147  ;;  %v219_v30 = vmul.f32 1.442695, %v205_v31  ;;  %v4165_v2 = vld [vmem:[#allocation5_spill] sm:$0xff]  ;;  %v1233_v43 = vrot.slane %v2444_v10, %v2770_v3  ;;  %2157 = vpow2.f32 %v369_v55  ;;  %v4168_v55 = vld [vmem:[#allocation14_spill] sm:$0xff] }
  0xcb   : > { %4156 = vst [vmem:[#allocation6_spill] sm:$0xff] %v2982_v11  ;;  %v359_v63 = vsub.f32 %v4165_v2, %v2410_v13  ;;  %v3026_v34 = vpop.eup %2149  ;;  %v436_v13 = vsub.f32 %v4167_v38, %v2412_v32  ;;  %v1255_v17 = vrot.slane %v2470_v52, %v2770_v3  ;;  %2159 = vpow2.f32 %v446_v39 }
  0xcc   : > { %v296_v31 = vmul.f32 1.442695, %v282_v15  ;;  %v298_v45 = vmul.f32 1.442695, %v283_v20  ;;  %v437_v2 = vsub.f32 %v4168_v55, %v2426_v47  ;;  %v1273_v15 = vrot.slane %v2473_v54, %v2770_v3  ;;  %v3044_v32 = vpop.eup %2151 }
  0xcd   : > { %2161 = vpow2.f32 %v219_v30  ;;  %v373_v25 = vmul.f32 1.442695, %v359_v63  ;;  %v1291_v39 = vrot.slane %v2484_v58, %v2770_v3  ;;  %v375_v20 = vmul.f32 1.442695, %v360_v48 }
  0xce   : > { %1906 = vrot.lane.b32.xlu1 %v2613_v29, %s2209_s26  ;;  %v1287_v29 = vrot.slane %v2463_v35, %v2770_v3  ;;  %2163 = vpow2.f32 %v221_v5  ;;  %v450_v55 = vmul.f32 1.442695, %v436_v13  ;;  %v452_v8 = vmul.f32 1.442695, %v437_v2 }
  0xcf   : > { %2165 = vpow2.f32 %v296_v31  ;;  %v1240_v48 = vcombine.low %v1233_v43, %v1237_v40  ;;  %v1258_v37 = vcombine.low %v1251_v51, %v1255_v17  ;;  %v1276_v31 = vcombine.low %v1269_v46, %v1273_v15  ;;  %v3074_v51 = vpop.eup %2153  ;;  %v2193_v15 = vld [vmem:[%s2239_s14] sm:$0xff] }
  0xd0   : > { %2167 = vpow2.f32 %v298_v45  ;;  %v1294_v13 = vcombine.low %v1287_v29, %v1291_v39  ;;  %4169 = vst [vmem:[#allocation2_spill] sm:$0xff] %v3074_v51  ;;  %v310_v2 = vadd.f32 %v2745_v12, %v2470_v52  ;;  %v387_v46 = vadd.f32 %v2747_v9, %v2473_v54 }
  0xd1   : > { %2169 = vpow2.f32 %v373_v25  ;;  %v3081_v29 = vmul.f32 %v2193_v15, %v1240_v48  ;;  %v3083_v39 = vmul.f32 %v2193_v15, %v1258_v37  ;;  %v3091_v40 = vmul.f32 %v2193_v15, %v1276_v31 }
  0xd2   : > { %2171 = vpow2.f32 %v375_v20  ;;  %v3093_v43 = vmul.f32 %v2193_v15, %v1294_v13  ;;  %v223_v48 = vadd.f32 %v2724_v22, %v2444_v10  ;;  %v233_v13 = vadd.f32 %v2739_v62, %v2465_v33 }
  0xd3   : > { %2173 = vpow2.f32 %v450_v55  ;;  %4170 = vst [vmem:[#allocation9_spill] sm:$0xff] %v3081_v29  ;;  %4171 = vst [vmem:[#allocation4_spill] sm:$0xff] %v3083_v39  ;;  %v300_v25 = vadd.f32 %v2730_v28, %v2447_v18  ;;  %v377_v31 = vadd.f32 %v2732_v56, %v2452_v14  ;;  %v454_v15 = vadd.f32 %v2737_v23, %v2463_v35 }
  0xd4   : > { %2175 = vpow2.f32 %v452_v8  ;;  %4173 = vst [vmem:[#allocation5_spill] sm:$0xff] %v3091_v40  ;;  %4174 = vst [vmem:[#allocation12_spill] sm:$0xff] %v3093_v43  ;;  %v224_v5 = vadd.f32 %v3074_v51, %v223_v48  ;;  %v234_v47 = vadd.f32 %v3006_v49, %v233_v13  ;;  %v311_v54 = vadd.f32 %v3016_v44, %v310_v2 }
  0xd5   : > { %v3085_v20 = vpop.eup %2155  ;;  %v464_v48 = vadd.f32 %v2759_v27, %v2484_v58  ;;  %v388_v10 = vadd.f32 %v3026_v34, %v387_v46 }
  0xd6   : > { %4172 = vst [vmem:[#allocation10_spill] sm:$0xff] %v3085_v20  ;;  %v301_v40 = vadd.f32 %v3085_v20, %v300_v25 }
  0xd7   : > { %v3095_v17 = vpop.eup %2157 }
  0xd8   : > { %4175 = vst [vmem:[#allocation7_spill] sm:$0xff] %v3095_v17  ;;  %v3113_v8 = vpop.eup %2159  ;;  %v378_v18 = vadd.f32 %v3095_v17, %v377_v31 }
  0xd9   : > { %4176 = vst [vmem:[#allocation14_spill] sm:$0xff] %v3113_v8  ;;  %v455_v31 = vadd.f32 %v3113_v8, %v454_v15 }
  0xda   : > { %v3123_v37 = vpop.eup %2161 }
  0xdb   : > { %4177 = vst [vmem:[#allocation63_spill] sm:$0xff] %v3123_v37  ;;  %v3133_v45 = vpop.eup %2163  ;;  %v225_v30 = vsel %vm179_vm0, %v3123_v37, 0.0 }
  0xdc   : > { %4178 = vst [vmem:[#allocation64_spill] sm:$0xff] %v3133_v45  ;;  %v3143_v63 = vpop.eup %2165  ;;  %v235_v38 = vsel %vm179_vm0, %v3133_v45, 0.0  ;;  %v226_v52 = vadd.f32 %v225_v30, %v224_v5 }
  0xdd   : > { %4179 = vst [vmem:[#allocation65_spill] sm:$0xff] %v3143_v63  ;;  %v3152_v55 = vpop.eup %2167  ;;  %v302_v29 = vsel %vm179_vm0, %v3143_v63, 0.0  ;;  %v236_v2 = vadd.f32 %v235_v38, %v234_v47  ;;  %v465_v38 = vadd.f32 %v3044_v32, %v464_v48 }
  0xde   : > { %4180 = vst [vmem:[#allocation66_spill] sm:$0xff] %v3152_v55  ;;  %v3161_v43 = vpop.eup %2169  ;;  %v312_v35 = vsel %vm179_vm0, %v3152_v55, 0.0  ;;  %v303_v30 = vadd.f32 %v302_v29, %v301_v40  ;;  %v227_v33 = vrot.slane %v226_v52, 4 }
  0xdf   : > { %4181 = vst [vmem:[#allocation67_spill] sm:$0xff] %v3161_v43  ;;  %v3170_v39 = vpop.eup %2171  ;;  %v379_v58 = vsel %vm179_vm0, %v3161_v43, 0.0  ;;  %v313_v11 = vadd.f32 %v312_v35, %v311_v54  ;;  %v237_v35 = vrot.slane %v236_v2, 4 }
  0xe0   : > { %4182 = vst [vmem:[#allocation68_spill] sm:$0xff] %v3170_v39  ;;  %v3179_v14 = vpop.eup %2173  ;;  %v389_v5 = vsel %vm179_vm0, %v3170_v39, 0.0  ;;  %v380_v25 = vadd.f32 %v379_v58, %v378_v18  ;;  %v304_v46 = vrot.slane %v303_v30, 4 }
  0xe1   : > { %4183 = vst [vmem:[#allocation69_spill] sm:$0xff] %v3179_v14  ;;  %v3186_v13 = vpop.eup %2175  ;;  %v456_v47 = vsel %vm179_vm0, %v3179_v14, 0.0  ;;  %v390_v54 = vadd.f32 %v389_v5, %v388_v10  ;;  %v314_v29 = vrot.slane %v313_v11, 4  ;;  %v228_v5 = vadd.f32 %v227_v33, %v226_v52 }
  0xe2   : > { %4184 = vst [vmem:[#allocation70_spill] sm:$0xff] %v3186_v13  ;;  %v466_v40 = vsel %vm179_vm0, %v3186_v13, 0.0  ;;  %v457_v1 = vadd.f32 %v456_v47, %v455_v31  ;;  %v381_v53 = vrot.slane %v380_v25, 4  ;;  %v238_v47 = vadd.f32 %v237_v35, %v236_v2 }
  0xe3   : > { %v467_v0 = vadd.f32 %v466_v40, %v465_v38  ;;  %v391_v18 = vrot.slane %v390_v54, 4  ;;  %v305_v40 = vadd.f32 %v304_v46, %v303_v30  ;;  %v315_v48 = vadd.f32 %v314_v29, %v313_v11 }
  0xe4   : > { %v458_v15 = vrot.slane %v457_v1, 4  ;;  %v229_v58 = vrot.slane %v228_v5, 2  ;;  %v382_v31 = vadd.f32 %v381_v53, %v380_v25  ;;  %v239_v33 = vrot.slane %v238_v47, 2 }
  0xe5   : > { %v468_v10 = vrot.slane %v467_v0, 4  ;;  %v392_v38 = vadd.f32 %v391_v18, %v390_v54  ;;  %v306_v2 = vrot.slane %v305_v40, 2  ;;  %v316_v25 = vrot.slane %v315_v48, 2 }
  0xe6   : > { %v459_v52 = vadd.f32 %v458_v15, %v457_v1  ;;  %v230_v18 = vadd.f32 %v229_v58, %v228_v5  ;;  %v383_v11 = vrot.slane %v382_v31, 2  ;;  %v240_v15 = vadd.f32 %v239_v33, %v238_v47 }
  0xe7   : > { %v469_v30 = vadd.f32 %v468_v10, %v467_v0  ;;  %v393_v35 = vrot.slane %v392_v38, 2  ;;  %v307_v10 = vadd.f32 %v306_v2, %v305_v40  ;;  %v317_v29 = vadd.f32 %v316_v25, %v315_v48 }
  0xe8   : > { %v460_v46 = vrot.slane %v459_v52, 2  ;;  %v231_v53 = vrot.slane %v230_v18, 1  ;;  %v384_v1 = vadd.f32 %v383_v11, %v382_v31  ;;  %v241_v0 = vrot.slane %v240_v15, 1 }
  0xe9   : > { %v470_v54 = vrot.slane %v469_v30, 2  ;;  %v394_v58 = vadd.f32 %v393_v35, %v392_v38  ;;  %v308_v5 = vrot.slane %v307_v10, 1  ;;  %v318_v40 = vrot.slane %v317_v29, 1 }
  0xea   : > { %v461_v33 = vadd.f32 %v460_v46, %v459_v52  ;;  %v232_v48 = vadd.f32 %v231_v53, %v230_v18  ;;  %v385_v47 = vrot.slane %v384_v1, 1  ;;  %v242_v46 = vadd.f32 %v241_v0, %v240_v15 }
  0xeb   : > { %v471_v2 = vadd.f32 %v470_v54, %v469_v30  ;;  %v395_v31 = vrot.slane %v394_v58, 1  ;;  %v309_v38 = vadd.f32 %v308_v5, %v307_v10  ;;  %v319_v25 = vadd.f32 %v318_v40, %v317_v29 }
  0xec   : > { %v462_v35 = vrot.slane %v461_v33, 1  ;;  %2177 = vrcp.f32 %v232_v48  ;;  %v386_v30 = vadd.f32 %v385_v47, %v384_v1  ;;  %v4187_v29 = vrot.slane %v2730_v28, %v2753_v36 }
  0xed   : > { %v472_v52 = vrot.slane %v471_v2, 1  ;;  %2179 = vrcp.f32 %v242_v46  ;;  %v396_v53 = vadd.f32 %v395_v31, %v394_v58  ;;  %v4193_v40 = vrot.slane %v2732_v56, %v2750_v59 }
  0xee   : > { %2181 = vrcp.f32 %v309_v38  ;;  %v463_v48 = vadd.f32 %v462_v35, %v461_v33  ;;  %v4194_v5 = vrot.slane %v2737_v23, %v2750_v59  ;;  %v4195_v10 = vrot.slane %v2747_v9, %v2753_v36 }
  0xef   : > { %2183 = vrcp.f32 %v319_v25  ;;  %v473_v46 = vadd.f32 %v472_v52, %v471_v2  ;;  %v4189_v25 = vrot.slane %v2730_v28, %v2750_v59  ;;  %v4199_v13 = vrot.slane %v2745_v12, %v2750_v59 }
  0xf0   : > { %2185 = vrcp.f32 %v386_v30  ;;  %v4200_v14 = vrot.slane %v2747_v9, %v2750_v59  ;;  %vm1683_vm0 = vcmask 785408  }
  0xf1   : > { %2187 = vrcp.f32 %v396_v53  ;;  %v4185_v53 = vrot.slane %v2724_v22, %v2753_v36 }
  0xf2   : > { %2189 = vrcp.f32 %v463_v48 }
  0xf3   : > { %2191 = vrcp.f32 %v473_v46  ;;  %v4188_v46 = vrot.slane %v2732_v56, %v2753_v36 }
  0xf8   : > { %v3275_v42 = vpop.permute.xlu0 %574 }
  0xf9   : > { %v582_v33 = vsel %vm578_vm13, 0.0, %v3275_v42  ;;  %v3399_v63 = vpop.eup %2177 }
  0xfa   : > { %v601_v47 = vmul.f32 %v4189_v25, %v582_v33  ;;  %v621_v25 = vmul.f32 %v4194_v5, %v582_v33  ;;  %4202 = vst [vmem:[#allocation72_spill] sm:$0xff] %v3399_v63 }
  0xfc   : > { %v577_v4 = vpop.permute.xlu1 %576  ;;  %v626_v11 = vpop.permute.xlu0 %625 }
  0xfd   : > { %v632_v58 = vsel %vm578_vm13, 0.0, %v626_v11  ;;  %v579_v30 = vsel %vm578_vm13, %v3275_v42, %v577_v4  ;;  %v4192_v4 = vrot.slane %v2745_v12, %v2753_v36 }
  0xfe   : > { %v641_v38 = vmul.f32 %v4185_v53, %v632_v58  ;;  %v653_v31 = vmul.f32 %v4187_v29, %v632_v58  ;;  %v665_v53 = vmul.f32 %v4188_v46, %v632_v58  ;;  %v611_v46 = vmul.f32 %v4193_v40, %v582_v33 }
  0xff   : > { %v602_v5 = vmul.f32 %v4199_v13, %v579_v30 }
 0x100   : > { %v628_v54 = vpop.permute.xlu1 %627  ;;  %v3309_v18 = vpop.permute.xlu0 %853  ;;  %v655_v43 = vadd.f32 %v653_v31, %v601_v47  ;;  %v667_v55 = vadd.f32 %v665_v53, %v611_v46  ;;  %v4205_v47 = vrot.slane %v2730_v28, %v2468_v41 }
 0x101   : > { %v629_v2 = vsel %vm578_vm13, %v626_v11, %v628_v54  ;;  %v4186_v54 = vrot.slane %v2724_v22, %v2750_v59  ;;  %v4190_v11 = vrot.slane %v2737_v23, %v2753_v36 }
 0x102   : > { %v654_v29 = vmul.f32 %v4192_v4, %v629_v2  ;;  %v4198_v4 = vrot.slane %v2739_v62, %v2750_v59 }
 0x103   : > { %v591_v48 = vmul.f32 %v4186_v54, %v582_v33  ;;  %v677_v1 = vmul.f32 %v4190_v11, %v632_v58  ;;  %v4191_v54 = vrot.slane %v2739_v62, %v2753_v36  ;;  %v666_v58 = vmul.f32 %v4195_v10, %v629_v2 }
 0x104   : > { %v3331_v35 = vpop.permute.xlu1 %741  ;;  %v3333_v52 = vpop.permute.xlu0 %910  ;;  %v4196_v11 = vrot.slane %v2759_v27, %v2753_v36  ;;  %v592_v40 = vmul.f32 %v4198_v4, %v579_v30  ;;  %v861_v10 = vsel %vm857_vm14, 0.0, %v3309_v18  ;;  %v656_v37 = vadd.f32 %v654_v29, %v602_v5 }
 0x105   : > { %v642_v42 = vmul.f32 %v4191_v54, %v629_v2  ;;  %v643_v33 = vadd.f32 %v641_v38, %v591_v48  ;;  %v679_v4 = vadd.f32 %v677_v1, %v621_v25  ;;  %v917_v13 = vsel %vm857_vm14, 0.0, %v3333_v52  ;;  %v3403_v38 = vpop.eup %2179 }
 0x106   : > { %v678_v54 = vmul.f32 %v4196_v11, %v629_v2  ;;  %v612_v2 = vmul.f32 %v4200_v14, %v579_v30  ;;  %v4201_v11 = vrot.slane %v2759_v27, %v2750_v59  ;;  %4203 = vst [vmem:[#allocation73_spill] sm:$0xff] %v3403_v38  ;;  %v4204_v14 = vrot.slane %v2724_v22, %v2468_v41  ;;  %v3417_v53 = vpop.eup %2181 }
 0x107   : > { %v644_v45 = vadd.f32 %v642_v42, %v592_v40  ;;  %v3413_v31 = vmul.f32 %v4205_v47, %v861_v10  ;;  %4207 = vst [vmem:[#allocation75_spill] sm:$0xff] %v3417_v53  ;;  %v4208_v42 = vrot.slane %v2732_v56, %v2468_v41  ;;  %v4211_v40 = vrot.slane %v2724_v22, %v2606_v16 }
 0x108   : > { %v3381_v0 = vpop.permute.xlu1 %799  ;;  %v3383_v15 = vpop.permute.xlu0 %1398  ;;  %v622_v39 = vmul.f32 %v4201_v11, %v579_v30  ;;  %v668_v48 = vadd.f32 %v666_v58, %v612_v2  ;;  %v3408_v17 = vmul.f32 %v4204_v14, %v861_v10  ;;  %v699_v58 = vadd.f32 %v2885_v50, %v643_v33 }
 0x109   : > { %4197 = vst [vmem:[#allocation71_spill] sm:$0xff] %v3383_v15  ;;  %v3422_v29 = vmul.f32 %v4208_v42, %v861_v10  ;;  %v3437_v5 = vmul.f32 %v4211_v40, %v917_v13  ;;  %v4212_v2 = vrot.slane %v2730_v28, %v2606_v16  ;;  %v723_v14 = vadd.f32 %v2899_v26, %v667_v55 }
 0x10a   : > { %v680_v8 = vadd.f32 %v678_v54, %v622_v39  ;;  %v4209_v39 = vrot.slane %v2737_v23, %v2468_v41  ;;  %v3432_v54 = vpop.eup %2183  ;;  %v4214_v50 = vrot.slane %v2732_v56, %v2606_v16  ;;  %v4215_v33 = vrot.slane %v2737_v23, %v2606_v16 }
 0x10b   : > { %4210 = vst [vmem:[#allocation76_spill] sm:$0xff] %v3432_v54  ;;  %v3442_v11 = vmul.f32 %v4212_v2, %v917_v13  ;;  %v3446_v47 = vpop.eup %2185  ;;  %v700_v42 = vadd.f32 %v2909_v21, %v644_v45  ;;  %v4217_v26 = vrot.slane %v2739_v62, %v2468_v41  ;;  %v724_v2 = vadd.f32 %v2923_v24, %v668_v48 }
 0x10c   : > { %v856_v1 = vpop.permute.xlu1 %855  ;;  %v3415_v30 = vpop.permute.xlu0 %1455  ;;  %v3427_v46 = vmul.f32 %v4209_v39, %v861_v10  ;;  %v711_v10 = vadd.f32 %v2894_v19, %v655_v43  ;;  %4213 = vst [vmem:[#allocation77_spill] sm:$0xff] %v3446_v47  ;;  %v712_v39 = vadd.f32 %v2918_v7, %v656_v37  ;;  %v736_v47 = vadd.f32 %v2931_v57, %v680_v8 }
 0x10d   : > { %4206 = vst [vmem:[#allocation74_spill] sm:$0xff] %v3415_v30  ;;  %v858_v25 = vsel %vm857_vm14, %v3309_v18, %v856_v1  ;;  %v3451_v18 = vmul.f32 %v4214_v50, %v917_v13  ;;  %v3456_v1 = vmul.f32 %v4215_v33, %v917_v13  ;;  %v3460_v40 = vpop.eup %2187  ;;  %v735_v50 = vadd.f32 %v2904_v6, %v679_v4 }
 0x10e   : > { %4216 = vst [vmem:[#allocation78_spill] sm:$0xff] %v3460_v40  ;;  %v871_v19 = vmul.f32 %v4217_v26, %v858_v25  ;;  %v3468_v13 = vpop.eup %2189  ;;  %v4219_v21 = vrot.slane %v2745_v12, %v2468_v41  ;;  %v4221_v6 = vrot.slane %v2747_v9, %v2468_v41  ;;  %v4222_v24 = vrot.slane %v2759_v27, %v2468_v41 }
 0x10f   : > { %4218 = vst [vmem:[#allocation79_spill] sm:$0xff] %v3468_v13  ;;  %v3478_v26 = vpop.eup %2191  ;;  %v4223_v4 = vrot.slane %v2739_v62, %v2606_v16  ;;  %v4227_v40 = vrot.slane %v2730_v28, %v4133_v61  ;;  %v4233_v53 = vrot.slane %v2747_v9, %v2606_v16 }
 0x110   : > { %v913_v43 = vpop.permute.xlu1 %912  ;;  %v740_v55 = vpop.permute.xlu0 %739  ;;  %v883_v7 = vmul.f32 %v4219_v21, %v858_v25  ;;  %4220 = vst [vmem:[#allocation80_spill] sm:$0xff] %v3478_v26  ;;  %v895_v57 = vmul.f32 %v4221_v6, %v858_v25  ;;  %v907_v8 = vmul.f32 %v4222_v24, %v858_v25  ;;  %v4226_v21 = vrot.slane %v2739_v62, %v4133_v61 }
 0x111   : > { %v914_v45 = vsel %vm857_vm14, %v3333_v52, %v913_v43  ;;  %v743_v37 = vsel %vm578_vm13, %v740_v55, %v3331_v35  ;;  %v746_v33 = vsel %vm578_vm13, 0.0, %v740_v55  ;;  %v4224_v52 = vrot.slane %v2745_v12, %v2606_v16 }
 0x112   : > { %v927_v48 = vmul.f32 %v4223_v4, %v914_v45  ;;  %v4225_v43 = vrot.slane %v2724_v22, %v4133_v61  ;;  %v756_v6 = vmul.f32 %v4226_v21, %v743_v37  ;;  %v767_v25 = vmul.f32 %v4227_v40, %v746_v33 }
 0x113   : > { %v939_v35 = vmul.f32 %v4224_v52, %v914_v45  ;;  %v4228_v24 = vrot.slane %v2745_v12, %v4133_v61  ;;  %v4229_v52 = vrot.slane %v2732_v56, %v4133_v61  ;;  %v4231_v21 = vrot.slane %v2737_v23, %v4133_v61 }
 0x114   : > { %v755_v55 = vmul.f32 %v4225_v43, %v746_v33  ;;  %v4230_v43 = vrot.slane %v2747_v9, %v4133_v61  ;;  %v4232_v40 = vrot.slane %v2759_v27, %v4133_v61  ;;  %v3516_v54 = vpop.permute.xlu1 %1024  ;;  %v951_v41 = vmul.f32 %v4233_v53, %v914_v45 }
 0x115   : > { %v768_v4 = vmul.f32 %v4228_v24, %v743_v37  ;;  %v779_v38 = vmul.f32 %v4229_v52, %v746_v33  ;;  %v791_v26 = vmul.f32 %v4231_v21, %v746_v33  ;;  %v798_v24 = vpop.permute.xlu0 %797  ;;  %v4234_v52 = vrot.slane %v2759_v27, %v2606_v16 }
 0x116   : > { %v780_v63 = vmul.f32 %v4230_v43, %v743_v37  ;;  %v792_v13 = vmul.f32 %v4232_v40, %v743_v37  ;;  %v757_v43 = vadd.f32 %v755_v55, %v699_v58  ;;  %v758_v20 = vadd.f32 %v756_v6, %v700_v42 }
 0x117   : > { %v963_v30 = vmul.f32 %v4234_v52, %v914_v45  ;;  %v769_v51 = vadd.f32 %v767_v25, %v711_v10  ;;  %v770_v60 = vadd.f32 %v768_v4, %v712_v39  ;;  %v781_v33 = vadd.f32 %v779_v38, %v723_v14 }
 0x118   : > { %v782_v21 = vadd.f32 %v780_v63, %v724_v2  ;;  %v793_v15 = vadd.f32 %v791_v26, %v735_v50  ;;  %v794_v61 = vadd.f32 %v792_v13, %v736_v47  ;;  %v801_v37 = vsel %vm578_vm13, %v798_v24, %v3381_v0  ;;  %v3551_v50 = vpop.permute.xlu1 %1513 }
 0x119   : > { %v804_v40 = vsel %vm578_vm13, 0.0, %v798_v24  ;;  %v4235_v53 = vrot.slane %v2724_v22, %v2770_v3  ;;  %v4236_v45 = vrot.slane %v2739_v62, %v2770_v3  ;;  %v4237_v10 = vrot.slane %v2730_v28, %v2770_v3 }
 0x11a   : > { %v4238_v63 = vrot.slane %v2745_v12, %v2770_v3  ;;  %v4239_v0 = vrot.slane %v2732_v56, %v2770_v3  ;;  %v4240_v22 = vrot.slane %v2747_v9, %v2770_v3  ;;  %v4241_v62 = vrot.slane %v2737_v23, %v2770_v3  ;;  %v1023_v56 = vpop.permute.xlu0 %1022 }
 0x11b   : > { %v813_v59 = vmul.f32 %v4235_v53, %v804_v40  ;;  %v814_v58 = vmul.f32 %v4236_v45, %v801_v37  ;;  %v825_v38 = vmul.f32 %v4237_v10, %v804_v40  ;;  %v4242_v28 = vrot.slane %v2759_v27, %v2770_v3  ;;  %v4247_v45 = vld [vmem:[#allocation13_spill] sm:$0xff]  ;;  %v4248_v10 = vld [vmem:[#allocation3_spill] sm:$0xff] }
 0x11c   : > { %v826_v14 = vmul.f32 %v4238_v63, %v801_v37  ;;  %v837_v47 = vmul.f32 %v4239_v0, %v804_v40  ;;  %v838_v42 = vmul.f32 %v4240_v22, %v801_v37  ;;  %v849_v39 = vmul.f32 %v4241_v62, %v804_v40  ;;  %v4249_v63 = vld [vmem:[#allocation15_spill] sm:$0xff]  ;;  %v4250_v0 = vld [vmem:[#allocation6_spill] sm:$0xff]  ;;  %v4251_v22 = vld [vmem:[#allocation16_spill] sm:$0xff] }
 0x11d   : > { %v850_v2 = vmul.f32 %v4242_v28, %v801_v37  ;;  %v815_v12 = vadd.f32 %v813_v59, %v757_v43  ;;  %v816_v13 = vadd.f32 %v814_v58, %v758_v20  ;;  %v827_v26 = vadd.f32 %v825_v38, %v769_v51  ;;  %v4252_v62 = vld [vmem:[#allocation8_spill] sm:$0xff] }
 0x11e   : > { %v828_v55 = vadd.f32 %v826_v14, %v770_v60  ;;  %v839_v6 = vadd.f32 %v837_v47, %v781_v33  ;;  %v840_v25 = vadd.f32 %v838_v42, %v782_v21  ;;  %v851_v4 = vadd.f32 %v849_v39, %v793_v15  ;;  %v1079_v33 = vpop.permute.xlu0 %1078 }
 0x11f   : > { %v852_v9 = vadd.f32 %v850_v2, %v794_v61  ;;  %v872_v24 = vadd.f32 %v3408_v17, %v815_v12  ;;  %v873_v52 = vadd.f32 %v871_v19, %v816_v13  ;;  %v884_v23 = vadd.f32 %v3413_v31, %v827_v26  ;;  %v4255_v12 = vld [vmem:[#allocation18_spill] sm:$0xff] }
 0x120   : > { %v885_v40 = vadd.f32 %v883_v7, %v828_v55  ;;  %v896_v27 = vadd.f32 %v3422_v29, %v839_v6  ;;  %v897_v37 = vadd.f32 %v895_v57, %v840_v25  ;;  %v908_v53 = vadd.f32 %v3427_v46, %v851_v4  ;;  %v4256_v13 = vld [vmem:[#allocation62_spill] sm:$0xff]  ;;  %v4258_v6 = vld [vmem:[#allocation24_spill] sm:$0xff] }
 0x121   : > { %v909_v59 = vadd.f32 %v907_v8, %v852_v9  ;;  %v1518_v60 = vsel %vm1402_vm15, %v3551_v50, 0.0  ;;  %v928_v51 = vadd.f32 %v3437_v5, %v872_v24  ;;  %v929_v20 = vadd.f32 %v927_v48, %v873_v52  ;;  %v4260_v9 = vld [vmem:[#allocation19_spill] sm:$0xff] }
 0x122   : > { %v940_v61 = vadd.f32 %v3442_v11, %v884_v23  ;;  %v4243_v17 = vrot.slane %v3006_v49, %v2753_v36  ;;  %v4244_v31 = vrot.slane %v3016_v44, %v2753_v36  ;;  %v4245_v46 = vrot.slane %v3026_v34, %v2753_v36  ;;  %v1081_v11 = vpop.permute.xlu1 %1080  ;;  %v4262_v23 = vld [vmem:[#allocation26_spill] sm:$0xff] }
 0x123   : > { %v4246_v5 = vrot.slane %v3044_v32, %v2753_v36  ;;  %v941_v57 = vadd.f32 %v939_v35, %v885_v40  ;;  %v952_v8 = vadd.f32 %v3451_v18, %v896_v27  ;;  %v953_v48 = vadd.f32 %v951_v41, %v897_v37  ;;  %v4253_v35 = vld [vmem:[#allocation17_spill] sm:$0xff]  ;;  %v4254_v18 = vld [vmem:[#allocation11_spill] sm:$0xff]  ;;  %v4264_v27 = vld [vmem:[#allocation20_spill] sm:$0xff] }
 0x124   : > { %v3564_v15 = vmul.f32 %v4243_v17, %v1518_v60  ;;  %v3569_v29 = vmul.f32 %v4244_v31, %v1518_v60  ;;  %v3574_v19 = vmul.f32 %v4245_v46, %v1518_v60  ;;  %v964_v43 = vadd.f32 %v3456_v1, %v908_v53  ;;  %v4266_v53 = vld [vmem:[#allocation27_spill] sm:$0xff]  ;;  %v4270_v17 = vld [vmem:[#allocation28_spill] sm:$0xff] }
 0x125   : > { %v3579_v7 = vmul.f32 %v4246_v5, %v1518_v60  ;;  %v965_v21 = vadd.f32 %v963_v30, %v909_v59  ;;  %v984_v58 = vadd.f32 %v4247_v45, %v928_v51  ;;  %v985_v38 = vadd.f32 %v4248_v10, %v929_v20  ;;  %v4268_v51 = vld [vmem:[#allocation23_spill] sm:$0xff] }
 0x126   : > { %v996_v14 = vadd.f32 %v4249_v63, %v940_v61  ;;  %v997_v47 = vadd.f32 %v4250_v0, %v941_v57  ;;  %v1008_v42 = vadd.f32 %v4251_v22, %v952_v8  ;;  %v1009_v39 = vadd.f32 %v4252_v62, %v953_v48  ;;  %v3619_v5 = vpop.permute.xlu1 %1400 }
 0x127   : > { %v1020_v28 = vadd.f32 %v4253_v35, %v964_v43  ;;  %v1021_v41 = vadd.f32 %v4254_v18, %v965_v21  ;;  %v1026_v1 = vsel %vm857_vm14, %v1023_v56, %v3516_v54  ;;  %v1029_v30 = vsel %vm857_vm14, 0.0, %v1023_v56 }
 0x128   : > { %v1082_v2 = vsel %vm857_vm14, %v1079_v33, %v1081_v11  ;;  %v4257_v26 = vrot.slane %v4255_v12, %v4256_v13  ;;  %v4259_v25 = vrot.slane %v4258_v6, %v4256_v13  ;;  %v4261_v24 = vrot.slane %v4260_v9, %v4256_v13 }
 0x129   : > { %v4263_v40 = vrot.slane %v4262_v23, %v4256_v13  ;;  %v4265_v56 = vrot.slane %v4264_v27, %v4256_v13  ;;  %v4267_v59 = vrot.slane %v4266_v53, %v4256_v13  ;;  %v4269_v20 = vrot.slane %v4268_v51, %v4256_v13 }
 0x12a   : > { %v1038_v55 = vmul.f32 %v4257_v26, %v1029_v30  ;;  %v1039_v4 = vmul.f32 %v4259_v25, %v1026_v1  ;;  %v1050_v52 = vmul.f32 %v4261_v24, %v1029_v30  ;;  %v4271_v31 = vrot.slane %v4270_v17, %v4256_v13 }
 0x12b   : > { %v1051_v54 = vmul.f32 %v4263_v40, %v1026_v1  ;;  %v1062_v37 = vmul.f32 %v4265_v56, %v1029_v30  ;;  %v1063_v60 = vmul.f32 %v4267_v59, %v1026_v1  ;;  %v1074_v61 = vmul.f32 %v4269_v20, %v1029_v30  ;;  %v3646_v56 = vpop.permute.xlu1 %1457  ;;  %v4280_v59 = vld [vmem:[#allocation37_spill] sm:$0xff]  ;;  %v4281_v20 = vld [vmem:[#allocation38_spill] sm:$0xff] }
 0x12c   : > { %v1075_v46 = vmul.f32 %v4271_v31, %v1026_v1  ;;  %v1040_v11 = vadd.f32 %v1038_v55, %v984_v58  ;;  %v1041_v57 = vadd.f32 %v1039_v4, %v985_v38  ;;  %v1052_v8 = vadd.f32 %v1050_v52, %v996_v14  ;;  %v4282_v31 = vld [vmem:[#allocation39_spill] sm:$0xff] }
 0x12d   : > { %v1053_v48 = vadd.f32 %v1051_v54, %v997_v47  ;;  %v1064_v43 = vadd.f32 %v1062_v37, %v1008_v42  ;;  %v1065_v21 = vadd.f32 %v1063_v60, %v1009_v39  ;;  %v1076_v45 = vadd.f32 %v1074_v61, %v1020_v28  ;;  %v1512_v54 = vpop.permute.xlu0 %1511 }
 0x12e   : > { %v1077_v10 = vadd.f32 %v1075_v46, %v1021_v41  ;;  %v1085_v63 = vsel %vm857_vm14, 0.0, %v1079_v33  ;;  %v4272_v0 = vrot.slane %v4258_v6, %v2753_v36  ;;  %v4273_v62 = vrot.slane %v4262_v23, %v2753_v36 }
 0x12f   : > { %v4274_v58 = vrot.slane %v4266_v53, %v2753_v36  ;;  %v4275_v14 = vrot.slane %v4255_v12, %v2753_v36  ;;  %v4276_v42 = vrot.slane %v4260_v9, %v2753_v36  ;;  %v4277_v39 = vrot.slane %v4264_v27, %v2753_v36 }
 0x130   : > { %v1095_v22 = vmul.f32 %v4272_v0, %v1082_v2  ;;  %v1107_v35 = vmul.f32 %v4273_v62, %v1082_v2  ;;  %v4278_v18 = vrot.slane %v4268_v51, %v2753_v36  ;;  %v4279_v55 = vrot.slane %v4270_v17, %v2753_v36  ;;  %v4285_v0 = vld [vmem:[#allocation31_spill] sm:$0xff] }
 0x131   : > { %v1119_v38 = vmul.f32 %v4274_v58, %v1082_v2  ;;  %v1094_v47 = vmul.f32 %v4275_v14, %v1085_v63  ;;  %v1106_v33 = vmul.f32 %v4276_v42, %v1085_v63  ;;  %v1118_v28 = vmul.f32 %v4277_v39, %v1085_v63  ;;  %v4290_v58 = vld [vmem:[#allocation43_spill] sm:$0xff]  ;;  %v4291_v14 = vld [vmem:[#allocation33_spill] sm:$0xff]  ;;  %v4292_v42 = vld [vmem:[#allocation34_spill] sm:$0xff] }
 0x132   : > { %v1130_v41 = vmul.f32 %v4278_v18, %v1085_v63  ;;  %v1097_v1 = vadd.f32 %v1095_v22, %v1041_v57  ;;  %v1109_v30 = vadd.f32 %v1107_v35, %v1053_v48  ;;  %v1131_v25 = vmul.f32 %v4279_v55, %v1082_v2  ;;  %v4283_v57 = vld [vmem:[#allocation29_spill] sm:$0xff]  ;;  %v4289_v35 = vld [vmem:[#allocation42_spill] sm:$0xff]  ;;  %v4293_v39 = vld [vmem:[#allocation35_spill] sm:$0xff] }
 0x133   : > { %v1121_v26 = vadd.f32 %v1119_v38, %v1065_v21  ;;  %v1096_v4 = vadd.f32 %v1094_v47, %v1040_v11  ;;  %v1108_v24 = vadd.f32 %v1106_v33, %v1052_v8  ;;  %v1120_v52 = vadd.f32 %v1118_v28, %v1064_v43  ;;  %v4284_v21 = vld [vmem:[#allocation30_spill] sm:$0xff]  ;;  %v4286_v11 = vld [vmem:[#allocation32_spill] sm:$0xff]  ;;  %v4288_v22 = vld [vmem:[#allocation41_spill] sm:$0xff] }
 0x134   : > { %v1132_v40 = vadd.f32 %v1130_v41, %v1076_v45  ;;  %v1133_v37 = vadd.f32 %v1131_v25, %v1077_v10  ;;  %v1145_v60 = vadd.f32 %v4280_v59, %v1097_v1  ;;  %v1157_v61 = vadd.f32 %v4281_v20, %v1109_v30  ;;  %v4287_v43 = vld [vmem:[#allocation40_spill] sm:$0xff] }
 0x135   : > { %v1169_v46 = vadd.f32 %v4282_v31, %v1121_v26  ;;  %v1144_v48 = vadd.f32 %v4283_v57, %v1096_v4  ;;  %v1156_v63 = vadd.f32 %v4284_v21, %v1108_v24  ;;  %v1168_v2 = vadd.f32 %v4285_v0, %v1120_v52  ;;  %v4294_v18 = vld [vmem:[#allocation36_spill] sm:$0xff]  ;;  %v4296_v26 = vld [vmem:[#allocation9_spill] sm:$0xff]  ;;  %v3677_v57 = vpop.permute.xlu0 %1679  ;;  %v4304_v0 = vld [vmem:[#allocation46_spill] sm:$0xff] }
 0x136   : > { %v1180_v8 = vadd.f32 %v4286_v11, %v1132_v40  ;;  %v1181_v45 = vadd.f32 %v4287_v43, %v1133_v37  ;;  %v1193_v62 = vadd.f32 %v4288_v22, %v1145_v60  ;;  %v1205_v10 = vadd.f32 %v4289_v35, %v1157_v61  ;;  %v4295_v1 = vld [vmem:[#allocation44_spill] sm:$0xff]  ;;  %v4300_v40 = vld [vmem:[#allocation5_spill] sm:$0xff]  ;;  %v4306_v43 = vld [vmem:[#allocation50_spill] sm:$0xff] }
 0x137   : > { %v1217_v38 = vadd.f32 %v4290_v58, %v1169_v46  ;;  %v1192_v47 = vadd.f32 %v4291_v14, %v1144_v48  ;;  %v1204_v33 = vadd.f32 %v4292_v42, %v1156_v63  ;;  %v1216_v28 = vadd.f32 %v4293_v39, %v1168_v2  ;;  %v4298_v4 = vld [vmem:[#allocation4_spill] sm:$0xff]  ;;  %v3679_v48 = vpop.permute.xlu1 %1569  ;;  %v4307_v22 = vld [vmem:[#allocation45_spill] sm:$0xff]  ;;  %v4308_v35 = vld [vmem:[#allocation47_spill] sm:$0xff] }
 0x138   : > { %v1228_v41 = vadd.f32 %v4294_v18, %v1180_v8  ;;  %v1229_v30 = vadd.f32 %v4295_v1, %v1181_v45  ;;  %v4297_v55 = vcombine.high %v4296_v26, %v4296_v26  ;;  %v4299_v24 = vcombine.high %v4298_v4, %v4298_v4  ;;  %v4302_v31 = vld [vmem:[#allocation12_spill] sm:$0xff]  ;;  %v4309_v58 = vld [vmem:[#allocation49_spill] sm:$0xff]  ;;  %v4310_v14 = vld [vmem:[#allocation51_spill] sm:$0xff] }
 0x139   : > { %v4301_v37 = vcombine.high %v4300_v40, %v4300_v40  ;;  %v1246_v60 = vadd.f32 %v4296_v26, %v1192_v47  ;;  %v1264_v20 = vadd.f32 %v4298_v4, %v1204_v33  ;;  %v1282_v61 = vadd.f32 %v4300_v40, %v1216_v28  ;;  %v4305_v11 = vld [vmem:[#allocation48_spill] sm:$0xff]  ;;  %v4312_v39 = vld [vmem:[#allocation54_spill] sm:$0xff]  ;;  %v4315_v26 = vld [vmem:[#allocation53_spill] sm:$0xff] }
 0x13a   : > { %v1247_v25 = vadd.f32 %v4297_v55, %v1193_v62  ;;  %v1265_v52 = vadd.f32 %v4299_v24, %v1205_v10  ;;  %v1300_v46 = vadd.f32 %v4302_v31, %v1228_v41  ;;  %v4303_v21 = vcombine.high %v4302_v31, %v4302_v31  ;;  %v4311_v42 = vld [vmem:[#allocation52_spill] sm:$0xff]  ;;  %v4314_v1 = vld [vmem:[#allocation58_spill] sm:$0xff]  ;;  %v4317_v24 = vld [vmem:[#allocation57_spill] sm:$0xff] }
 0x13b   : > { %v1283_v59 = vadd.f32 %v4301_v37, %v1217_v38  ;;  %v1312_v62 = vadd.f32 %v4307_v22, %v1246_v60  ;;  %v1324_v10 = vadd.f32 %v4308_v35, %v1264_v20  ;;  %v1336_v38 = vadd.f32 %v4309_v58, %v1282_v61  ;;  %v4313_v18 = vld [vmem:[#allocation56_spill] sm:$0xff]  ;;  %v4318_v40 = vld [vmem:[#allocation59_spill] sm:$0xff] }
 0x13c   : > { %v1301_v63 = vadd.f32 %v4303_v21, %v1229_v30  ;;  %v1313_v2 = vadd.f32 %v4304_v0, %v1247_v25  ;;  %v1325_v8 = vadd.f32 %v4305_v11, %v1265_v52  ;;  %v1348_v47 = vadd.f32 %v4310_v14, %v1300_v46  ;;  %v4316_v25 = vld [vmem:[#allocation55_spill] sm:$0xff]  ;;  %v4321_v21 = vld [vmem:[#allocation61_spill] sm:$0xff] }
 0x13d   : > { %v1337_v45 = vadd.f32 %v4306_v43, %v1283_v59  ;;  %v1360_v55 = vadd.f32 %v4315_v26, %v1312_v62  ;;  %v1372_v4 = vadd.f32 %v4316_v25, %v1324_v10  ;;  %v1384_v52 = vadd.f32 %v4317_v24, %v1336_v38  ;;  %v4319_v59 = vld [vmem:[#allocation60_spill] sm:$0xff]  ;;  %v4320_v20 = vld [vmem:[#allocation71_spill] sm:$0xff]  ;;  %v3721_v62 = vpop.permute.xlu1 %1794  ;;  %v4332_v26 = vld [vmem:[#allocation10_spill] sm:$0xff] }
 0x13e   : > { %v1349_v33 = vadd.f32 %v4311_v42, %v1301_v63  ;;  %v1361_v28 = vadd.f32 %v4312_v39, %v1313_v2  ;;  %v1373_v41 = vadd.f32 %v4313_v18, %v1325_v8  ;;  %v1396_v37 = vadd.f32 %v4318_v40, %v1348_v47  ;;  %v4330_v18 = vld [vmem:[#allocation2_spill] sm:$0xff]  ;;  %v4334_v24 = vld [vmem:[#allocation7_spill] sm:$0xff] }
 0x13f   : > { %v1385_v30 = vadd.f32 %v4314_v1, %v1337_v45  ;;  %v1403_v61 = vsel %vm1402_vm15, %v4320_v20, %v3619_v5  ;;  %v1406_v31 = vsel %vm1402_vm15, %v3619_v5, 0.0  ;;  %v1515_v46 = vsel %vm1402_vm15, %v1512_v54, %v3551_v50  ;;  %v3719_v5 = vpop.permute.xlu0 %1736 }
 0x140   : > { %v1397_v60 = vadd.f32 %v4319_v59, %v1349_v33  ;;  %v4322_v63 = vrot.slane %v4255_v12, %v4321_v21  ;;  %v4323_v2 = vrot.slane %v4258_v6, %v4321_v21  ;;  %v4324_v8 = vrot.slane %v4260_v9, %v4321_v21 }
 0x141   : > { %v4325_v45 = vrot.slane %v4262_v23, %v4321_v21  ;;  %v4326_v50 = vrot.slane %v4264_v27, %v4321_v21  ;;  %v4327_v6 = vrot.slane %v4266_v53, %v4321_v21  ;;  %v4328_v9 = vrot.slane %v4268_v51, %v4321_v21 }
 0x142   : > { %v1415_v0 = vmul.f32 %v4322_v63, %v1403_v61  ;;  %v1416_v11 = vmul.f32 %v4323_v2, %v1406_v31  ;;  %v1427_v43 = vmul.f32 %v4324_v8, %v1403_v61  ;;  %v4329_v23 = vrot.slane %v4270_v17, %v4321_v21  ;;  %v1626_v2 = vpop.permute.xlu1 %1625 }
 0x143   : > { %v1428_v22 = vmul.f32 %v4325_v45, %v1406_v31  ;;  %v1439_v12 = vmul.f32 %v4326_v50, %v1403_v61  ;;  %v1440_v54 = vmul.f32 %v4327_v6, %v1406_v31  ;;  %v1451_v35 = vmul.f32 %v4328_v9, %v1403_v61 }
 0x144   : > { %v1452_v10 = vmul.f32 %v4329_v23, %v1406_v31  ;;  %v1417_v58 = vadd.f32 %v1415_v0, %v1360_v55  ;;  %v1418_v38 = vadd.f32 %v1416_v11, %v1361_v28  ;;  %v1429_v14 = vadd.f32 %v1427_v43, %v1372_v4  ;;  %v4336_v55 = vld [vmem:[#allocation14_spill] sm:$0xff]  ;;  %v1568_v0 = vpop.permute.xlu0 %1567 }
 0x145   : > { %v1430_v47 = vadd.f32 %v1428_v22, %v1373_v41  ;;  %v1441_v42 = vadd.f32 %v1439_v12, %v1384_v52  ;;  %v1442_v33 = vadd.f32 %v1440_v54, %v1385_v30  ;;  %v1453_v27 = vadd.f32 %v1451_v35, %v1396_v37  ;;  %v4338_v30 = vld [vmem:[#allocation74_spill] sm:$0xff] }
 0x146   : > { %v1454_v39 = vadd.f32 %v1452_v10, %v1397_v60  ;;  %v4331_v53 = vrot.slane %v4330_v18, %v2753_v36  ;;  %v4333_v51 = vrot.slane %v4332_v26, %v2753_v36  ;;  %v4335_v17 = vrot.slane %v4334_v24, %v2753_v36 }
 0x147   : > { %v4337_v28 = vrot.slane %v4336_v55, %v2753_v36  ;;  %v1459_v4 = vsel %vm1402_vm15, %v4338_v30, %v3646_v56  ;;  %v1462_v52 = vsel %vm1402_vm15, %v3646_v56, 0.0  ;;  %v1574_v37 = vsel %vm1402_vm15, %v3679_v48, 0.0 }
 0x148   : > { %v1527_v1 = vmul.f32 %v4331_v53, %v1515_v46  ;;  %v1539_v25 = vmul.f32 %v4333_v51, %v1515_v46  ;;  %v1551_v40 = vmul.f32 %v4335_v17, %v1515_v46  ;;  %v1799_v59 = vsel %vm1683_vm0, %v3721_v62, 0.0 }
 0x149   : > { %v1563_v41 = vmul.f32 %v4337_v28, %v1515_v46  ;;  %v4339_v60 = vrot.slane %v4330_v18, %v4256_v13  ;;  %v4340_v36 = vrot.slane %v3006_v49, %v4256_v13  ;;  %v4341_v31 = vrot.slane %v4332_v26, %v4256_v13 }
 0x14a   : > { %v4342_v56 = vrot.slane %v3016_v44, %v4256_v13  ;;  %v4343_v11 = vrot.slane %v4334_v24, %v4256_v13  ;;  %v4344_v43 = vrot.slane %v3026_v34, %v4256_v13  ;;  %v4345_v22 = vrot.slane %v4336_v55, %v4256_v13 }
 0x14b   : > { %v1471_v20 = vmul.f32 %v4339_v60, %v1459_v4  ;;  %v1472_v61 = vmul.f32 %v4340_v36, %v1462_v52  ;;  %v1483_v46 = vmul.f32 %v4341_v31, %v1459_v4  ;;  %v4346_v12 = vrot.slane %v3044_v32, %v4256_v13  ;;  %v4347_v60 = vld [vmem:[#allocation21_spill] sm:$0xff] }
 0x14c   : > { %v1484_v63 = vmul.f32 %v4342_v56, %v1462_v52  ;;  %v1495_v8 = vmul.f32 %v4343_v11, %v1459_v4  ;;  %v1496_v45 = vmul.f32 %v4344_v43, %v1462_v52  ;;  %v1507_v50 = vmul.f32 %v4345_v22, %v1459_v4 }
 0x14d   : > { %v1508_v6 = vmul.f32 %v4346_v12, %v1462_v52  ;;  %v1473_v54 = vadd.f32 %v1471_v20, %v1417_v58  ;;  %v1474_v9 = vadd.f32 %v1472_v61, %v1418_v38  ;;  %v1485_v35 = vadd.f32 %v1483_v46, %v1429_v14  ;;  %v1682_v61 = vpop.permute.xlu1 %1681 }
 0x14e   : > { %v1486_v23 = vadd.f32 %v1484_v63, %v1430_v47  ;;  %v1497_v10 = vadd.f32 %v1495_v8, %v1441_v42  ;;  %v1498_v53 = vadd.f32 %v1496_v45, %v1442_v33  ;;  %v1509_v51 = vadd.f32 %v1507_v50, %v1453_v27 }
 0x14f   : > { %v1510_v17 = vadd.f32 %v1508_v6, %v1454_v39  ;;  %v1530_v28 = vadd.f32 %v3564_v15, %v1474_v9  ;;  %v4348_v36 = vrot.slane %v3006_v49, %v4347_v60  ;;  %v4349_v31 = vrot.slane %v3016_v44, %v4347_v60 }
 0x150   : > { %v1542_v30 = vadd.f32 %v3569_v29, %v1486_v23  ;;  %v1554_v58 = vadd.f32 %v3574_v19, %v1498_v53  ;;  %v4350_v14 = vrot.slane %v3026_v34, %v4347_v60  ;;  %v4351_v15 = vrot.slane %v3044_v32, %v4347_v60 }
 0x151   : > { %v1584_v4 = vmul.f32 %v4348_v36, %v1574_v37  ;;  %v1596_v52 = vmul.f32 %v4349_v31, %v1574_v37  ;;  %v1566_v38 = vadd.f32 %v3579_v7, %v1510_v17  ;;  %v4352_v27 = vrot.slane %v3006_v49, %v2606_v16  ;;  %v1624_v7 = vpop.permute.xlu0 %1623 }
 0x152   : > { %v1608_v47 = vmul.f32 %v4350_v14, %v1574_v37  ;;  %v1620_v29 = vmul.f32 %v4351_v15, %v1574_v37  ;;  %v4353_v19 = vrot.slane %v3016_v44, %v2606_v16  ;;  %v4354_v63 = vrot.slane %v3026_v34, %v2606_v16 }
 0x153   : > { %v1586_v42 = vadd.f32 %v1584_v4, %v1530_v28  ;;  %v1598_v33 = vadd.f32 %v1596_v52, %v1542_v30  ;;  %v3799_v39 = vmul.f32 %v4352_v27, %v1799_v59  ;;  %v4355_v11 = vrot.slane %v3044_v32, %v2606_v16 }
 0x154   : > { %v3804_v20 = vmul.f32 %v4353_v19, %v1799_v59  ;;  %v1610_v46 = vadd.f32 %v1608_v47, %v1554_v58  ;;  %v1622_v56 = vadd.f32 %v1620_v29, %v1566_v38  ;;  %v3809_v37 = vmul.f32 %v4354_v63, %v1799_v59  ;;  %v1739_v47 = vpop.permute.xlu1 %1738 }
 0x155   : > { %v3814_v8 = vmul.f32 %v4355_v11, %v1799_v59  ;;  %v1529_v43 = vadd.f32 %v1527_v1, %v1473_v54  ;;  %v1541_v45 = vadd.f32 %v1539_v25, %v1485_v35  ;;  %v1553_v22 = vadd.f32 %v1551_v40, %v1497_v10 }
 0x156   : > { %v1565_v50 = vadd.f32 %v1563_v41, %v1509_v51  ;;  %v1571_v12 = vsel %vm1402_vm15, %v1568_v0, %v3679_v48  ;;  %v1630_v6 = vsel %vm1402_vm15, %v1626_v2, 0.0  ;;  %v1627_v9 = vsel %vm1402_vm15, %v1624_v7, %v1626_v2  ;;  %v4360_v0 = vld [vmem:[#allocation22_spill] sm:$0xff] }
 0x157   : > { %v1684_v23 = vsel %vm1683_vm0, %v3677_v57, %v1682_v61  ;;  %v4356_v53 = vrot.slane %v4330_v18, %v4347_v60  ;;  %v4357_v1 = vrot.slane %v4332_v26, %v4347_v60  ;;  %v4358_v40 = vrot.slane %v4334_v24, %v4347_v60 }
 0x158   : > { %v4359_v48 = vrot.slane %v4336_v55, %v4347_v60  ;;  %v4361_v2 = vrot.slane %v3006_v49, %v4360_v0  ;;  %v4362_v54 = vrot.slane %v3016_v44, %v4360_v0  ;;  %v4363_v10 = vrot.slane %v3026_v34, %v4360_v0 }
 0x159   : > { %v1583_v17 = vmul.f32 %v4356_v53, %v1571_v12  ;;  %v1595_v25 = vmul.f32 %v4357_v1, %v1571_v12  ;;  %v1607_v41 = vmul.f32 %v4358_v40, %v1571_v12  ;;  %v4364_v28 = vrot.slane %v3044_v32, %v4360_v0 }
 0x15a   : > { %v1619_v59 = vmul.f32 %v4359_v48, %v1571_v12  ;;  %v1640_v57 = vmul.f32 %v4361_v2, %v1630_v6  ;;  %v1652_v35 = vmul.f32 %v4362_v54, %v1630_v6  ;;  %v1664_v51 = vmul.f32 %v4363_v10, %v1630_v6  ;;  %v1793_v12 = vpop.permute.xlu0 %1792 }
 0x15b   : > { %v1676_v30 = vmul.f32 %v4364_v28, %v1630_v6  ;;  %v1585_v36 = vadd.f32 %v1583_v17, %v1529_v43  ;;  %v1597_v4 = vadd.f32 %v1595_v25, %v1541_v45  ;;  %v1609_v60 = vadd.f32 %v1607_v41, %v1553_v22 }
 0x15c   : > { %v1621_v31 = vadd.f32 %v1619_v59, %v1565_v50  ;;  %v1642_v52 = vadd.f32 %v1640_v57, %v1586_v42  ;;  %v1654_v58 = vadd.f32 %v1652_v35, %v1598_v33  ;;  %v1666_v38 = vadd.f32 %v1664_v51, %v1610_v46 }
 0x15d   : > { %v1678_v14 = vadd.f32 %v1676_v30, %v1622_v56  ;;  %v4365_v15 = vrot.slane %v4330_v18, %v4360_v0  ;;  %v4366_v27 = vrot.slane %v4332_v26, %v4360_v0  ;;  %v4367_v7 = vrot.slane %v4334_v24, %v4360_v0 }
 0x15e   : > { %v4368_v11 = vrot.slane %v4336_v55, %v4360_v0  ;;  %v1687_v33 = vsel %vm1683_vm0, %v1682_v61, 0.0  ;;  %v4369_v46 = vrot.slane %v4330_v18, %v2770_v3  ;;  %v4370_v43 = vrot.slane %v4332_v26, %v2770_v3 }
 0x15f   : > { %v1639_v29 = vmul.f32 %v4365_v15, %v1627_v9  ;;  %v1651_v19 = vmul.f32 %v4366_v27, %v1627_v9  ;;  %v1663_v63 = vmul.f32 %v4367_v7, %v1627_v9  ;;  %v4371_v22 = vrot.slane %v4334_v24, %v2770_v3 }
 0x160   : > { %v1675_v42 = vmul.f32 %v4368_v11, %v1627_v9  ;;  %v1696_v56 = vmul.f32 %v4369_v46, %v1684_v23  ;;  %v1708_v45 = vmul.f32 %v4370_v43, %v1684_v23  ;;  %v4372_v61 = vrot.slane %v3006_v49, %v2770_v3 }
 0x161   : > { %v1720_v50 = vmul.f32 %v4371_v22, %v1684_v23  ;;  %v1641_v6 = vadd.f32 %v1639_v29, %v1585_v36  ;;  %v1653_v53 = vadd.f32 %v1651_v19, %v1597_v4  ;;  %v1665_v17 = vadd.f32 %v1663_v63, %v1609_v60  ;;  %v1851_v4 = vpop.permute.xlu1 %1850  ;;  %v1849_v19 = vpop.permute.xlu0 %1848 }
 0x162   : > { %v1677_v1 = vadd.f32 %v1675_v42, %v1621_v31  ;;  %v1697_v9 = vmul.f32 %v4372_v61, %v1687_v33  ;;  %v4373_v25 = vrot.slane %v3016_v44, %v2770_v3  ;;  %v4374_v41 = vrot.slane %v3026_v34, %v2770_v3 }
 0x163   : > { %v4375_v59 = vrot.slane %v4336_v55, %v2770_v3  ;;  %v1698_v2 = vadd.f32 %v1696_v56, %v1641_v6  ;;  %v1710_v57 = vadd.f32 %v1708_v45, %v1653_v53  ;;  %v1722_v54 = vadd.f32 %v1720_v50, %v1665_v17 }
 0x164   : > { %v1709_v40 = vmul.f32 %v4373_v25, %v1687_v33  ;;  %v1721_v48 = vmul.f32 %v4374_v41, %v1687_v33  ;;  %v4376_v35 = vrot.slane %v3044_v32, %v2770_v3  ;;  %v1699_v51 = vadd.f32 %v1697_v9, %v1642_v52 }
 0x165   : > { %v1732_v0 = vmul.f32 %v4375_v59, %v1684_v23  ;;  %v1796_v31 = vsel %vm1683_vm0, %v1793_v12, %v3721_v62  ;;  %v1740_v15 = vsel %vm1683_vm0, %v3719_v5, %v1739_v47  ;;  %v1743_v23 = vsel %vm1683_vm0, %v1739_v47, 0.0  ;;  %v4381_v5 = vld [vmem:[#allocation25_spill] sm:$0xff]  ;;  %v1907_v59 = vpop.permute.xlu1 %1906 }
 0x166   : > { %v1733_v10 = vmul.f32 %v4376_v35, %v1687_v33  ;;  %v1711_v28 = vadd.f32 %v1709_v40, %v1654_v58  ;;  %v1723_v30 = vadd.f32 %v1721_v48, %v1666_v38  ;;  %v4377_v29 = vrot.slane %v4330_v18, %v2606_v16 }
 0x167   : > { %v1734_v36 = vadd.f32 %v1732_v0, %v1677_v1  ;;  %v4378_v3 = vrot.slane %v4332_v26, %v2606_v16  ;;  %v4379_v58 = vrot.slane %v4334_v24, %v2606_v16  ;;  %v4380_v62 = vrot.slane %v4336_v55, %v2606_v16 }
 0x168   : > { %v1735_v60 = vadd.f32 %v1733_v10, %v1678_v14  ;;  %v1808_v27 = vmul.f32 %v4377_v29, %v1796_v31  ;;  %v4382_v47 = vrot.slane %v4330_v18, %v4381_v5  ;;  %v4383_v63 = vrot.slane %v3006_v49, %v4381_v5 }
 0x169   : > { %v1820_v52 = vmul.f32 %v4378_v3, %v1796_v31  ;;  %v1832_v38 = vmul.f32 %v4379_v58, %v1796_v31  ;;  %v1844_v14 = vmul.f32 %v4380_v62, %v1796_v31  ;;  %v4384_v42 = vrot.slane %v4332_v26, %v4381_v5 }
 0x16a   : > { %v1752_v7 = vmul.f32 %v4382_v47, %v1740_v15  ;;  %v1753_v11 = vmul.f32 %v4383_v63, %v1743_v23  ;;  %v4385_v46 = vrot.slane %v3016_v44, %v4381_v5  ;;  %v4386_v16 = vrot.slane %v4334_v24, %v4381_v5 }
 0x16b   : > { %v1764_v33 = vmul.f32 %v4384_v42, %v1740_v15  ;;  %v4387_v45 = vrot.slane %v3026_v34, %v4381_v5  ;;  %v4388_v50 = vrot.slane %v4336_v55, %v4381_v5  ;;  %v4389_v6 = vrot.slane %v3044_v32, %v4381_v5 }
 0x16c   : > { %v1765_v56 = vmul.f32 %v4385_v46, %v1743_v23  ;;  %v1776_v43 = vmul.f32 %v4386_v16, %v1740_v15  ;;  %v1754_v17 = vadd.f32 %v1752_v7, %v1698_v2  ;;  %v1755_v1 = vadd.f32 %v1753_v11, %v1699_v51  ;;  %v1905_v51 = vpop.permute.xlu0 %1904  ;;  %v4398_v11 = vld [vmem:[#allocation63_spill] sm:$0xff]  ;;  %v4404_v16 = vld [vmem:[#allocation66_spill] sm:$0xff] }
 0x16d   : > { %v1777_v22 = vmul.f32 %v4387_v45, %v1743_v23  ;;  %v1788_v12 = vmul.f32 %v4388_v50, %v1740_v15  ;;  %v1789_v53 = vmul.f32 %v4389_v6, %v1743_v23  ;;  %v1766_v61 = vadd.f32 %v1764_v33, %v1710_v57  ;;  %v4400_v33 = vld [vmem:[#allocation64_spill] sm:$0xff] }
 0x16e   : > { %v1767_v9 = vadd.f32 %v1765_v56, %v1711_v28  ;;  %v1778_v25 = vadd.f32 %v1776_v43, %v1722_v54  ;;  %v1810_v0 = vadd.f32 %v1808_v27, %v1754_v17  ;;  %v1811_v35 = vadd.f32 %v3799_v39, %v1755_v1  ;;  %v4402_v56 = vld [vmem:[#allocation65_spill] sm:$0xff]  ;;  %v4408_v6 = vld [vmem:[#allocation68_spill] sm:$0xff] }
 0x16f   : > { %v1779_v40 = vadd.f32 %v1777_v22, %v1723_v30  ;;  %v1790_v41 = vadd.f32 %v1788_v12, %v1734_v36  ;;  %v1791_v48 = vadd.f32 %v1789_v53, %v1735_v60  ;;  %v1822_v10 = vadd.f32 %v1820_v52, %v1766_v61  ;;  %v4406_v22 = vld [vmem:[#allocation67_spill] sm:$0xff]  ;;  %v4410_v1 = vld [vmem:[#allocation69_spill] sm:$0xff] }
 0x170   : > { %v1823_v31 = vadd.f32 %v3804_v20, %v1767_v9  ;;  %v1834_v15 = vadd.f32 %v1832_v38, %v1778_v25  ;;  %v1852_v57 = vsel %vm1683_vm0, %v1849_v19, %v1851_v4  ;;  %v1855_v54 = vsel %vm1683_vm0, %v1851_v4, 0.0  ;;  %v4412_v25 = vld [vmem:[#allocation70_spill] sm:$0xff] }
 0x171   : > { %v1835_v29 = vadd.f32 %v3809_v37, %v1779_v40  ;;  %v1846_v3 = vadd.f32 %v1844_v14, %v1790_v41  ;;  %v1847_v2 = vadd.f32 %v3814_v8, %v1791_v48  ;;  %v1908_v28 = vsel %vm1683_vm0, %v1905_v51, %v1907_v59  ;;  %v4415_v51 = vld [vmem:[#allocation76_spill] sm:$0xff] }
 0x172   : > { %v1911_v30 = vsel %vm1683_vm0, %v1907_v59, 0.0  ;;  %v4390_v39 = vrot.slane %v4330_v18, %v4321_v21  ;;  %v4391_v20 = vrot.slane %v3006_v49, %v4321_v21  ;;  %v4392_v8 = vrot.slane %v4332_v26, %v4321_v21 }
 0x173   : > { %v4393_v23 = vrot.slane %v3016_v44, %v4321_v21  ;;  %v4394_v27 = vrot.slane %v4334_v24, %v4321_v21  ;;  %v4395_v18 = vrot.slane %v3026_v34, %v4321_v21  ;;  %v4396_v49 = vrot.slane %v4336_v55, %v4321_v21 }
 0x174   : > { %v1864_v36 = vmul.f32 %v4390_v39, %v1852_v57  ;;  %v1865_v37 = vmul.f32 %v4391_v20, %v1855_v54  ;;  %v1876_v60 = vmul.f32 %v4392_v8, %v1852_v57  ;;  %v4397_v26 = vrot.slane %v3044_v32, %v4321_v21  ;;  %v4417_v39 = vld [vmem:[#allocation80_spill] sm:$0xff]  ;;  %v4419_v20 = vld [vmem:[#allocation73_spill] sm:$0xff] }
 0x175   : > { %v1877_v4 = vmul.f32 %v4393_v23, %v1855_v54  ;;  %v1888_v52 = vmul.f32 %v4394_v27, %v1852_v57  ;;  %v1889_v58 = vmul.f32 %v4395_v18, %v1855_v54  ;;  %v1900_v38 = vmul.f32 %v4396_v49, %v1852_v57  ;;  %v4420_v23 = vld [vmem:[#allocation77_spill] sm:$0xff]  ;;  %v4421_v27 = vld [vmem:[#allocation78_spill] sm:$0xff] }
 0x176   : > { %v1901_v62 = vmul.f32 %v4397_v26, %v1855_v54  ;;  %v1866_v14 = vadd.f32 %v1864_v36, %v1810_v0  ;;  %v1867_v19 = vadd.f32 %v1865_v37, %v1811_v35  ;;  %v1878_v44 = vadd.f32 %v1876_v60, %v1822_v10  ;;  %v4416_v54 = vld [vmem:[#allocation79_spill] sm:$0xff] }
 0x177   : > { %v1879_v5 = vadd.f32 %v1877_v4, %v1823_v31  ;;  %v1890_v47 = vadd.f32 %v1888_v52, %v1834_v15  ;;  %v1891_v24 = vadd.f32 %v1889_v58, %v1835_v29  ;;  %v1902_v7 = vadd.f32 %v1900_v38, %v1846_v3  ;;  %v4414_v3 = vld [vmem:[#allocation75_spill] sm:$0xff] }
 0x178   : > { %v1903_v63 = vadd.f32 %v1901_v62, %v1847_v2  ;;  %v4399_v34 = vrot.slane %v4398_v11, %v4256_v13  ;;  %v4401_v55 = vrot.slane %v4400_v33, %v4256_v13  ;;  %v4403_v32 = vrot.slane %v4402_v56, %v4256_v13 }
 0x179   : > { %v4405_v43 = vrot.slane %v4404_v16, %v4256_v13  ;;  %v4407_v50 = vrot.slane %v4406_v22, %v4256_v13  ;;  %v4409_v53 = vrot.slane %v4408_v6, %v4256_v13  ;;  %v4411_v61 = vrot.slane %v4410_v1, %v4256_v13 }
 0x17a   : > { %v1920_v42 = vmul.f32 %v4399_v34, %v1908_v28  ;;  %v1921_v46 = vmul.f32 %v4401_v55, %v1911_v30  ;;  %v1932_v21 = vmul.f32 %v4403_v32, %v1908_v28  ;;  %v4413_v40 = vrot.slane %v4412_v25, %v4256_v13  ;;  %v4418_v13 = vld [vmem:[#allocation72_spill] sm:$0xff] }
 0x17b   : > { %v1933_v45 = vmul.f32 %v4405_v43, %v1911_v30  ;;  %v1944_v12 = vmul.f32 %v4407_v50, %v1908_v28  ;;  %v1945_v17 = vmul.f32 %v4409_v53, %v1911_v30  ;;  %v1956_v9 = vmul.f32 %v4411_v61, %v1908_v28 }
 0x17c   : > { %v1957_v41 = vmul.f32 %v4413_v40, %v1911_v30  ;;  %v1922_v48 = vadd.f32 %v1920_v42, %v1866_v14  ;;  %v1923_v59 = vadd.f32 %v1921_v46, %v1867_v19  ;;  %v1934_v0 = vadd.f32 %v1932_v21, %v1878_v44 }
 0x17d   : > { %v1935_v35 = vadd.f32 %v1933_v45, %v1879_v5  ;;  %v1946_v10 = vadd.f32 %v1944_v12, %v1890_v47  ;;  %v1947_v31 = vadd.f32 %v1945_v17, %v1891_v24  ;;  %v1958_v15 = vadd.f32 %v1956_v9, %v1902_v7 }
 0x17e   : > { %v1959_v29 = vadd.f32 %v1957_v41, %v1903_v63  ;;  %v1962_v2 = vmul.f32 %v4414_v3, %v1934_v0  ;;  %v1960_v30 = vmul.f32 %v4418_v13, %v1922_v48  ;;  %v1961_v37 = vmul.f32 %v4419_v20, %v1923_v59 }
 0x17f   : > { %v1963_v57 = vmul.f32 %v4415_v51, %v1935_v35  ;;  %v1966_v28 = vmul.f32 %v4416_v54, %v1958_v15  ;;  %v1964_v4 = vmul.f32 %v4420_v23, %v1946_v10  ;;  %v1965_v52 = vmul.f32 %v4421_v27, %v1947_v31 }
 0x180   : > { %v1967_v36 = vmul.f32 %v4417_v39, %v1959_v29  ;;  %v1970_v8 = vrot.slane %v1962_v2, 4 }
 0x181   : > { %v1971_v60 = vrot.slane %v1963_v57, 4  ;;  %v1976_v18 = vrot.slane %v1966_v28, 4 }
 0x182   : > { %v1977_v58 = vrot.slane %v1967_v36, 4  ;;  %v1981_v49 = vsel %vm1980_vm1, %v1960_v30, %v1970_v8 }
 0x183   : > { %v1982_v38 = vsel %vm1980_vm1, %v1961_v37, %v1971_v60  ;;  %v1983_v26 = vsel %vm1980_vm1, %v1964_v4, %v1976_v18  ;;  %1985 = vst [vmem:[%s163_s30] sm:$0xff] %v1981_v49 }
 0x184   : > { %v1984_v62 = vsel %vm1980_vm1, %v1965_v52, %v1977_v58  ;;  %1986 = vst [vmem:[%s163_s30 + $0x8] sm:$0xff] %v1982_v38  ;;  %1987 = vst [vmem:[%s163_s30 + $0x10] sm:$0xff] %v1983_v26 }
 0x185   : > { %1988 = vst [vmem:[%s163_s30 + $0x18] sm:$0xff] %v1984_v62 }
 0x186 PF: > { %s12_s9 = sadd.s32 1, %s2200_s9  }
 0x187   : > { %p9_p4 = scmp.ge.s32.totalorder %s12_s9, 4  }
 0x189   :  { %11 = sbr.rel (!%p9_p4) target bundleno = 1 (0x1), region = 64 }

</bundles_post_ra>
